<compile_context>
chip_gen: v6e
topology: v6e:2x2x1
jax: 0.10.0
libtpu: 0.0.40
codegen_flags: <defaults>
</compile_context>

<pallas_src>
import functools

import jax
import jax.numpy as jnp
import numpy as np
from jax.experimental import pallas as pl
from jax.experimental.pallas import tpu as pltpu


def _round_up(x, m):
    return ((x + m - 1) // m) * m


# ----------------------------- in-kernel math helpers -----------------------------

def _softplus(x):
    # matches torch.nn.functional.softplus(beta=1, threshold=20)
    return jnp.where(x > 20.0, x, jnp.log(1.0 + jnp.exp(jnp.minimum(x, 20.0))))


def _softmax(x, axis):
    x = x - jnp.max(x, axis=axis, keepdims=True)
    e = jnp.exp(x)
    return e * pl.reciprocal(jnp.sum(e, axis=axis, keepdims=True), approx=True)


def _address(k, beta, g, s, gamma, w_prev, mem):
    """NTMMemory.address: content -> interpolate -> shift -> sharpen."""
    # content addressing (torch.cosine_similarity, eps=1e-8; +1e-16 like pytorch-ntm)
    k_e = k + 1e-16                                        # (B, M)
    mem_e = mem + 1e-16                                    # (B, N, M)
    dot = jnp.sum(mem_e * k_e[:, None, :], axis=-1)        # (B, N)
    k_ss = jnp.sum(k_e * k_e, axis=-1, keepdims=True)      # (B, 1)
    m_ss = jnp.sum(mem_e * mem_e, axis=-1)                 # (B, N)
    cos = dot * jax.lax.rsqrt(jnp.maximum(k_ss, 1e-16)) \
              * jax.lax.rsqrt(jnp.maximum(m_ss, 1e-16))
    wc = _softmax(beta * cos, axis=1)
    # interpolation
    wg = g * wc + (1.0 - g) * w_prev
    # circular 3-tap shift convolution (F.conv1d on [w[-1:], w, w[:1]])
    w_m1 = jnp.concatenate([wg[:, -1:], wg[:, :-1]], axis=1)   # w[i-1 mod N]
    w_p1 = jnp.concatenate([wg[:, 1:], wg[:, :1]], axis=1)     # w[i+1 mod N]
    w_hat = s[:, 0:1] * w_m1 + s[:, 1:2] * wg + s[:, 2:3] * w_p1
    # sharpening: w_hat ** gamma (explicit exp/log; w_hat > 0)
    w_pow = jnp.exp(gamma * jnp.log(w_hat + 1e-38))
    return w_pow * pl.reciprocal(
        jnp.sum(w_pow, axis=1, keepdims=True) + 1e-16, approx=True)


# ----------------------------------- kernel ---------------------------------------

def _ntm_seq_kernel(cfg, *refs):
    L = cfg["layers"]
    R = cfg["R"]
    Wh = cfg["Wh"]
    M = cfg["M"]
    H = cfg["H"]
    NO = cfg["num_outputs"]
    RSEG = cfg["RSEG"]
    WSEG = cfg["WSEG"]

    it = iter(refs)
    # ---- inputs ----
    x_ref = next(it)            # (Tc, B, num_inputs)  chunk of time steps
    reads0_ref = next(it)       # (B, R*M)
    h0_ref = next(it)           # (L, B, H)
    c0_ref = next(it)           # (L, B, H)
    w0_ref = next(it)           # (R+Wh, B, N)
    mem0_ref = next(it)         # (B, N, M)
    lstm_refs = []
    for l in range(L):
        if l == 0:
            lstm_refs.append((next(it), next(it), next(it), next(it)))  # Wx, Wr, Wh, b
        else:
            lstm_refs.append((next(it), next(it), next(it)))            # Wi, Wh, b
    headW_ref = next(it)        # (H, P)  fused read/write-head + fc(ctrl) weights
    headb_ref = next(it)        # (1, P)
    fcrW_ref = next(it)         # (R*M, num_outputs)
    # ---- outputs (state outputs double as the VMEM-resident running state) ----
    o_ref = next(it)            # (Tc, B, num_outputs)
    reads_ref = next(it)        # (B, R*M)
    h_ref = next(it)            # (L, B, H)
    c_ref = next(it)            # (L, B, H)
    w_ref = next(it)            # (R+Wh, B, N)
    mem_ref = next(it)          # (B, N, M)

    Tc = x_ref.shape[0]
    B = x_ref.shape[1]

    @pl.when(pl.program_id(0) == 0)
    def _init_state():
        reads_ref[...] = reads0_ref[...]
        h_ref[...] = h0_ref[...]
        c_ref[...] = c0_ref[...]
        w_ref[...] = w0_ref[...]
        mem_ref[...] = mem0_ref[...]

    # gate-lane mask hoisted out of the time / layer loops (JAX does not CSE iota)
    lane = jax.lax.broadcasted_iota(jnp.int32, (B, 4 * H), 1)
    is_g = (lane >= 2 * H) & (lane < 3 * H)

    @pl.loop(0, Tc)
    def _step(tt):
        x = x_ref[tt]                 # (B, num_inputs)
        prev_reads = reads_ref[...]   # (B, R*M)
        mem = mem_ref[...]            # (B, N, M)

        # ---- LSTM controller: gates via separate tiny matmuls (no lane concats) ----
        inp = None
        for l in range(L):
            h_prev = h_ref[l]
            c_prev = c_ref[l]
            if l == 0:
                wx_ref, wr_ref, whh_ref, b_ref = lstm_refs[0]
                gates = (jnp.dot(x, wx_ref[...], preferred_element_type=jnp.float32)
                         + jnp.dot(prev_reads, wr_ref[...],
                                   preferred_element_type=jnp.float32)
                         + jnp.dot(h_prev, whh_ref[...],
                                   preferred_element_type=jnp.float32)
                         + b_ref[...])
            else:
                wi_ref, whh_ref, b_ref = lstm_refs[l]
                gates = (jnp.dot(inp, wi_ref[...], preferred_element_type=jnp.float32)
                         + jnp.dot(h_prev, whh_ref[...],
                                   preferred_element_type=jnp.float32)
                         + b_ref[...])
            # single sigmoid pass: tanh(x) = 2*sigmoid(2x) - 1 on the g-gate lanes
            pre = jnp.where(is_g, 2.0 * gates, gates)
            y = jax.nn.sigmoid(pre)
            act = jnp.where(is_g, 2.0 * y - 1.0, y)
            i_g = act[:, 0 * H:1 * H]
            f_g = act[:, 1 * H:2 * H]
            g_g = act[:, 2 * H:3 * H]
            o_g = act[:, 3 * H:4 * H]
            c_new = f_g * c_prev + i_g * g_g
            h_new = o_g * jnp.tanh(c_new)
            h_ref[l] = h_new
            c_ref[l] = c_new
            inp = h_new
        ctrl = inp                    # (B, H)

        # ---- one fused MXU push: all heads + fc(ctrl) + fc bias ----
        hw_all = jnp.dot(ctrl, headW_ref[...],
                         preferred_element_type=jnp.float32) + headb_ref[...]

        # ---- read heads (module lists all read heads before write heads, so reads
        #      are addressed against the pre-write memory — matches the reference) ----
        reads_list = []
        for r in range(R):
            seg = hw_all[:, r * RSEG:(r + 1) * RSEG]
            k = seg[:, 0:M]
            beta = _softplus(seg[:, M:M + 1])
            g = jax.nn.sigmoid(seg[:, M + 1:M + 2])
            s = _softmax(seg[:, M + 2:M + 5], axis=1)
            gamma = 1.0 + _softplus(seg[:, M + 5:M + 6])
            w = _address(k, beta, g, s, gamma, w_ref[r], mem)
            w_ref[r] = w
            reads_list.append(jnp.sum(w[:, :, None] * mem, axis=1))   # (B, M)

        # ---- write heads (erase / add, applied sequentially) ----
        # TODO(synk): read_only=True branch of the (unshown) NTM internals is unknown;
        #             only the default read_only=False path (writes applied) is done.
        for wi in range(Wh):
            base = R * RSEG + wi * WSEG
            seg = hw_all[:, base:base + WSEG]      # layout: [k | e | a | b,g,s,gamma]
            k = seg[:, 0:M]
            e = jax.nn.sigmoid(seg[:, M:2 * M])
            a = seg[:, 2 * M:3 * M]
            beta = _softplus(seg[:, 3 * M:3 * M + 1])
            g = jax.nn.sigmoid(seg[:, 3 * M + 1:3 * M + 2])
            s = _softmax(seg[:, 3 * M + 2:3 * M + 5], axis=1)
            gamma = 1.0 + _softplus(seg[:, 3 * M + 5:3 * M + 6])
            w = _address(k, beta, g, s, gamma, w_ref[R + wi], mem)
            w_ref[R + wi] = w
            erase = w[:, :, None] * e[:, None, :]
            add = w[:, :, None] * a[:, None, :]
            mem = mem * (1.0 - erase) + add
        mem_ref[...] = mem

        reads_cat = jnp.concatenate(reads_list, axis=1) if R > 1 else reads_list[0]
        reads_ref[...] = reads_cat

        # ---- output: sigmoid(fc([ctrl, reads])); ctrl part + bias live in hw_all ----
        fc_off = R * RSEG + Wh * WSEG
        fc_ctrl = hw_all[:, fc_off:fc_off + NO]
        o = jax.nn.sigmoid(fc_ctrl + jnp.dot(reads_cat, fcrW_ref[...],
                                             preferred_element_type=jnp.float32))
        o_ref[tt] = o


# --------------------------------- wrapper ----------------------------------------

def pack_params(params, cfg):
    """Pre-transpose / fuse torch-style (out, in) weights once on the host side."""
    L, H, R, Wh, M = cfg["layers"], cfg["H"], cfg["R"], cfg["Wh"], cfg["M"]
    NI = cfg["num_inputs"]
    RSEG, WSEG, NOP = cfg["RSEG"], cfg["WSEG"], cfg["NOP"]
    packed = {}
    # LSTM: split per-source (x / prev_reads / h) so the kernel avoids lane concats.
    for l in range(L):
        W_ih = params[f"lstm_W_ih_{l}"]                  # (4H, in_l)
        W_hh = params[f"lstm_W_hh_{l}"]                  # (4H, H)
        if l == 0:
            packed["lstm_Wx_0"] = W_ih[:, :NI].T         # (NI, 4H)
            packed["lstm_Wr_0"] = W_ih[:, NI:].T         # (R*M, 4H)
        else:
            packed[f"lstm_Wi_{l}"] = W_ih.T              # (H, 4H)
        packed[f"lstm_Wh_{l}"] = W_hh.T                  # (H, 4H)
        packed[f"lstm_b_{l}"] = params[f"lstm_b_ih_{l}"] + params[f"lstm_b_hh_{l}"]

    def pad_cols(w, b, width):
        cols = w.shape[1]
        if cols < width:
            w = jnp.pad(w, ((0, 0), (0, width - cols)))
            b = jnp.pad(b, ((0, width - cols),))
        return w, b

    blocks, biases = [], []
    # read heads: torch row order [k(M), beta, g, s(3), gamma] -> pad to RSEG
    for r in range(R):
        w, b = pad_cols(params["read_W"][r].T, params["read_b"][r], RSEG)
        blocks.append(w); biases.append(b)
    # write heads: torch row order [k, beta, g, s, gamma, e, a] -> reorder to
    # [k | e | a | beta, g, s, gamma] so k/e/a start at 8-lane boundaries; pad to WSEG
    perm = np.array(list(range(0, M))                         # k
                    + list(range(M + 6, 2 * M + 6))           # e
                    + list(range(2 * M + 6, 3 * M + 6))       # a
                    + list(range(M, M + 6)))                  # beta, g, s(3), gamma
    for wi in range(Wh):
        w = params["write_W"][wi].T[:, perm]
        b = params["write_b"][wi][perm]
        w, b = pad_cols(w, b, WSEG)
        blocks.append(w); biases.append(b)
    # fc(ctrl) part + fc bias, padded to NOP
    w, b = pad_cols(params["fc_W"][:, :H].T, params["fc_b"][0], NOP)
    blocks.append(w); biases.append(b)
    packed["head_W"] = jnp.concatenate(blocks, axis=1)               # (H, P)
    packed["head_b"] = jnp.concatenate(biases, axis=0)[None, :]      # (1, P)
    packed["fc_reads_W"] = params["fc_W"][:, H:].T                   # (R*M, num_outputs)
    return packed


def make_forward_seq(cfg, max_chunk=64):
    kernel = functools.partial(_ntm_seq_kernel, cfg)
    L, R, Wh, M, N, H = (cfg["layers"], cfg["R"], cfg["Wh"],
                         cfg["M"], cfg["N"], cfg["H"])
    NI, NO = cfg["num_inputs"], cfg["num_outputs"]
    RM = R * M
    P = R * cfg["RSEG"] + Wh * cfg["WSEG"] + cfg["NOP"]

    def full_spec(shape):
        zeros = (0,) * len(shape)
        return pl.BlockSpec(shape, lambda t, zeros=zeros: zeros)

    def forward_seq(packed, xs, state):
        reads, (h, c), ws, mem = state
        T, B, _ = xs.shape
        # largest divisor of T that is <= max_chunk (exact semantics, no padding)
        Tc = min(T, max_chunk)
        while T % Tc != 0:
            Tc -= 1

        inputs = [xs, reads, h, c, ws, mem]
        in_specs = [
            pl.BlockSpec((Tc, B, NI), lambda t: (t, 0, 0)),
            full_spec((B, RM)),
            full_spec((L, B, H)),
            full_spec((L, B, H)),
            full_spec((R + Wh, B, N)),
            full_spec((B, N, M)),
        ]
        for l in range(L):
            if l == 0:
                warrs = [packed["lstm_Wx_0"], packed["lstm_Wr_0"],
                         packed["lstm_Wh_0"], packed["lstm_b_0"]]
            else:
                warrs = [packed[f"lstm_Wi_{l}"], packed[f"lstm_Wh_{l}"],
                         packed[f"lstm_b_{l}"]]
            for wa in warrs:
                inputs.append(wa)
                in_specs.append(full_spec(tuple(wa.shape)))
        inputs += [packed["head_W"], packed["head_b"], packed["fc_reads_W"]]
        in_specs += [full_spec((H, P)), full_spec((1, P)), full_spec((RM, NO))]

        out_shape = (
            jax.ShapeDtypeStruct((T, B, NO), jnp.float32),
            jax.ShapeDtypeStruct((B, RM), jnp.float32),
            jax.ShapeDtypeStruct((L, B, H), jnp.float32),
            jax.ShapeDtypeStruct((L, B, H), jnp.float32),
            jax.ShapeDtypeStruct((R + Wh, B, N), jnp.float32),
            jax.ShapeDtypeStruct((B, N, M), jnp.float32),
        )
        out_specs = (
            pl.BlockSpec((Tc, B, NO), lambda t: (t, 0, 0)),
            full_spec((B, RM)),
            full_spec((L, B, H)),
            full_spec((L, B, H)),
            full_spec((R + Wh, B, N)),
            full_spec((B, N, M)),
        )

        o, reads_o, h_o, c_o, w_o, mem_o = pl.pallas_call(
            kernel,
            out_shape=out_shape,
            grid_spec=pltpu.PrefetchScalarGridSpec(
                num_scalar_prefetch=0,
                grid=(T // Tc,),
                in_specs=in_specs,
                out_specs=out_specs,
            ),
            # alias state inputs onto state outputs (in-place state update in HBM)
            input_output_aliases={1: 1, 2: 2, 3: 3, 4: 4, 5: 5},
            compiler_params=pltpu.CompilerParams(
                dimension_semantics=("arbitrary",)),
        )(*inputs)

        return o, (reads_o, (h_o, c_o), w_o, mem_o)

    return forward_seq


def init_params(key, cfg):
    H, M, N = cfg["H"], cfg["M"], cfg["N"]
    R, Wh, L = cfg["R"], cfg["Wh"], cfg["layers"]
    num_inputs, num_outputs = cfg["num_inputs"], cfg["num_outputs"]

    keys = iter(jax.random.split(key, 64))
    p = {}

    def uni(shape, bound):
        return jax.random.uniform(next(keys), shape, jnp.float32, -bound, bound)

    # LSTM controller (PyTorch gate layout i, f, g, o)
    lstm_in0 = num_inputs + M * R
    for l in range(L):
        in_dim = lstm_in0 if l == 0 else H
        bound = 1.0 / float(np.sqrt(H))
        p[f"lstm_W_ih_{l}"] = uni((4 * H, in_dim), bound)
        p[f"lstm_W_hh_{l}"] = uni((4 * H, H), bound)
        p[f"lstm_b_ih_{l}"] = uni((1, 4 * H), bound)
        p[f"lstm_b_hh_{l}"] = uni((1, 4 * H), bound)
    # head FC layers (torch-style (out, in))
    p["read_W"] = uni((R, M + 6, H), 1.0 / float(np.sqrt(H)))
    p["read_b"] = 0.01 * jax.random.normal(next(keys), (R, M + 6), jnp.float32)
    p["write_W"] = uni((Wh, 3 * M + 6, H), 1.0 / float(np.sqrt(H)))
    p["write_b"] = 0.01 * jax.random.normal(next(keys), (Wh, 3 * M + 6), jnp.float32)
    # output FC
    p["fc_W"] = uni((num_outputs, H + R * M), 1.0 / float(np.sqrt(H + R * M)))
    p["fc_b"] = uni((1, num_outputs), 1.0 / float(np.sqrt(H + R * M)))
    # learned initial states / memory bias
    p["mem_bias"] = uni((N, M), 1.0 / float(np.sqrt(N + M)))
    p["init_r"] = 0.01 * jax.random.normal(next(keys), (R, M), jnp.float32)
    p["lstm_h_bias"] = 0.05 * jax.random.normal(next(keys), (L, 1, H), jnp.float32)
    p["lstm_c_bias"] = 0.05 * jax.random.normal(next(keys), (L, 1, H), jnp.float32)
    return p


class EncapsulatedNTMPallas:
    """Mirrors EncapsulatedNTM: stateful memory + previous_state.

    `forward` runs one NTM step (reference API); `forward_sequence` folds a whole
    (T, B, num_inputs) sequence into a single Pallas launch (time = grid axis,
    chunked with an inner in-kernel loop)."""

    def __init__(self, num_inputs, num_outputs, num_classes, controller_size,
                 controller_layers, num_read_heads, num_write_heads, N, M, key):
        # num_classes is stored but (as in the reference module) unused in forward.
        self.cfg = dict(num_inputs=num_inputs, num_outputs=num_outputs,
                        num_classes=num_classes, H=controller_size,
                        layers=controller_layers, R=num_read_heads,
                        Wh=num_write_heads, N=N, M=M,
                        RSEG=_round_up(M + 6, 8),
                        WSEG=_round_up(3 * M + 6, 8),
                        NOP=_round_up(num_outputs, 8))
        self.params = init_params(key, self.cfg)
        self.packed = pack_params(self.params, self.cfg)      # one-time weight packing
        self._forward_seq = jax.jit(make_forward_seq(self.cfg))
        self.previous_state = None
        self.batch_size = None

    def init_sequence(self, batch_size):
        cfg = self.cfg
        self.batch_size = batch_size
        reads = jnp.tile(self.params["init_r"].reshape(1, cfg["R"] * cfg["M"]),
                         (batch_size, 1))
        h = jnp.tile(self.params["lstm_h_bias"], (1, batch_size, 1))
        c = jnp.tile(self.params["lstm_c_bias"], (1, batch_size, 1))
        ws = jnp.zeros((cfg["R"] + cfg["Wh"], batch_size, cfg["N"]), jnp.float32)
        mem = jnp.tile(self.params["mem_bias"][None], (batch_size, 1, 1))
        # state = (reads, (lstm_h, lstm_c), head_weightings, memory)
        self.previous_state = (reads, (h, c), ws, mem)
        return self.previous_state

    def forward(self, x=None, previous_state=None, class_vector=None,
                read_only=False, text=False):
        if x is None:
            x = jnp.zeros((self.batch_size, self.cfg["num_inputs"]), jnp.float32)
        state = self.previous_state if previous_state is None else previous_state
        o_seq, new_state = self._forward_seq(self.packed, x[None], state)
        o = o_seq[0]
        if previous_state is None:
            self.previous_state = new_state
            return o, self.previous_state
        return o, new_state

    def forward_sequence(self, xs, previous_state=None):
        state = self.previous_state if previous_state is None else previous_state
        o_seq, new_state = self._forward_seq(self.packed, xs, state)
        if previous_state is None:
            self.previous_state = new_state
        return o_seq, new_state

    __call__ = forward


if __name__ == "__main__":
    key = jax.random.PRNGKey(0)
    k_param, k_x = jax.random.split(key)

    model = EncapsulatedNTMPallas(num_inputs=8, num_outputs=8, num_classes=4,
                                  controller_size=32, controller_layers=1,
                                  num_read_heads=1, num_write_heads=1,
                                  N=16, M=8, key=k_param)
    batch, T = 8, 8                       # batch >= 8 fills f32 sublanes
    state0 = model.init_sequence(batch)
    xs = jax.random.normal(k_x, (T, batch, 8), jnp.float32)

    # whole sequence in ONE kernel launch (time axis chunked inside the kernel)
    o_seq, seq_state = model.forward_sequence(xs, previous_state=state0)
    jax.block_until_ready(o_seq)
    jax.block_until_ready(seq_state)

    # step-by-step path (reference single-step API) starting from the same state
    state = state0
    o_step = None
    for t in range(T):
        o_step, state = model.forward(xs[t], previous_state=state)
    jax.block_until_ready(o_step)

    assert o_seq.shape == (T, batch, 8)
    assert np.allclose(np.asarray(o_seq[-1]), np.asarray(o_step),
                       rtol=1e-4, atol=1e-4), "sequence vs per-step mismatch (output)"
    assert np.allclose(np.asarray(seq_state[3]), np.asarray(state[3]),
                       rtol=1e-4, atol=1e-4), "sequence vs per-step mismatch (memory)"

    # x=None exercises the zero_pad path on the stateful API
    model.previous_state = seq_state
    o2, _ = model.forward()
    jax.block_until_ready(o2)
    assert o2.shape == (batch, 8)

    print("KERNEL_OK")
</pallas_src>

<mosaic_0001>
module attributes {stable_mosaic.version = 11 : i64} {
  func.func @_ntm_seq_kernel(%arg0: i32, %arg1: memref<8x8x8xf32, #tpu.memory_space<vmem>>, %arg2: memref<8x8xf32, #tpu.memory_space<vmem>>, %arg3: memref<1x8x32xf32, #tpu.memory_space<vmem>>, %arg4: memref<1x8x32xf32, #tpu.memory_space<vmem>>, %arg5: memref<2x8x16xf32, #tpu.memory_space<vmem>>, %arg6: memref<8x16x8xf32, #tpu.memory_space<vmem>>, %arg7: memref<8x128xf32, #tpu.memory_space<vmem>>, %arg8: memref<8x128xf32, #tpu.memory_space<vmem>>, %arg9: memref<32x128xf32, #tpu.memory_space<vmem>>, %arg10: memref<1x128xf32, #tpu.memory_space<vmem>>, %arg11: memref<32x56xf32, #tpu.memory_space<vmem>>, %arg12: memref<1x56xf32, #tpu.memory_space<vmem>>, %arg13: memref<8x8xf32, #tpu.memory_space<vmem>>, %arg14: memref<8x8x8xf32, #tpu.memory_space<vmem>>, %arg15: memref<8x8xf32, #tpu.memory_space<vmem>>, %arg16: memref<1x8x32xf32, #tpu.memory_space<vmem>>, %arg17: memref<1x8x32xf32, #tpu.memory_space<vmem>>, %arg18: memref<2x8x16xf32, #tpu.memory_space<vmem>>, %arg19: memref<8x16x8xf32, #tpu.memory_space<vmem>>) attributes {dimension_semantics = [#tpu.dimension_semantics<arbitrary>], iteration_bounds = array<i64: 1>, scalar_prefetch = 0 : i64, scratch_operands = 0 : i64, tpu.core_type = #tpu.core_type<tc>, window_params = [{transform_indices = @transform_0, window_bounds = array<i64: 8, 8, 8>}, {pipeline_mode = #tpu.pipeline_mode<synchronous>, transform_indices = @transform_1, window_bounds = array<i64: 8, 8>}, {pipeline_mode = #tpu.pipeline_mode<synchronous>, transform_indices = @transform_2, window_bounds = array<i64: 1, 8, 32>}, {pipeline_mode = #tpu.pipeline_mode<synchronous>, transform_indices = @transform_3, window_bounds = array<i64: 1, 8, 32>}, {pipeline_mode = #tpu.pipeline_mode<synchronous>, transform_indices = @transform_4, window_bounds = array<i64: 2, 8, 16>}, {pipeline_mode = #tpu.pipeline_mode<synchronous>, transform_indices = @transform_5, window_bounds = array<i64: 8, 16, 8>}, {pipeline_mode = #tpu.pipeline_mode<synchronous>, transform_indices = @transform_6, window_bounds = array<i64: 8, 128>}, {pipeline_mode = #tpu.pipeline_mode<synchronous>, transform_indices = @transform_7, window_bounds = array<i64: 8, 128>}, {pipeline_mode = #tpu.pipeline_mode<synchronous>, transform_indices = @transform_8, window_bounds = array<i64: 32, 128>}, {pipeline_mode = #tpu.pipeline_mode<synchronous>, transform_indices = @transform_9, window_bounds = array<i64: 1, 128>}, {pipeline_mode = #tpu.pipeline_mode<synchronous>, transform_indices = @transform_10, window_bounds = array<i64: 32, 56>}, {pipeline_mode = #tpu.pipeline_mode<synchronous>, transform_indices = @transform_11, window_bounds = array<i64: 1, 56>}, {pipeline_mode = #tpu.pipeline_mode<synchronous>, transform_indices = @transform_12, window_bounds = array<i64: 8, 8>}, {transform_indices = @transform_13, window_bounds = array<i64: 8, 8, 8>}, {pipeline_mode = #tpu.pipeline_mode<synchronous>, transform_indices = @transform_14, window_bounds = array<i64: 8, 8>}, {pipeline_mode = #tpu.pipeline_mode<synchronous>, transform_indices = @transform_15, window_bounds = array<i64: 1, 8, 32>}, {pipeline_mode = #tpu.pipeline_mode<synchronous>, transform_indices = @transform_16, window_bounds = array<i64: 1, 8, 32>}, {pipeline_mode = #tpu.pipeline_mode<synchronous>, transform_indices = @transform_17, window_bounds = array<i64: 2, 8, 16>}, {pipeline_mode = #tpu.pipeline_mode<synchronous>, transform_indices = @transform_18, window_bounds = array<i64: 8, 16, 8>}]} {
    %c0_i32 = arith.constant 0 : i32
    %0 = arith.cmpi eq, %arg0, %c0_i32 : i32
    %1 = arith.extui %0 : i1 to i32
    %c0_i32_0 = arith.constant 0 : i32
    %2 = arith.cmpi ne, %1, %c0_i32_0 : i32
    scf.if %2 {
      %c0 = arith.constant 0 : index
      %c0_3 = arith.constant 0 : index
      %10 = vector.load %arg2[%c0, %c0_3] : memref<8x8xf32, #tpu.memory_space<vmem>>, vector<8x8xf32>
      %c0_4 = arith.constant 0 : index
      %c0_5 = arith.constant 0 : index
      %11 = vector.load %arg15[%c0_4, %c0_5] : memref<8x8xf32, #tpu.memory_space<vmem>>, vector<8x8xf32>
      tpu.vector_store %arg15[%c0_4, %c0_5], %10 {strides = array<i32>} : memref<8x8xf32, #tpu.memory_space<vmem>>, vector<8x8xf32>,
      %c0_6 = arith.constant 0 : index
      %c0_7 = arith.constant 0 : index
      %c0_8 = arith.constant 0 : index
      %12 = vector.load %arg3[%c0_6, %c0_7, %c0_8] : memref<1x8x32xf32, #tpu.memory_space<vmem>>, vector<1x8x32xf32>
      %c0_9 = arith.constant 0 : index
      %c0_10 = arith.constant 0 : index
      %c0_11 = arith.constant 0 : index
      %13 = vector.load %arg16[%c0_9, %c0_10, %c0_11] : memref<1x8x32xf32, #tpu.memory_space<vmem>>, vector<1x8x32xf32>
      tpu.vector_store %arg16[%c0_9, %c0_10, %c0_11], %12 {strides = array<i32>} : memref<1x8x32xf32, #tpu.memory_space<vmem>>, vector<1x8x32xf32>,
      %c0_12 = arith.constant 0 : index
      %c0_13 = arith.constant 0 : index
      %c0_14 = arith.constant 0 : index
      %14 = vector.load %arg4[%c0_12, %c0_13, %c0_14] : memref<1x8x32xf32, #tpu.memory_space<vmem>>, vector<1x8x32xf32>
      %c0_15 = arith.constant 0 : index
      %c0_16 = arith.constant 0 : index
      %c0_17 = arith.constant 0 : index
      %15 = vector.load %arg17[%c0_15, %c0_16, %c0_17] : memref<1x8x32xf32, #tpu.memory_space<vmem>>, vector<1x8x32xf32>
      tpu.vector_store %arg17[%c0_15, %c0_16, %c0_17], %14 {strides = array<i32>} : memref<1x8x32xf32, #tpu.memory_space<vmem>>, vector<1x8x32xf32>,
      %c0_18 = arith.constant 0 : index
      %c0_19 = arith.constant 0 : index
      %c0_20 = arith.constant 0 : index
      %16 = vector.load %arg5[%c0_18, %c0_19, %c0_20] : memref<2x8x16xf32, #tpu.memory_space<vmem>>, vector<2x8x16xf32>
      %c0_21 = arith.constant 0 : index
      %c0_22 = arith.constant 0 : index
      %c0_23 = arith.constant 0 : index
      %17 = vector.load %arg18[%c0_21, %c0_22, %c0_23] : memref<2x8x16xf32, #tpu.memory_space<vmem>>, vector<2x8x16xf32>
      tpu.vector_store %arg18[%c0_21, %c0_22, %c0_23], %16 {strides = array<i32>} : memref<2x8x16xf32, #tpu.memory_space<vmem>>, vector<2x8x16xf32>,
      %c0_24 = arith.constant 0 : index
      %c0_25 = arith.constant 0 : index
      %c0_26 = arith.constant 0 : index
      %18 = vector.load %arg6[%c0_24, %c0_25, %c0_26] : memref<8x16x8xf32, #tpu.memory_space<vmem>>, vector<8x16x8xf32>
      %c0_27 = arith.constant 0 : index
      %c0_28 = arith.constant 0 : index
      %c0_29 = arith.constant 0 : index
      %19 = vector.load %arg19[%c0_27, %c0_28, %c0_29] : memref<8x16x8xf32, #tpu.memory_space<vmem>>, vector<8x16x8xf32>
      tpu.vector_store %arg19[%c0_27, %c0_28, %c0_29], %18 {strides = array<i32>} : memref<8x16x8xf32, #tpu.memory_space<vmem>>, vector<8x16x8xf32>,
    } else {
    }
    %3 = tpu.iota {dimensions = array<i32: 1>} : vector<8x128xi32>
    %c64_i32 = arith.constant 64 : i32
    %4 = vector.broadcast %c64_i32 : i32 to vector<8x128xi32>
    %5 = arith.cmpi sge, %3, %4 : vector<8x128xi32>
    %c96_i32 = arith.constant 96 : i32
    %6 = vector.broadcast %c96_i32 : i32 to vector<8x128xi32>
    %7 = arith.cmpi slt, %3, %6 : vector<8x128xi32>
    %8 = arith.andi %5, %7 : vector<8x128xi1>
    %c0_i32_1 = arith.constant 0 : i32
    %c8_i32 = arith.constant 8 : i32
    %9 = arith.addi %c0_i32_1, %c8_i32 : i32
    %c1_i32 = arith.constant 1 : i32
    scf.for %arg20 = %c0_i32_1 to %9 step %c1_i32  : i32 {
      %c1_i32_3 = arith.constant 1 : i32
      %10 = arith.muli %arg20, %c1_i32_3 : i32
      %c0_i32_4 = arith.constant 0 : i32
      %11 = arith.addi %c0_i32_4, %10 : i32
      %12 = arith.index_cast %11 : i32 to index
      %c0 = arith.constant 0 : index
      %c0_5 = arith.constant 0 : index
      %13 = vector.load %arg1[%12, %c0, %c0_5] : memref<8x8x8xf32, #tpu.memory_space<vmem>>, vector<1x8x8xf32>
      %14 = vector.shape_cast %13 : vector<1x8x8xf32> to vector<8x8xf32>
      %c0_6 = arith.constant 0 : index
      %c0_7 = arith.constant 0 : index
      %15 = vector.load %arg15[%c0_6, %c0_7] : memref<8x8xf32, #tpu.memory_space<vmem>>, vector<8x8xf32>
      %c0_8 = arith.constant 0 : index
      %c0_9 = arith.constant 0 : index
      %c0_10 = arith.constant 0 : index
      %16 = vector.load %arg19[%c0_8, %c0_9, %c0_10] : memref<8x16x8xf32, #tpu.memory_space<vmem>>, vector<8x16x8xf32>
      %c0_11 = arith.constant 0 : index
      %c0_12 = arith.constant 0 : index
      %c0_13 = arith.constant 0 : index
      %17 = vector.load %arg16[%c0_11, %c0_12, %c0_13] : memref<1x8x32xf32, #tpu.memory_space<vmem>>, vector<1x8x32xf32>
      %18 = vector.shape_cast %17 : vector<1x8x32xf32> to vector<8x32xf32>
      %c0_14 = arith.constant 0 : index
      %c0_15 = arith.constant 0 : index
      %c0_16 = arith.constant 0 : index
      %19 = vector.load %arg17[%c0_14, %c0_15, %c0_16] : memref<1x8x32xf32, #tpu.memory_space<vmem>>, vector<1x8x32xf32>
      %20 = vector.shape_cast %19 : vector<1x8x32xf32> to vector<8x32xf32>
      %c0_17 = arith.constant 0 : index
      %c0_18 = arith.constant 0 : index
      %21 = vector.load %arg7[%c0_17, %c0_18] : memref<8x128xf32, #tpu.memory_space<vmem>>, vector<8x128xf32>
      %cst = arith.constant dense<0.000000e+00> : vector<8x128xf32>
      %22 = tpu.matmul %14, %21, %cst {dimension_numbers = #tpu.dot_dimension_numbers<[1], [0], [0], [1], [0, 0, 1, 1], [], []>} : vector<8x8xf32>, vector<8x128xf32>, vector<8x128xf32> -> vector<8x128xf32>
      %c0_19 = arith.constant 0 : index
      %c0_20 = arith.constant 0 : index
      %23 = vector.load %arg8[%c0_19, %c0_20] : memref<8x128xf32, #tpu.memory_space<vmem>>, vector<8x128xf32>
      %cst_21 = arith.constant dense<0.000000e+00> : vector<8x128xf32>
      %24 = tpu.matmul %15, %23, %cst_21 {dimension_numbers = #tpu.dot_dimension_numbers<[1], [0], [0], [1], [0, 0, 1, 1], [], []>} : vector<8x8xf32>, vector<8x128xf32>, vector<8x128xf32> -> vector<8x128xf32>
      %25 = arith.addf %22, %24 : vector<8x128xf32>
      %c0_22 = arith.constant 0 : index
      %c0_23 = arith.constant 0 : index
      %26 = vector.load %arg9[%c0_22, %c0_23] : memref<32x128xf32, #tpu.memory_space<vmem>>, vector<32x128xf32>
      %cst_24 = arith.constant dense<0.000000e+00> : vector<8x128xf32>
      %27 = tpu.matmul %18, %26, %cst_24 {dimension_numbers = #tpu.dot_dimension_numbers<[1], [0], [0], [1], [0, 0, 1, 1], [], []>} : vector<8x32xf32>, vector<32x128xf32>, vector<8x128xf32> -> vector<8x128xf32>
      %28 = arith.addf %25, %27 : vector<8x128xf32>
      %c0_25 = arith.constant 0 : index
      %c0_26 = arith.constant 0 : index
      %29 = vector.load %arg10[%c0_25, %c0_26] : memref<1x128xf32, #tpu.memory_space<vmem>>, vector<1x128xf32>
      %30 = vector.broadcast %29 : vector<1x128xf32> to vector<8x128xf32>
      %31 = arith.addf %28, %30 : vector<8x128xf32>
      %cst_27 = arith.constant 2.000000e+00 : f32
      %32 = vector.broadcast %cst_27 : f32 to vector<8x128xf32>
      %33 = arith.mulf %32, %31 : vector<8x128xf32>
      %34 = arith.select %8, %33, %31 : vector<8x128xi1>, vector<8x128xf32>
      %35 = arith.negf %34 : vector<8x128xf32>
      %36 = math.exp %35 : vector<8x128xf32>
      %cst_28 = arith.constant 1.000000e+00 : f32
      %37 = vector.broadcast %cst_28 : f32 to vector<8x128xf32>
      %38 = arith.addf %37, %36 : vector<8x128xf32>
      %39 = arith.divf %37, %38 : vector<8x128xf32>
      %cst_29 = arith.constant 2.000000e+00 : f32
      %40 = vector.broadcast %cst_29 : f32 to vector<8x128xf32>
      %41 = arith.mulf %40, %39 : vector<8x128xf32>
      %cst_30 = arith.constant 1.000000e+00 : f32
      %42 = vector.broadcast %cst_30 : f32 to vector<8x128xf32>
      %43 = arith.subf %41, %42 : vector<8x128xf32>
      %44 = arith.select %8, %43, %39 : vector<8x128xi1>, vector<8x128xf32>
      %45 = vector.extract_strided_slice %44 {offsets = [0, 0], sizes = [8, 32], strides = [1, 1]} : vector<8x128xf32> to vector<8x32xf32>
      %46 = vector.extract_strided_slice %44 {offsets = [0, 32], sizes = [8, 32], strides = [1, 1]} : vector<8x128xf32> to vector<8x32xf32>
      %47 = vector.extract_strided_slice %44 {offsets = [0, 64], sizes = [8, 32], strides = [1, 1]} : vector<8x128xf32> to vector<8x32xf32>
      %48 = vector.extract_strided_slice %44 {offsets = [0, 96], sizes = [8, 32], strides = [1, 1]} : vector<8x128xf32> to vector<8x32xf32>
      %49 = arith.mulf %46, %20 : vector<8x32xf32>
      %50 = arith.mulf %45, %47 : vector<8x32xf32>
      %51 = arith.addf %49, %50 : vector<8x32xf32>
      %52 = math.tanh %51 : vector<8x32xf32>
      %53 = arith.mulf %48, %52 : vector<8x32xf32>
      %c0_31 = arith.constant 0 : index
      %c0_32 = arith.constant 0 : index
      %c0_33 = arith.constant 0 : index
      %54 = vector.load %arg16[%c0_31, %c0_32, %c0_33] : memref<1x8x32xf32, #tpu.memory_space<vmem>>, vector<1x8x32xf32>
      %55 = vector.shape_cast %54 : vector<1x8x32xf32> to vector<8x32xf32>
      %56 = vector.shape_cast %53 : vector<8x32xf32> to vector<1x8x32xf32>
      tpu.vector_store %arg16[%c0_31, %c0_32, %c0_33], %56 {strides = array<i32>} : memref<1x8x32xf32, #tpu.memory_space<vmem>>, vector<1x8x32xf32>,
      %c0_34 = arith.constant 0 : index
      %c0_35 = arith.constant 0 : index
      %c0_36 = arith.constant 0 : index
      %57 = vector.load %arg17[%c0_34, %c0_35, %c0_36] : memref<1x8x32xf32, #tpu.memory_space<vmem>>, vector<1x8x32xf32>
      %58 = vector.shape_cast %57 : vector<1x8x32xf32> to vector<8x32xf32>
      %59 = vector.shape_cast %51 : vector<8x32xf32> to vector<1x8x32xf32>
      tpu.vector_store %arg17[%c0_34, %c0_35, %c0_36], %59 {strides = array<i32>} : memref<1x8x32xf32, #tpu.memory_space<vmem>>, vector<1x8x32xf32>,
      %c0_37 = arith.constant 0 : index
      %c0_38 = arith.constant 0 : index
      %60 = vector.load %arg11[%c0_37, %c0_38] : memref<32x56xf32, #tpu.memory_space<vmem>>, vector<32x56xf32>
      %cst_39 = arith.constant dense<0.000000e+00> : vector<8x56xf32>
      %61 = tpu.matmul %53, %60, %cst_39 {dimension_numbers = #tpu.dot_dimension_numbers<[1], [0], [0], [1], [0, 0, 1, 1], [], []>} : vector<8x32xf32>, vector<32x56xf32>, vector<8x56xf32> -> vector<8x56xf32>
      %c0_40 = arith.constant 0 : index
      %c0_41 = arith.constant 0 : index
      %62 = vector.load %arg12[%c0_40, %c0_41] : memref<1x56xf32, #tpu.memory_space<vmem>>, vector<1x56xf32>
      %63 = vector.broadcast %62 : vector<1x56xf32> to vector<8x56xf32>
      %64 = arith.addf %61, %63 : vector<8x56xf32>
      %65 = vector.extract_strided_slice %64 {offsets = [0, 0], sizes = [8, 16], strides = [1, 1]} : vector<8x56xf32> to vector<8x16xf32>
      %66 = vector.extract_strided_slice %65 {offsets = [0, 0], sizes = [8, 8], strides = [1, 1]} : vector<8x16xf32> to vector<8x8xf32>
      %67 = vector.extract_strided_slice %65 {offsets = [0, 8], sizes = [8, 1], strides = [1, 1]} : vector<8x16xf32> to vector<8x1xf32>
      %cst_42 = arith.constant 2.000000e+01 : f32
      %68 = vector.broadcast %cst_42 : f32 to vector<8x1xf32>
      %69 = arith.cmpf ogt, %67, %68 : vector<8x1xf32>
      %cst_43 = arith.constant 2.000000e+01 : f32
      %70 = vector.broadcast %cst_43 : f32 to vector<8x1xf32>
      %71 = arith.minimumf %67, %70 : vector<8x1xf32>
      %72 = math.exp %71 : vector<8x1xf32>
      %cst_44 = arith.constant 1.000000e+00 : f32
      %73 = vector.broadcast %cst_44 : f32 to vector<8x1xf32>
      %74 = arith.addf %73, %72 : vector<8x1xf32>
      %75 = math.log %74 : vector<8x1xf32>
      %76 = arith.select %69, %67, %75 : vector<8x1xi1>, vector<8x1xf32>
      %77 = vector.extract_strided_slice %65 {offsets = [0, 9], sizes = [8, 1], strides = [1, 1]} : vector<8x16xf32> to vector<8x1xf32>
      %78 = arith.negf %77 : vector<8x1xf32>
      %79 = math.exp %78 : vector<8x1xf32>
      %cst_45 = arith.constant 1.000000e+00 : f32
      %80 = vector.broadcast %cst_45 : f32 to vector<8x1xf32>
      %81 = arith.addf %80, %79 : vector<8x1xf32>
      %82 = arith.divf %80, %81 : vector<8x1xf32>
      %83 = vector.extract_strided_slice %65 {offsets = [0, 10], sizes = [8, 3], strides = [1, 1]} : vector<8x16xf32> to vector<8x3xf32>
      %cst_46 = arith.constant dense<0xFF800000> : vector<8xf32>
      %84 = vector.multi_reduction <maximumf>, %83, %cst_46 [1] : vector<8x3xf32> to vector<8xf32>
      %85 = vector.shape_cast %84 : vector<8xf32> to vector<8x1xf32>
      %86 = vector.broadcast %85 : vector<8x1xf32> to vector<8x3xf32>
      %87 = arith.subf %83, %86 : vector<8x3xf32>
      %88 = math.exp %87 : vector<8x3xf32>
      %cst_47 = arith.constant dense<0.000000e+00> : vector<8xf32>
      %89 = vector.multi_reduction <add>, %88, %cst_47 [1] : vector<8x3xf32> to vector<8xf32>
      %90 = vector.shape_cast %89 : vector<8xf32> to vector<8x1xf32>
      %91 = tpu.reciprocal %90 {approx = true} : vector<8x1xf32> -> vector<8x1xf32>
      %92 = vector.broadcast %91 : vector<8x1xf32> to vector<8x3xf32>
      %93 = arith.mulf %88, %92 : vector<8x3xf32>
      %94 = vector.extract_strided_slice %65 {offsets = [0, 13], sizes = [8, 1], strides = [1, 1]} : vector<8x16xf32> to vector<8x1xf32>
      %cst_48 = arith.constant 2.000000e+01 : f32
      %95 = vector.broadcast %cst_48 : f32 to vector<8x1xf32>
      %96 = arith.cmpf ogt, %94, %95 : vector<8x1xf32>
      %cst_49 = arith.constant 2.000000e+01 : f32
      %97 = vector.broadcast %cst_49 : f32 to vector<8x1xf32>
      %98 = arith.minimumf %94, %97 : vector<8x1xf32>
      %99 = math.exp %98 : vector<8x1xf32>
      %cst_50 = arith.constant 1.000000e+00 : f32
      %100 = vector.broadcast %cst_50 : f32 to vector<8x1xf32>
      %101 = arith.addf %100, %99 : vector<8x1xf32>
      %102 = math.log %101 : vector<8x1xf32>
      %103 = arith.select %96, %94, %102 : vector<8x1xi1>, vector<8x1xf32>
      %cst_51 = arith.constant 1.000000e+00 : f32
      %104 = vector.broadcast %cst_51 : f32 to vector<8x1xf32>
      %105 = arith.addf %104, %103 : vector<8x1xf32>
      %c0_52 = arith.constant 0 : index
      %c0_53 = arith.constant 0 : index
      %c0_54 = arith.constant 0 : index
      %106 = vector.load %arg18[%c0_52, %c0_53, %c0_54] : memref<2x8x16xf32, #tpu.memory_space<vmem>>, vector<1x8x16xf32>
      %107 = vector.shape_cast %106 : vector<1x8x16xf32> to vector<8x16xf32>
      %cst_55 = arith.constant 1.000000e-16 : f32
      %108 = vector.broadcast %cst_55 : f32 to vector<8x8xf32>
      %109 = arith.addf %66, %108 : vector<8x8xf32>
      %cst_56 = arith.constant 1.000000e-16 : f32
      %110 = vector.broadcast %cst_56 : f32 to vector<8x16x8xf32>
      %111 = arith.addf %16, %110 : vector<8x16x8xf32>
      %112 = vector.shape_cast %109 : vector<8x8xf32> to vector<8x1x8xf32>
      %113 = vector.broadcast %112 : vector<8x1x8xf32> to vector<8x16x8xf32>
      %114 = arith.mulf %111, %113 : vector<8x16x8xf32>
      %cst_57 = arith.constant dense<0.000000e+00> : vector<8x16xf32>
      %115 = vector.multi_reduction <add>, %114, %cst_57 [2] : vector<8x16x8xf32> to vector<8x16xf32>
      %116 = arith.mulf %109, %109 : vector<8x8xf32>
      %cst_58 = arith.constant dense<0.000000e+00> : vector<8xf32>
      %117 = vector.multi_reduction <add>, %116, %cst_58 [1] : vector<8x8xf32> to vector<8xf32>
      %118 = vector.shape_cast %117 : vector<8xf32> to vector<8x1xf32>
      %119 = arith.mulf %111, %111 : vector<8x16x8xf32>
      %cst_59 = arith.constant dense<0.000000e+00> : vector<8x16xf32>
      %120 = vector.multi_reduction <add>, %119, %cst_59 [2] : vector<8x16x8xf32> to vector<8x16xf32>
      %cst_60 = arith.constant 1.000000e-16 : f32
      %121 = vector.broadcast %cst_60 : f32 to vector<8x1xf32>
      %122 = arith.maximumf %118, %121 : vector<8x1xf32>
      %123 = math.rsqrt %122 : vector<8x1xf32>
      %124 = vector.broadcast %123 : vector<8x1xf32> to vector<8x16xf32>
      %125 = arith.mulf %115, %124 : vector<8x16xf32>
      %cst_61 = arith.constant 1.000000e-16 : f32
      %126 = vector.broadcast %cst_61 : f32 to vector<8x16xf32>
      %127 = arith.maximumf %120, %126 : vector<8x16xf32>
      %128 = math.rsqrt %127 : vector<8x16xf32>
      %129 = arith.mulf %125, %128 : vector<8x16xf32>
      %130 = vector.broadcast %76 : vector<8x1xf32> to vector<8x16xf32>
      %131 = arith.mulf %130, %129 : vector<8x16xf32>
      %cst_62 = arith.constant dense<0xFF800000> : vector<8xf32>
      %132 = vector.multi_reduction <maximumf>, %131, %cst_62 [1] : vector<8x16xf32> to vector<8xf32>
      %133 = vector.shape_cast %132 : vector<8xf32> to vector<8x1xf32>
      %134 = vector.broadcast %133 : vector<8x1xf32> to vector<8x16xf32>
      %135 = arith.subf %131, %134 : vector<8x16xf32>
      %136 = math.exp %135 : vector<8x16xf32>
      %cst_63 = arith.constant dense<0.000000e+00> : vector<8xf32>
      %137 = vector.multi_reduction <add>, %136, %cst_63 [1] : vector<8x16xf32> to vector<8xf32>
      %138 = vector.shape_cast %137 : vector<8xf32> to vector<8x1xf32>
      %139 = tpu.reciprocal %138 {approx = true} : vector<8x1xf32> -> vector<8x1xf32>
      %140 = vector.broadcast %139 : vector<8x1xf32> to vector<8x16xf32>
      %141 = arith.mulf %136, %140 : vector<8x16xf32>
      %142 = vector.broadcast %82 : vector<8x1xf32> to vector<8x16xf32>
      %143 = arith.mulf %142, %141 : vector<8x16xf32>
      %cst_64 = arith.constant 1.000000e+00 : f32
      %144 = vector.broadcast %cst_64 : f32 to vector<8x1xf32>
      %145 = arith.subf %144, %82 : vector<8x1xf32>
      %146 = vector.broadcast %145 : vector<8x1xf32> to vector<8x16xf32>
      %147 = arith.mulf %146, %107 : vector<8x16xf32>
      %148 = arith.addf %143, %147 : vector<8x16xf32>
      %149 = vector.extract_strided_slice %148 {offsets = [0, 15], sizes = [8, 1], strides = [1, 1]} : vector<8x16xf32> to vector<8x1xf32>
      %150 = vector.extract_strided_slice %148 {offsets = [0, 0], sizes = [8, 15], strides = [1, 1]} : vector<8x16xf32> to vector<8x15xf32>
      %151 = tpu.concatenate %149, %150 in 1 : vector<8x1xf32>, vector<8x15xf32> -> vector<8x16xf32>
      %152 = vector.extract_strided_slice %148 {offsets = [0, 1], sizes = [8, 15], strides = [1, 1]} : vector<8x16xf32> to vector<8x15xf32>
      %153 = vector.extract_strided_slice %148 {offsets = [0, 0], sizes = [8, 1], strides = [1, 1]} : vector<8x16xf32> to vector<8x1xf32>
      %154 = tpu.concatenate %152, %153 in 1 : vector<8x15xf32>, vector<8x1xf32> -> vector<8x16xf32>
      %155 = vector.extract_strided_slice %93 {offsets = [0, 0], sizes = [8, 1], strides = [1, 1]} : vector<8x3xf32> to vector<8x1xf32>
      %156 = vector.broadcast %155 : vector<8x1xf32> to vector<8x16xf32>
      %157 = arith.mulf %156, %151 : vector<8x16xf32>
      %158 = vector.extract_strided_slice %93 {offsets = [0, 1], sizes = [8, 1], strides = [1, 1]} : vector<8x3xf32> to vector<8x1xf32>
      %159 = vector.broadcast %158 : vector<8x1xf32> to vector<8x16xf32>
      %160 = arith.mulf %159, %148 : vector<8x16xf32>
      %161 = arith.addf %157, %160 : vector<8x16xf32>
      %162 = vector.extract_strided_slice %93 {offsets = [0, 2], sizes = [8, 1], strides = [1, 1]} : vector<8x3xf32> to vector<8x1xf32>
      %163 = vector.broadcast %162 : vector<8x1xf32> to vector<8x16xf32>
      %164 = arith.mulf %163, %154 : vector<8x16xf32>
      %165 = arith.addf %161, %164 : vector<8x16xf32>
      %cst_65 = arith.constant 9.99999935E-39 : f32
      %166 = vector.broadcast %cst_65 : f32 to vector<8x16xf32>
      %167 = arith.addf %165, %166 : vector<8x16xf32>
      %168 = math.log %167 : vector<8x16xf32>
      %169 = vector.broadcast %105 : vector<8x1xf32> to vector<8x16xf32>
      %170 = arith.mulf %169, %168 : vector<8x16xf32>
      %171 = math.exp %170 : vector<8x16xf32>
      %cst_66 = arith.constant dense<0.000000e+00> : vector<8xf32>
      %172 = vector.multi_reduction <add>, %171, %cst_66 [1] : vector<8x16xf32> to vector<8xf32>
      %173 = vector.shape_cast %172 : vector<8xf32> to vector<8x1xf32>
      %cst_67 = arith.constant 1.000000e-16 : f32
      %174 = vector.broadcast %cst_67 : f32 to vector<8x1xf32>
      %175 = arith.addf %173, %174 : vector<8x1xf32>
      %176 = tpu.reciprocal %175 {approx = true} : vector<8x1xf32> -> vector<8x1xf32>
      %177 = vector.broadcast %176 : vector<8x1xf32> to vector<8x16xf32>
      %178 = arith.mulf %171, %177 : vector<8x16xf32>
      %c0_68 = arith.constant 0 : index
      %c0_69 = arith.constant 0 : index
      %c0_70 = arith.constant 0 : index
      %179 = vector.load %arg18[%c0_68, %c0_69, %c0_70] : memref<2x8x16xf32, #tpu.memory_space<vmem>>, vector<1x8x16xf32>
      %180 = vector.shape_cast %179 : vector<1x8x16xf32> to vector<8x16xf32>
      %181 = vector.shape_cast %178 : vector<8x16xf32> to vector<1x8x16xf32>
      tpu.vector_store %arg18[%c0_68, %c0_69, %c0_70], %181 {strides = array<i32>} : memref<2x8x16xf32, #tpu.memory_space<vmem>>, vector<1x8x16xf32>,
      %182 = vector.shape_cast %178 : vector<8x16xf32> to vector<8x16x1xf32>
      %183 = vector.broadcast %182 : vector<8x16x1xf32> to vector<8x16x8xf32>
      %184 = arith.mulf %183, %16 : vector<8x16x8xf32>
      %cst_71 = arith.constant dense<0.000000e+00> : vector<8x8xf32>
      %185 = vector.multi_reduction <add>, %184, %cst_71 [1] : vector<8x16x8xf32> to vector<8x8xf32>
      %186 = vector.extract_strided_slice %64 {offsets = [0, 16], sizes = [8, 32], strides = [1, 1]} : vector<8x56xf32> to vector<8x32xf32>
      %187 = vector.extract_strided_slice %186 {offsets = [0, 0], sizes = [8, 8], strides = [1, 1]} : vector<8x32xf32> to vector<8x8xf32>
      %188 = vector.extract_strided_slice %186 {offsets = [0, 8], sizes = [8, 8], strides = [1, 1]} : vector<8x32xf32> to vector<8x8xf32>
      %189 = arith.negf %188 : vector<8x8xf32>
      %190 = math.exp %189 : vector<8x8xf32>
      %cst_72 = arith.constant 1.000000e+00 : f32
      %191 = vector.broadcast %cst_72 : f32 to vector<8x8xf32>
      %192 = arith.addf %191, %190 : vector<8x8xf32>
      %193 = arith.divf %191, %192 : vector<8x8xf32>
      %194 = vector.extract_strided_slice %186 {offsets = [0, 16], sizes = [8, 8], strides = [1, 1]} : vector<8x32xf32> to vector<8x8xf32>
      %195 = vector.extract_strided_slice %186 {offsets = [0, 24], sizes = [8, 1], strides = [1, 1]} : vector<8x32xf32> to vector<8x1xf32>
      %cst_73 = arith.constant 2.000000e+01 : f32
      %196 = vector.broadcast %cst_73 : f32 to vector<8x1xf32>
      %197 = arith.cmpf ogt, %195, %196 : vector<8x1xf32>
      %cst_74 = arith.constant 2.000000e+01 : f32
      %198 = vector.broadcast %cst_74 : f32 to vector<8x1xf32>
      %199 = arith.minimumf %195, %198 : vector<8x1xf32>
      %200 = math.exp %199 : vector<8x1xf32>
      %cst_75 = arith.constant 1.000000e+00 : f32
      %201 = vector.broadcast %cst_75 : f32 to vector<8x1xf32>
      %202 = arith.addf %201, %200 : vector<8x1xf32>
      %203 = math.log %202 : vector<8x1xf32>
      %204 = arith.select %197, %195, %203 : vector<8x1xi1>, vector<8x1xf32>
      %205 = vector.extract_strided_slice %186 {offsets = [0, 25], sizes = [8, 1], strides = [1, 1]} : vector<8x32xf32> to vector<8x1xf32>
      %206 = arith.negf %205 : vector<8x1xf32>
      %207 = math.exp %206 : vector<8x1xf32>
      %cst_76 = arith.constant 1.000000e+00 : f32
      %208 = vector.broadcast %cst_76 : f32 to vector<8x1xf32>
      %209 = arith.addf %208, %207 : vector<8x1xf32>
      %210 = arith.divf %208, %209 : vector<8x1xf32>
      %211 = vector.extract_strided_slice %186 {offsets = [0, 26], sizes = [8, 3], strides = [1, 1]} : vector<8x32xf32> to vector<8x3xf32>
      %cst_77 = arith.constant dense<0xFF800000> : vector<8xf32>
      %212 = vector.multi_reduction <maximumf>, %211, %cst_77 [1] : vector<8x3xf32> to vector<8xf32>
      %213 = vector.shape_cast %212 : vector<8xf32> to vector<8x1xf32>
      %214 = vector.broadcast %213 : vector<8x1xf32> to vector<8x3xf32>
      %215 = arith.subf %211, %214 : vector<8x3xf32>
      %216 = math.exp %215 : vector<8x3xf32>
      %cst_78 = arith.constant dense<0.000000e+00> : vector<8xf32>
      %217 = vector.multi_reduction <add>, %216, %cst_78 [1] : vector<8x3xf32> to vector<8xf32>
      %218 = vector.shape_cast %217 : vector<8xf32> to vector<8x1xf32>
      %219 = tpu.reciprocal %218 {approx = true} : vector<8x1xf32> -> vector<8x1xf32>
      %220 = vector.broadcast %219 : vector<8x1xf32> to vector<8x3xf32>
      %221 = arith.mulf %216, %220 : vector<8x3xf32>
      %222 = vector.extract_strided_slice %186 {offsets = [0, 29], sizes = [8, 1], strides = [1, 1]} : vector<8x32xf32> to vector<8x1xf32>
      %cst_79 = arith.constant 2.000000e+01 : f32
      %223 = vector.broadcast %cst_79 : f32 to vector<8x1xf32>
      %224 = arith.cmpf ogt, %222, %223 : vector<8x1xf32>
      %cst_80 = arith.constant 2.000000e+01 : f32
      %225 = vector.broadcast %cst_80 : f32 to vector<8x1xf32>
      %226 = arith.minimumf %222, %225 : vector<8x1xf32>
      %227 = math.exp %226 : vector<8x1xf32>
      %cst_81 = arith.constant 1.000000e+00 : f32
      %228 = vector.broadcast %cst_81 : f32 to vector<8x1xf32>
      %229 = arith.addf %228, %227 : vector<8x1xf32>
      %230 = math.log %229 : vector<8x1xf32>
      %231 = arith.select %224, %222, %230 : vector<8x1xi1>, vector<8x1xf32>
      %cst_82 = arith.constant 1.000000e+00 : f32
      %232 = vector.broadcast %cst_82 : f32 to vector<8x1xf32>
      %233 = arith.addf %232, %231 : vector<8x1xf32>
      %c1 = arith.constant 1 : index
      %c0_83 = arith.constant 0 : index
      %c0_84 = arith.constant 0 : index
      %234 = vector.load %arg18[%c1, %c0_83, %c0_84] : memref<2x8x16xf32, #tpu.memory_space<vmem>>, vector<1x8x16xf32>
      %235 = vector.shape_cast %234 : vector<1x8x16xf32> to vector<8x16xf32>
      %cst_85 = arith.constant 1.000000e-16 : f32
      %236 = vector.broadcast %cst_85 : f32 to vector<8x8xf32>
      %237 = arith.addf %187, %236 : vector<8x8xf32>
      %cst_86 = arith.constant 1.000000e-16 : f32
      %238 = vector.broadcast %cst_86 : f32 to vector<8x16x8xf32>
      %239 = arith.addf %16, %238 : vector<8x16x8xf32>
      %240 = vector.shape_cast %237 : vector<8x8xf32> to vector<8x1x8xf32>
      %241 = vector.broadcast %240 : vector<8x1x8xf32> to vector<8x16x8xf32>
      %242 = arith.mulf %239, %241 : vector<8x16x8xf32>
      %cst_87 = arith.constant dense<0.000000e+00> : vector<8x16xf32>
      %243 = vector.multi_reduction <add>, %242, %cst_87 [2] : vector<8x16x8xf32> to vector<8x16xf32>
      %244 = arith.mulf %237, %237 : vector<8x8xf32>
      %cst_88 = arith.constant dense<0.000000e+00> : vector<8xf32>
      %245 = vector.multi_reduction <add>, %244, %cst_88 [1] : vector<8x8xf32> to vector<8xf32>
      %246 = vector.shape_cast %245 : vector<8xf32> to vector<8x1xf32>
      %247 = arith.mulf %239, %239 : vector<8x16x8xf32>
      %cst_89 = arith.constant dense<0.000000e+00> : vector<8x16xf32>
      %248 = vector.multi_reduction <add>, %247, %cst_89 [2] : vector<8x16x8xf32> to vector<8x16xf32>
      %cst_90 = arith.constant 1.000000e-16 : f32
      %249 = vector.broadcast %cst_90 : f32 to vector<8x1xf32>
      %250 = arith.maximumf %246, %249 : vector<8x1xf32>
      %251 = math.rsqrt %250 : vector<8x1xf32>
      %252 = vector.broadcast %251 : vector<8x1xf32> to vector<8x16xf32>
      %253 = arith.mulf %243, %252 : vector<8x16xf32>
      %cst_91 = arith.constant 1.000000e-16 : f32
      %254 = vector.broadcast %cst_91 : f32 to vector<8x16xf32>
      %255 = arith.maximumf %248, %254 : vector<8x16xf32>
      %256 = math.rsqrt %255 : vector<8x16xf32>
      %257 = arith.mulf %253, %256 : vector<8x16xf32>
      %258 = vector.broadcast %204 : vector<8x1xf32> to vector<8x16xf32>
      %259 = arith.mulf %258, %257 : vector<8x16xf32>
      %cst_92 = arith.constant dense<0xFF800000> : vector<8xf32>
      %260 = vector.multi_reduction <maximumf>, %259, %cst_92 [1] : vector<8x16xf32> to vector<8xf32>
      %261 = vector.shape_cast %260 : vector<8xf32> to vector<8x1xf32>
      %262 = vector.broadcast %261 : vector<8x1xf32> to vector<8x16xf32>
      %263 = arith.subf %259, %262 : vector<8x16xf32>
      %264 = math.exp %263 : vector<8x16xf32>
      %cst_93 = arith.constant dense<0.000000e+00> : vector<8xf32>
      %265 = vector.multi_reduction <add>, %264, %cst_93 [1] : vector<8x16xf32> to vector<8xf32>
      %266 = vector.shape_cast %265 : vector<8xf32> to vector<8x1xf32>
      %267 = tpu.reciprocal %266 {approx = true} : vector<8x1xf32> -> vector<8x1xf32>
      %268 = vector.broadcast %267 : vector<8x1xf32> to vector<8x16xf32>
      %269 = arith.mulf %264, %268 : vector<8x16xf32>
      %270 = vector.broadcast %210 : vector<8x1xf32> to vector<8x16xf32>
      %271 = arith.mulf %270, %269 : vector<8x16xf32>
      %cst_94 = arith.constant 1.000000e+00 : f32
      %272 = vector.broadcast %cst_94 : f32 to vector<8x1xf32>
      %273 = arith.subf %272, %210 : vector<8x1xf32>
      %274 = vector.broadcast %273 : vector<8x1xf32> to vector<8x16xf32>
      %275 = arith.mulf %274, %235 : vector<8x16xf32>
      %276 = arith.addf %271, %275 : vector<8x16xf32>
      %277 = vector.extract_strided_slice %276 {offsets = [0, 15], sizes = [8, 1], strides = [1, 1]} : vector<8x16xf32> to vector<8x1xf32>
      %278 = vector.extract_strided_slice %276 {offsets = [0, 0], sizes = [8, 15], strides = [1, 1]} : vector<8x16xf32> to vector<8x15xf32>
      %279 = tpu.concatenate %277, %278 in 1 : vector<8x1xf32>, vector<8x15xf32> -> vector<8x16xf32>
      %280 = vector.extract_strided_slice %276 {offsets = [0, 1], sizes = [8, 15], strides = [1, 1]} : vector<8x16xf32> to vector<8x15xf32>
      %281 = vector.extract_strided_slice %276 {offsets = [0, 0], sizes = [8, 1], strides = [1, 1]} : vector<8x16xf32> to vector<8x1xf32>
      %282 = tpu.concatenate %280, %281 in 1 : vector<8x15xf32>, vector<8x1xf32> -> vector<8x16xf32>
      %283 = vector.extract_strided_slice %221 {offsets = [0, 0], sizes = [8, 1], strides = [1, 1]} : vector<8x3xf32> to vector<8x1xf32>
      %284 = vector.broadcast %283 : vector<8x1xf32> to vector<8x16xf32>
      %285 = arith.mulf %284, %279 : vector<8x16xf32>
      %286 = vector.extract_strided_slice %221 {offsets = [0, 1], sizes = [8, 1], strides = [1, 1]} : vector<8x3xf32> to vector<8x1xf32>
      %287 = vector.broadcast %286 : vector<8x1xf32> to vector<8x16xf32>
      %288 = arith.mulf %287, %276 : vector<8x16xf32>
      %289 = arith.addf %285, %288 : vector<8x16xf32>
      %290 = vector.extract_strided_slice %221 {offsets = [0, 2], sizes = [8, 1], strides = [1, 1]} : vector<8x3xf32> to vector<8x1xf32>
      %291 = vector.broadcast %290 : vector<8x1xf32> to vector<8x16xf32>
      %292 = arith.mulf %291, %282 : vector<8x16xf32>
      %293 = arith.addf %289, %292 : vector<8x16xf32>
      %cst_95 = arith.constant 9.99999935E-39 : f32
      %294 = vector.broadcast %cst_95 : f32 to vector<8x16xf32>
      %295 = arith.addf %293, %294 : vector<8x16xf32>
      %296 = math.log %295 : vector<8x16xf32>
      %297 = vector.broadcast %233 : vector<8x1xf32> to vector<8x16xf32>
      %298 = arith.mulf %297, %296 : vector<8x16xf32>
      %299 = math.exp %298 : vector<8x16xf32>
      %cst_96 = arith.constant dense<0.000000e+00> : vector<8xf32>
      %300 = vector.multi_reduction <add>, %299, %cst_96 [1] : vector<8x16xf32> to vector<8xf32>
      %301 = vector.shape_cast %300 : vector<8xf32> to vector<8x1xf32>
      %cst_97 = arith.constant 1.000000e-16 : f32
      %302 = vector.broadcast %cst_97 : f32 to vector<8x1xf32>
      %303 = arith.addf %301, %302 : vector<8x1xf32>
      %304 = tpu.reciprocal %303 {approx = true} : vector<8x1xf32> -> vector<8x1xf32>
      %305 = vector.broadcast %304 : vector<8x1xf32> to vector<8x16xf32>
      %306 = arith.mulf %299, %305 : vector<8x16xf32>
      %c1_98 = arith.constant 1 : index
      %c0_99 = arith.constant 0 : index
      %c0_100 = arith.constant 0 : index
      %307 = vector.load %arg18[%c1_98, %c0_99, %c0_100] : memref<2x8x16xf32, #tpu.memory_space<vmem>>, vector<1x8x16xf32>
      %308 = vector.shape_cast %307 : vector<1x8x16xf32> to vector<8x16xf32>
      %309 = vector.shape_cast %306 : vector<8x16xf32> to vector<1x8x16xf32>
      tpu.vector_store %arg18[%c1_98, %c0_99, %c0_100], %309 {strides = array<i32>} : memref<2x8x16xf32, #tpu.memory_space<vmem>>, vector<1x8x16xf32>,
      %310 = vector.shape_cast %306 : vector<8x16xf32> to vector<8x16x1xf32>
      %311 = vector.shape_cast %193 : vector<8x8xf32> to vector<8x1x8xf32>
      %312 = vector.broadcast %310 : vector<8x16x1xf32> to vector<8x16x8xf32>
      %313 = vector.broadcast %311 : vector<8x1x8xf32> to vector<8x16x8xf32>
      %314 = arith.mulf %312, %313 : vector<8x16x8xf32>
      %315 = vector.shape_cast %306 : vector<8x16xf32> to vector<8x16x1xf32>
      %316 = vector.shape_cast %194 : vector<8x8xf32> to vector<8x1x8xf32>
      %317 = vector.broadcast %315 : vector<8x16x1xf32> to vector<8x16x8xf32>
      %318 = vector.broadcast %316 : vector<8x1x8xf32> to vector<8x16x8xf32>
      %319 = arith.mulf %317, %318 : vector<8x16x8xf32>
      %cst_101 = arith.constant 1.000000e+00 : f32
      %320 = vector.broadcast %cst_101 : f32 to vector<8x16x8xf32>
      %321 = arith.subf %320, %314 : vector<8x16x8xf32>
      %322 = arith.mulf %16, %321 : vector<8x16x8xf32>
      %323 = arith.addf %322, %319 : vector<8x16x8xf32>
      %c0_102 = arith.constant 0 : index
      %c0_103 = arith.constant 0 : index
      %c0_104 = arith.constant 0 : index
      %324 = vector.load %arg19[%c0_102, %c0_103, %c0_104] : memref<8x16x8xf32, #tpu.memory_space<vmem>>, vector<8x16x8xf32>
      tpu.vector_store %arg19[%c0_102, %c0_103, %c0_104], %323 {strides = array<i32>} : memref<8x16x8xf32, #tpu.memory_space<vmem>>, vector<8x16x8xf32>,
      %c0_105 = arith.constant 0 : index
      %c0_106 = arith.constant 0 : index
      %325 = vector.load %arg15[%c0_105, %c0_106] : memref<8x8xf32, #tpu.memory_space<vmem>>, vector<8x8xf32>
      tpu.vector_store %arg15[%c0_105, %c0_106], %185 {strides = array<i32>} : memref<8x8xf32, #tpu.memory_space<vmem>>, vector<8x8xf32>,
      %326 = vector.extract_strided_slice %64 {offsets = [0, 48], sizes = [8, 8], strides = [1, 1]} : vector<8x56xf32> to vector<8x8xf32>
      %c0_107 = arith.constant 0 : index
      %c0_108 = arith.constant 0 : index
      %327 = vector.load %arg13[%c0_107, %c0_108] : memref<8x8xf32, #tpu.memory_space<vmem>>, vector<8x8xf32>
      %cst_109 = arith.constant dense<0.000000e+00> : vector<8x8xf32>
      %328 = tpu.matmul %185, %327, %cst_109 {dimension_numbers = #tpu.dot_dimension_numbers<[1], [0], [0], [1], [0, 0, 1, 1], [], []>} : vector<8x8xf32>, vector<8x8xf32>, vector<8x8xf32> -> vector<8x8xf32>
      %329 = arith.addf %326, %328 : vector<8x8xf32>
      %330 = arith.negf %329 : vector<8x8xf32>
      %331 = math.exp %330 : vector<8x8xf32>
      %cst_110 = arith.constant 1.000000e+00 : f32
      %332 = vector.broadcast %cst_110 : f32 to vector<8x8xf32>
      %333 = arith.addf %332, %331 : vector<8x8xf32>
      %334 = arith.divf %332, %333 : vector<8x8xf32>
      %335 = arith.index_cast %11 : i32 to index
      %c0_111 = arith.constant 0 : index
      %c0_112 = arith.constant 0 : index
      %336 = vector.load %arg14[%335, %c0_111, %c0_112] : memref<8x8x8xf32, #tpu.memory_space<vmem>>, vector<1x8x8xf32>
      %337 = vector.shape_cast %336 : vector<1x8x8xf32> to vector<8x8xf32>
      %338 = vector.shape_cast %334 : vector<8x8xf32> to vector<1x8x8xf32>
      tpu.vector_store %arg14[%335, %c0_111, %c0_112], %338 {strides = array<i32>} : memref<8x8x8xf32, #tpu.memory_space<vmem>>, vector<1x8x8xf32>,
    }
    %c8_i32_2 = arith.constant 8 : i32
    return
  }
  func.func @transform_0(%arg0: i32) -> (i32, i32, i32) {
    %c0_i32 = arith.constant 0 : i32
    %c0_i32_0 = arith.constant 0 : i32
    %c0_i32_1 = arith.constant 0 : i32
    return %arg0, %c0_i32, %c0_i32_0 : i32, i32, i32
  }
  func.func @transform_1(%arg0: i32) -> (i32, i32) {
    %c0_i32 = arith.constant 0 : i32
    %c0_i32_0 = arith.constant 0 : i32
    %c0_i32_1 = arith.constant 0 : i32
    return %c0_i32, %c0_i32_0 : i32, i32
  }
  func.func @transform_2(%arg0: i32) -> (i32, i32, i32) {
    %c0_i32 = arith.constant 0 : i32
    %c0_i32_0 = arith.constant 0 : i32
    %c0_i32_1 = arith.constant 0 : i32
    %c0_i32_2 = arith.constant 0 : i32
    return %c0_i32, %c0_i32_0, %c0_i32_1 : i32, i32, i32
  }
  func.func @transform_3(%arg0: i32) -> (i32, i32, i32) {
    %c0_i32 = arith.constant 0 : i32
    %c0_i32_0 = arith.constant 0 : i32
    %c0_i32_1 = arith.constant 0 : i32
    %c0_i32_2 = arith.constant 0 : i32
    return %c0_i32, %c0_i32_0, %c0_i32_1 : i32, i32, i32
  }
  func.func @transform_4(%arg0: i32) -> (i32, i32, i32) {
    %c0_i32 = arith.constant 0 : i32
    %c0_i32_0 = arith.constant 0 : i32
    %c0_i32_1 = arith.constant 0 : i32
    %c0_i32_2 = arith.constant 0 : i32
    return %c0_i32, %c0_i32_0, %c0_i32_1 : i32, i32, i32
  }
  func.func @transform_5(%arg0: i32) -> (i32, i32, i32) {
    %c0_i32 = arith.constant 0 : i32
    %c0_i32_0 = arith.constant 0 : i32
    %c0_i32_1 = arith.constant 0 : i32
    %c0_i32_2 = arith.constant 0 : i32
    return %c0_i32, %c0_i32_0, %c0_i32_1 : i32, i32, i32
  }
  func.func @transform_6(%arg0: i32) -> (i32, i32) {
    %c0_i32 = arith.constant 0 : i32
    %c0_i32_0 = arith.constant 0 : i32
    %c0_i32_1 = arith.constant 0 : i32
    return %c0_i32, %c0_i32_0 : i32, i32
  }
  func.func @transform_7(%arg0: i32) -> (i32, i32) {
    %c0_i32 = arith.constant 0 : i32
    %c0_i32_0 = arith.constant 0 : i32
    %c0_i32_1 = arith.constant 0 : i32
    return %c0_i32, %c0_i32_0 : i32, i32
  }
  func.func @transform_8(%arg0: i32) -> (i32, i32) {
    %c0_i32 = arith.constant 0 : i32
    %c0_i32_0 = arith.constant 0 : i32
    %c0_i32_1 = arith.constant 0 : i32
    return %c0_i32, %c0_i32_0 : i32, i32
  }
  func.func @transform_9(%arg0: i32) -> (i32, i32) {
    %c0_i32 = arith.constant 0 : i32
    %c0_i32_0 = arith.constant 0 : i32
    %c0_i32_1 = arith.constant 0 : i32
    return %c0_i32, %c0_i32_0 : i32, i32
  }
  func.func @transform_10(%arg0: i32) -> (i32, i32) {
    %c0_i32 = arith.constant 0 : i32
    %c0_i32_0 = arith.constant 0 : i32
    %c0_i32_1 = arith.constant 0 : i32
    return %c0_i32, %c0_i32_0 : i32, i32
  }
  func.func @transform_11(%arg0: i32) -> (i32, i32) {
    %c0_i32 = arith.constant 0 : i32
    %c0_i32_0 = arith.constant 0 : i32
    %c0_i32_1 = arith.constant 0 : i32
    return %c0_i32, %c0_i32_0 : i32, i32
  }
  func.func @transform_12(%arg0: i32) -> (i32, i32) {
    %c0_i32 = arith.constant 0 : i32
    %c0_i32_0 = arith.constant 0 : i32
    %c0_i32_1 = arith.constant 0 : i32
    return %c0_i32, %c0_i32_0 : i32, i32
  }
  func.func @transform_13(%arg0: i32) -> (i32, i32, i32) {
    %c0_i32 = arith.constant 0 : i32
    %c0_i32_0 = arith.constant 0 : i32
    %c0_i32_1 = arith.constant 0 : i32
    return %arg0, %c0_i32, %c0_i32_0 : i32, i32, i32
  }
  func.func @transform_14(%arg0: i32) -> (i32, i32) {
    %c0_i32 = arith.constant 0 : i32
    %c0_i32_0 = arith.constant 0 : i32
    %c0_i32_1 = arith.constant 0 : i32
    return %c0_i32, %c0_i32_0 : i32, i32
  }
  func.func @transform_15(%arg0: i32) -> (i32, i32, i32) {
    %c0_i32 = arith.constant 0 : i32
    %c0_i32_0 = arith.constant 0 : i32
    %c0_i32_1 = arith.constant 0 : i32
    %c0_i32_2 = arith.constant 0 : i32
    return %c0_i32, %c0_i32_0, %c0_i32_1 : i32, i32, i32
  }
  func.func @transform_16(%arg0: i32) -> (i32, i32, i32) {
    %c0_i32 = arith.constant 0 : i32
    %c0_i32_0 = arith.constant 0 : i32
    %c0_i32_1 = arith.constant 0 : i32
    %c0_i32_2 = arith.constant 0 : i32
    return %c0_i32, %c0_i32_0, %c0_i32_1 : i32, i32, i32
  }
  func.func @transform_17(%arg0: i32) -> (i32, i32, i32) {
    %c0_i32 = arith.constant 0 : i32
    %c0_i32_0 = arith.constant 0 : i32
    %c0_i32_1 = arith.constant 0 : i32
    %c0_i32_2 = arith.constant 0 : i32
    return %c0_i32, %c0_i32_0, %c0_i32_1 : i32, i32, i32
  }
  func.func @transform_18(%arg0: i32) -> (i32, i32, i32) {
    %c0_i32 = arith.constant 0 : i32
    %c0_i32_0 = arith.constant 0 : i32
    %c0_i32_1 = arith.constant 0 : i32
    %c0_i32_2 = arith.constant 0 : i32
    return %c0_i32, %c0_i32_0, %c0_i32_1 : i32, i32, i32
  }
}

</mosaic_0001>

<bundles_post_ra>
// kernel: forward_seq.1
= control target key start
LH: loop header
LB: loop body
LE: loop exit
PB: predicated region body
PF: predicated region fallthrough
CT: control target
= control target key end

     0   :  { %s3923_s0 = inlined_call_operand.vmem [shape: f32[8,8,8], index: 0, kind: input, shape index: {}]   ;;  %s3924_s1 = inlined_call_operand.vmem [shape: f32[8,8], index: 1, kind: input, shape index: {}, may-alias: {1,14}]   ;;  %s3925_s2 = inlined_call_operand.vmem [shape: f32[1,8,32], index: 2, kind: input, shape index: {}, may-alias: {2,15}]   ;;  %s3926_s3 = inlined_call_operand.vmem [shape: f32[1,8,32], index: 3, kind: input, shape index: {}, may-alias: {3,16}]   ;;  %s3927_s4 = inlined_call_operand.vmem [shape: f32[2,8,16], index: 4, kind: input, shape index: {}, may-alias: {4,17}]   ;;  %s3928_s5 = inlined_call_operand.vmem [shape: f32[8,16,8], index: 5, kind: input, shape index: {}, may-alias: {5,18}]   ;;  %s3929_s6 = inlined_call_operand.vmem [shape: f32[8,128], index: 6, kind: input, shape index: {}]   ;;  %s3930_s7 = inlined_call_operand.vmem [shape: f32[8,128], index: 7, kind: input, shape index: {}]   ;;  %s3931_s8 = inlined_call_operand.vmem [shape: f32[32,128], index: 8, kind: input, shape index: {}]   ;;  %s3932_s9 = inlined_call_operand.vmem [shape: f32[1,128], index: 9, kind: input, shape index: {}]   ;;  %s3933_s10 = inlined_call_operand.vmem [shape: f32[32,56], index: 10, kind: input, shape index: {}]   ;;  %s3934_s11 = inlined_call_operand.vmem [shape: f32[1,56], index: 11, kind: input, shape index: {}]   ;;  %s3935_s12 = inlined_call_operand.vmem [shape: f32[8,8], index: 12, kind: input, shape index: {}]   ;;  %s3936_s13 = inlined_call_operand.hbm [shape: f32[8,8,8], index: 13, kind: output, shape index: {0}]   ;;  %s3937_s14 = inlined_call_operand.vmem [shape: f32[8,8], index: 14, kind: output, shape index: {1}, may-alias: {1,14}]   ;;  %s3938_s15 = inlined_call_operand.vmem [shape: f32[1,8,32], index: 15, kind: output, shape index: {2}, may-alias: {2,15}]   ;;  %s3939_s16 = inlined_call_operand.vmem [shape: f32[1,8,32], index: 16, kind: output, shape index: {3}, may-alias: {3,16}]   ;;  %s3940_s17 = inlined_call_operand.vmem [shape: f32[2,8,16], index: 17, kind: output, shape index: {4}, may-alias: {4,17}]   ;;  %s3941_s18 = inlined_call_operand.vmem [shape: f32[8,16,8], index: 18, kind: output, shape index: {5}, may-alias: {5,18}]  }
   0x1   :  { %3964 = sst [smem:[#allocation18_spill]] %s3923_s0 }
   0x2   :  { %3965 = sst [smem:[#allocation19_spill]] %s3924_s1 }
   0x3   :  { %3966 = sst [smem:[#allocation20_spill]] %s3925_s2 }
   0x4   :  { %24 = vsyncpa [#allocation3], 0  ;;  %s3967_s29 = sld [smem:[#allocation19_spill]]  ;;  %vm56_vm0 = vcmask 64512   ;;  %vm59_vm1 = vcmask 261120   ;;  %v3942_v2 = vlaneseq  ;;  %v61_v3 = vld [vmem:[%s3926_s3] sm:$0xff] }
   0x5   :  { %s3968_s19 = sld [smem:[#allocation20_spill]]  ;;  %v63_v4 = vld [vmem:[%s3927_s4] sm:$0xff]  ;;  %vm65_vm2 = vcmask 130048   ;;  %v64_v5 = vld [vmem:[%s3927_s4 + $0x8] sm:$0xff]  ;;  %62 = vst.msk [vmem:[%s3939_s16] sm:$0xff] %vm59_vm1, %v61_v3  ;;  %v70_v8 = vld [vmem:[%s3928_s5 + $0x10] sm:$0xff] }
   0x6   :  { %66 = vst.msk [vmem:[%s3940_s17] sm:$0xff] %vm65_vm2, %v63_v4  ;;  %67 = vst.msk [vmem:[%s3940_s17 + $0x8] sm:$0xff] %vm65_vm2, %v64_v5  ;;  %v68_v6 = vld [vmem:[%s3928_s5] sm:$0xff]  ;;  %v69_v7 = vld [vmem:[%s3928_s5 + $0x8] sm:$0xff]  ;;  %v2765_v9 = vand.u32 127, %v3942_v2  ;;  %v3970_v23 = vmov 0 }
   0x7   :  { %84 = vst.msk [vmem:[%s3941_s18] sm:$0xff] %vm56_vm0, %v68_v6  ;;  %85 = vst.msk [vmem:[%s3941_s18 + $0x8] sm:$0xff] %vm56_vm0, %v69_v7  ;;  %s2880_s30 = smov 0  }
   0x8   :  { %3969 = vst [vmem:[#allocation5_spill] sm:$0xff] %v2765_v9  ;;  %86 = vst.msk [vmem:[%s3941_s18 + $0x10] sm:$0xff] %vm56_vm0, %v70_v8  ;;  %vm102_vm3 = vcmp.ge.s32.totalorder %v2765_v9, 64  ;;  %vm103_vm4 = vcmp.lt.s32.totalorder %v2765_v9, 96 }
   0x9   :  { %vm2872_vm5 = vmand %vm102_vm3, %vm103_vm4 }
   0xa   :  { %v55_v0 = vld [vmem:[%s3967_s29] sm:$0xff]  ;;  %v3971_v23 = vsel %vm2872_vm5, 4294967295, %v3970_v23 }
   0xb   :  { %v58_v1 = vld [vmem:[%s3968_s19] sm:$0xff]  ;;  %57 = vst.msk [vmem:[%s3937_s14] sm:$0xff] %vm56_vm0, %v55_v0  ;;  %3972 = vst [vmem:[#allocation6_spill] sm:$0xff] %v3971_v23 }
   0xc   :  { %60 = vst.msk [vmem:[%s3938_s15] sm:$0xff] %vm59_vm1, %v58_v1 }
   0xf   :  { %v71_v10 = vld [vmem:[%s3928_s5 + $0x18] sm:$0xff]  ;;  %v72_v11 = vld [vmem:[%s3928_s5 + $0x20] sm:$0xff]  ;;  %v73_v12 = vld [vmem:[%s3928_s5 + $0x28] sm:$0xff] }
  0x10   :  { %87 = vst.msk [vmem:[%s3941_s18 + $0x18] sm:$0xff] %vm56_vm0, %v71_v10  ;;  %88 = vst.msk [vmem:[%s3941_s18 + $0x20] sm:$0xff] %vm56_vm0, %v72_v11 }
  0x11   :  { %89 = vst.msk [vmem:[%s3941_s18 + $0x28] sm:$0xff] %vm56_vm0, %v73_v12 }
  0x18   :  { %v74_v13 = vld [vmem:[%s3928_s5 + $0x30] sm:$0xff]  ;;  %v75_v14 = vld [vmem:[%s3928_s5 + $0x38] sm:$0xff]  ;;  %v76_v15 = vld [vmem:[%s3928_s5 + $0x40] sm:$0xff] }
  0x19   :  { %90 = vst.msk [vmem:[%s3941_s18 + $0x30] sm:$0xff] %vm56_vm0, %v74_v13  ;;  %91 = vst.msk [vmem:[%s3941_s18 + $0x38] sm:$0xff] %vm56_vm0, %v75_v14 }
  0x1a   :  { %92 = vst.msk [vmem:[%s3941_s18 + $0x40] sm:$0xff] %vm56_vm0, %v76_v15 }
  0x21   :  { %v77_v16 = vld [vmem:[%s3928_s5 + $0x48] sm:$0xff]  ;;  %v78_v17 = vld [vmem:[%s3928_s5 + $0x50] sm:$0xff]  ;;  %v79_v18 = vld [vmem:[%s3928_s5 + $0x58] sm:$0xff] }
  0x22   :  { %93 = vst.msk [vmem:[%s3941_s18 + $0x48] sm:$0xff] %vm56_vm0, %v77_v16  ;;  %94 = vst.msk [vmem:[%s3941_s18 + $0x50] sm:$0xff] %vm56_vm0, %v78_v17 }
  0x23   :  { %95 = vst.msk [vmem:[%s3941_s18 + $0x58] sm:$0xff] %vm56_vm0, %v79_v18 }
  0x2a   :  { %v80_v19 = vld [vmem:[%s3928_s5 + $0x60] sm:$0xff]  ;;  %v81_v20 = vld [vmem:[%s3928_s5 + $0x68] sm:$0xff]  ;;  %v82_v21 = vld [vmem:[%s3928_s5 + $0x70] sm:$0xff] }
  0x2b   :  { %96 = vst.msk [vmem:[%s3941_s18 + $0x60] sm:$0xff] %vm56_vm0, %v80_v19  ;;  %97 = vst.msk [vmem:[%s3941_s18 + $0x68] sm:$0xff] %vm56_vm0, %v81_v20 }
  0x2c   :  { %98 = vst.msk [vmem:[%s3941_s18 + $0x70] sm:$0xff] %vm56_vm0, %v82_v21 }
  0x33   :  { %v83_v22 = vld [vmem:[%s3928_s5 + $0x78] sm:$0xff] }
  0x34   :  { %99 = vst.msk [vmem:[%s3941_s18 + $0x78] sm:$0xff] %vm56_vm0, %v83_v22 }
  0x35 LB: > { %v3973_v9 = vld [vmem:[#allocation5_spill] sm:$0xff]  ;;  %v2593_v26 = vmov 0.0   ;;  %vm2594_vm6 = vmmov 0   ;;  %v285_v28 = vld [vmem:[%s3931_s8 + $0x18] sm:$0xff]  ;;  %s2339_s22 = sshll.u32 %s2591_s30, 3  ;;  %s3975_s24 = sld [smem:[#allocation18_spill]]  ;;  %v3977_v2 = vlaneseq  ;;  %s2591_s30 = sphi %s2880_s30, %s110_s30  }
  0x36   : > { %v134_v24 = vld [vmem:[%s3930_s7] sm:$0xff]  ;;  %2369 = vmatprep.subr.mxu0 %v2593_v26  ;;  %2371 = vmatprep.mubr.msk.f32.mxu0 %vm2594_vm6, %v2593_v26  ;;  %v284_v30 = vld [vmem:[%s3931_s8 + $0x10] sm:$0xff]  ;;  %v283_v31 = vld [vmem:[%s3931_s8 + $0x8] sm:$0xff]  ;;  %s2595_s4 = smov 64   ;;  %s2596_s23 = smov 32   ;;  %vm508_vm8 = vcmask 105552  }
  0x37   : > { %v114_v25 = vld [vmem:[%s3937_s14] sm:$0xff]  ;;  %2370 = vmatpush3.msra.mxu0 %v134_v24  ;;  %2374 = vmatprep.subr.mxu1 %v2593_v26  ;;  %v414_v60 = vld [vmem:[%s3933_s10 + $0x18] sm:$0xff]  ;;  %v413_v61 = vld [vmem:[%s3933_s10 + $0x10] sm:$0xff]  ;;  %s2600_s21 = smov 112   ;;  %vm951_vm9 = vcmask 130112   ;;  %vm1016_vm10 = vcmask 1041409  }
  0x38   : > { %v133_v27 = vld [vmem:[%s3929_s6] sm:$0xff]  ;;  %2372 = vmatmul.mubr.msk.f32.vlgmr.msra.gmra.mxu0 %vm56_vm0, %v114_v25  ;;  %2379 = vmatprep.subr.mxu0 %v2593_v26  ;;  %v412_v62 = vld [vmem:[%s3933_s10 + $0x8] sm:$0xff]  ;;  %v117_v1 = vld [vmem:[%s3941_s18 + $0x10] sm:$0xff]  ;;  %vm1018_vm11 = vcmask 1042434   ;;  %vm1020_vm12 = vcmask 1043459   ;;  %vm1022_vm13 = vcmask 1044484  }
  0x39   : > { %2375 = vmatpush3.msra.mxu1 %v133_v27  ;;  %2376 = vmatprep.mubr.msk.f32.mxu1 %vm2594_vm6, %v2593_v26  ;;  %v282_v32 = vld [vmem:[%s3931_s8] sm:$0xff]  ;;  %v2969_v3 = vadd.f32 1e-16, %v117_v1  ;;  %v121_v5 = vld [vmem:[%s3941_s18 + $0x30] sm:$0xff]  ;;  %vm1024_vm14 = vcmask 1045509   ;;  %vm1026_vm15 = vcmask 1046534  }
  0x3a   : > { %2380 = vmatpush3.msra.mxu0 %v285_v28  ;;  %2387 = vmatprep.mubr.msk.f32.mxu0 %vm2594_vm6, %v2593_v26  ;;  %v131_v33 = vld [vmem:[%s3938_s15] sm:$0xff]  ;;  %v2981_v8 = vadd.f32 1e-16, %v121_v5  ;;  %v125_v16 = vld [vmem:[%s3941_s18 + $0x50] sm:$0xff]  ;;  %vm1028_vm3 = vcmask 1047559   ;;  %s2602_s2 = smov 118  }
  0x3b   : > { %s112_s25 = scalar_lea.vmem %s3975_s24, %s2339_s22  ;;  %2381 = vmatprep.subr.mxu0 %v2593_v26  ;;  %2390 = vmatprep.subr.mxu1 %v2593_v26  ;;  %v2343_v40 = vld [vmem:[%s3932_s9] ss:$0 sm:$0xff]  ;;  %v704_v6 = vmul.f32 %v2969_v3, %v2969_v3  ;;  %v3000_v21 = vadd.f32 1e-16, %v125_v16  ;;  %v130_v5 = vld [vmem:[%s3941_s18 + $0x78] sm:$0xff]  ;;  %vm519_vm4 = vcmask 23552  }
  0x3c   : > { %v113_v29 = vld [vmem:[%s112_s25] sm:$0xff]  ;;  %2382 = vmatpush3.msra.mxu0 %v284_v30  ;;  %v708_v14 = vmul.f32 %v2981_v8, %v2981_v8  ;;  %s2606_s25 = smov 113   ;;  %s2608_s26 = smov 1  }
  0x3d   : > { %2377 = vmatmul.mubr.msk.f32.vlgmr.msra.gmra.mxu1 %vm56_vm0, %v113_v29  ;;  %2383 = vmatprep.subr.mxu0 %v2593_v26  ;;  %v132_v53 = vld [vmem:[%s3939_s16] sm:$0xff]  ;;  %v724_v11 = vsel %vm56_vm0, %v704_v6, 0.0  ;;  %v712_v25 = vmul.f32 %v3000_v21, %v3000_v21  ;;  %s2609_s27 = smov 127   ;;  %s2610_s28 = smov 15  }
  0x3e   : > { %2398 = vmatprep.mubr.msk.f32.mxu1 %vm2594_vm6, %v2593_v26  ;;  %2384 = vmatpush3.msra.mxu0 %v283_v31  ;;  %v411_v63 = vld [vmem:[%s3933_s10] sm:$0xff]  ;;  %v736_v19 = vsel %vm56_vm0, %v708_v14, 0.0  ;;  %s2613_s29 = smov 86   ;;  %s2619_s1 = smov 48  }
  0x3f   : > { %2385 = vmatprep.subr.mxu0 %v2593_v26  ;;  %2391 = vmatpush3.msra.mxu1 %v414_v60  ;;  %v119_v4 = vld [vmem:[%s3941_s18 + $0x20] sm:$0xff]  ;;  %v748_v27 = vsel %vm56_vm0, %v712_v25, 0.0  ;;  %s2620_s20 = smov 104   ;;  %s110_s30 = sadd.s32 1, %s2591_s30  }
  0x40   : > { %2386 = vmatpush3.msra.mxu0 %v282_v32  ;;  %2392 = vmatprep.subr.mxu1 %v2593_v26  ;;  %v2979_v7 = vadd.f32 1e-16, %v119_v4  ;;  %v123_v10 = vld [vmem:[%s3941_s18 + $0x40] sm:$0xff]  ;;  %v116_v32 = vld [vmem:[%s3941_s18 + $0x8] sm:$0xff]  ;;  %p107_p0 = scmp.ge.s32.totalorder %s110_s30, 8  }
  0x41   : > { %2388 = vmatmul.mubr.msk.f32.vlgmr.msra.gmra.mxu0 %vm59_vm1, %v131_v33  ;;  %2401 = vmatprep.subr.mxu0 %v2593_v26  ;;  %v2992_v15 = vadd.f32 1e-16, %v123_v10  ;;  %v127_v22 = vld [vmem:[%s3941_s18 + $0x60] sm:$0xff]  ;;  %v3095_v10 = vadd.f32 1e-16, %v130_v5 }
  0x42   : > { %2403 = vmatprep.mubr.msk.f32.mxu0 %vm2594_vm6, %v2593_v26  ;;  %2393 = vmatpush3.msra.mxu1 %v413_v61  ;;  %v706_v12 = vmul.f32 %v2979_v7, %v2979_v7  ;;  %v115_v30 = vld [vmem:[%s3941_s18] sm:$0xff]  ;;  %v128_v61 = vld [vmem:[%s3941_s18 + $0x68] sm:$0xff]  ;;  %vm1065_vm6 = vcmask 7168  }
  0x43   : > { %2394 = vmatprep.subr.mxu1 %v2593_v26  ;;  %v710_v20 = vmul.f32 %v2992_v15, %v2992_v15  ;;  %v3018_v31 = vadd.f32 1e-16, %v115_v30  ;;  %v2346_v16 = vld [vmem:[%s3934_s11] ss:$0 sm:$0xff] }
  0x44   : > { %2395 = vmatpush3.msra.mxu1 %v412_v62  ;;  %v730_v13 = vsel %vm56_vm0, %v706_v12, 0.0 }
  0x45   : > { %2396 = vmatprep.subr.mxu1 %v2593_v26  ;;  %v742_v24 = vsel %vm56_vm0, %v710_v20, 0.0  ;;  %v3009_v26 = vadd.f32 1e-16, %v127_v22  ;;  %v702_v33 = vmul.f32 %v3018_v31, %v3018_v31 }
  0x46   : > { %2397 = vmatpush3.msra.mxu1 %v411_v63 }
  0x47   : > { %v714_v28 = vmul.f32 %v3009_v26, %v3009_v26 }
  0x49   : > { %v754_v29 = vsel %vm56_vm0, %v714_v28, 0.0 }
  0xf8   : > { %v205_v34 = vpop.f32.mrf.mxu0 }
  0xfa   : > { %v2373_v35 = vpop.f32.mrf.mxu0 }
  0xfb   : > { %v118_v35 = vld [vmem:[%s3941_s18 + $0x18] sm:$0xff] }
  0xfd   : > { %v278_v36 = vpop.f32.mrf.mxu1 }
  0xfe   : > { %v279_v38 = vadd.f32 %v278_v36, %v205_v34  ;;  %v3025_v34 = vadd.f32 1e-16, %v116_v32  ;;  %v718_v36 = vsel %vm56_vm0, %v702_v33, 0.0 }
  0xff   : > { %v2378_v37 = vpop.f32.mrf.mxu1 }
 0x100   : > { %v703_v37 = vmul.f32 %v3025_v34, %v3025_v34 }
 0x101   : > { %v356_v39 = vpop.f32.mrf.mxu0 }
 0x102   : > { %v360_v41 = vadd.f32 %v356_v39, %v279_v38  ;;  %v3033_v38 = vadd.f32 1e-16, %v118_v35  ;;  %v120_v39 = vld [vmem:[%s3941_s18 + $0x28] sm:$0xff] }
 0x103   : > { %v2389_v42 = vpop.f32.mrf.mxu0 }
 0x104   : > { %v368_v43 = vadd.f32 %v2343_v40, %v360_v41  ;;  %v721_v40 = vsel %vm56_vm0, %v703_v37, 0.0  ;;  %v705_v41 = vmul.f32 %v3033_v38, %v3033_v38  ;;  %v3041_v42 = vadd.f32 1e-16, %v120_v39 }
 0x106   : > { %v369_v44 = vmul.f32 2.0, %v368_v43 }
 0x108   : > { %v370_v45 = vsel %vm2872_vm5, %v369_v44, %v368_v43  ;;  %v122_v43 = vld [vmem:[%s3941_s18 + $0x38] sm:$0xff]  ;;  %v727_v44 = vsel %vm56_vm0, %v705_v41, 0.0 }
 0x109   : > { %v2344_v46 = vmul.f32 -1.442695, %v370_v45  ;;  %v707_v45 = vmul.f32 %v3041_v42, %v3041_v42 }
 0x10b   : > { %2465 = vpow2.f32 %v2344_v46  ;;  %v3049_v46 = vadd.f32 1e-16, %v122_v43 }
 0x118   : > { %v2466_v47 = vpop.eup %2465 }
 0x119   : > { %v374_v48 = vadd.f32 1.0, %v2466_v47  ;;  %v124_v47 = vld [vmem:[%s3941_s18 + $0x48] sm:$0xff] }
 0x11b   : > { %2467 = vrcp.f32 %v374_v48  ;;  %v733_v48 = vsel %vm56_vm0, %v707_v45, 0.0 }
 0x128   : > { %v2468_v49 = vpop.eup %2467 }
 0x129   : > { %v377_v50 = vmul.f32 2.0, %v2468_v49 }
 0x12b   : > { %v2345_v51 = vadd.f32 -1.0, %v377_v50  ;;  %v3057_v50 = vadd.f32 1e-16, %v124_v47 }
 0x12d   : > { %v379_v52 = vsel %vm2872_vm5, %v2345_v51, %v2468_v49  ;;  %v709_v49 = vmul.f32 %v3049_v46, %v3049_v46 }
 0x12e   : > { %386 = vrot.lane.b32.xlu0 %v379_v52, %s2595_s4 }
 0x12f   : > { %v739_v51 = vsel %vm56_vm0, %v709_v49, 0.0 }
 0x132   : > { %381 = vrot.lane.b32.xlu0 %v132_v53, %s2596_s23 }
 0x1a0   : > { %v387_v54 = vpop.permute.xlu0 %386 }
 0x1a1   : > { %v389_v55 = vmul.f32 %v387_v54, %v379_v52 }
 0x1a3   : > { %391 = vrot.lane.b32.xlu1 %v389_v55, %s2596_s23  ;;  %v126_v55 = vld [vmem:[%s3941_s18 + $0x58] sm:$0xff] }
 0x1a4   : > { %v382_v56 = vpop.permute.xlu0 %381 }
 0x1a5   : > { %v384_v57 = vmul.f32 %v382_v56, %v379_v52  ;;  %v3071_v56 = vadd.f32 1e-16, %v126_v55 }
 0x215   : > { %v392_v58 = vpop.permute.xlu1 %391 }
 0x216   : > { %v2948_v59 = vadd.f32 %v392_v58, %v384_v57  ;;  %v129_v57 = vld [vmem:[%s3941_s18 + $0x70] sm:$0xff]  ;;  %v713_v58 = vmul.f32 %v3071_v56, %v3071_v56 }
 0x217   : > { %v3078_v60 = vadd.f32 1e-16, %v129_v57 }
 0x218   : > { %3976 = vst [vmem:[#allocation7_spill] sm:$0xff] %v2948_v59  ;;  %2469 = vtanh.f32 %v2948_v59  ;;  %v751_v62 = vsel %vm56_vm0, %v713_v58, 0.0 }
 0x219   : > { %v716_v63 = vmul.f32 %v3078_v60, %v3078_v60 }
 0x21b   : > { %v760_v1 = vsel %vm56_vm0, %v716_v63, 0.0 }
 0x225   : > { %v2470_v0 = vpop.eup %2469 }
 0x226   : > { %397 = vrot.lane.b32.xlu1 %v2470_v0, %s2595_s4  ;;  %v3086_v0 = vadd.f32 1e-16, %v128_v61  ;;  %s2622_s4 = smov (%p107_p0), [#allocation2]  }
 0x227   :  { %s2299_s24 = sshll.u32 (%p107_p0), %s2622_s4, 4  ;;  %s2300_s24 = int_to_ptr.vmem [resolvable:$true] %s2299_s24 }
 0x228   : > { %v715_v4 = vmul.f32 %v3086_v0, %v3086_v0  ;;  %p2568_p2 = scmp.lt.s32.totalorder (%p107_p0), %s2300_s24, %s2300_s24 }
 0x22a   : > { %v757_v6 = vsel %vm56_vm0, %v715_v4, 0.0 }
 0x24a   : > { %725 = vadd.xlane.f32.xlu1 %v724_v11  ;;  %v717_v11 = vmul.f32 %v3095_v10, %v3095_v10 }
 0x24c   : > { %v763_v12 = vsel %vm56_vm0, %v717_v11, 0.0 }
 0x24e   : > { %731 = vadd.xlane.f32.xlu1 %v730_v13  ;;  %v2597_v13 = vmov 1966171168  }
 0x24f   : > { %v547_v14 = vunpack.c.l.s4 %v2597_v13 }
 0x252   : > { %737 = vadd.xlane.f32.xlu1 %v736_v19 }
 0x256   : > { %743 = vadd.xlane.f32.xlu1 %v742_v24 }
 0x25a   : > { %749 = vadd.xlane.f32.xlu1 %v748_v27 }
 0x25e   : > { %755 = vadd.xlane.f32.xlu1 %v754_v29 }
 0x262   : > { %761 = vadd.xlane.f32.xlu1 %v760_v1 }
 0x298   : > { %v398_v17 = vpop.permute.xlu1 %397 }
 0x299   : > { %v400_v18 = vmul.f32 %v398_v17, %v379_v52  ;;  %v711_v52 = vmul.f32 %v3057_v50, %v3057_v50  ;;  %v548_v17 = vunpack.c.0.s8 %v547_v14 }
 0x29b   : > { %402 = vrot.lane.b32.xlu0 %v400_v18, %s2596_s23  ;;  %v745_v53 = vsel %vm56_vm0, %v711_v52, 0.0  ;;  %v3104_v18 = vshrl.u32 %v3977_v2, 7 }
 0x29d   : > { %v3110_v25 = vsub.s32 %v548_v17, %v3104_v18  ;;  %v3119_v33 = vsub.s32 0, %v3104_v18  ;;  %v3235_v2 = vsub.s32 5, %v3104_v18 }
 0x29f   : > { %3978 = vst [vmem:[#allocation8_spill] sm:$0xff] %v3110_v25  ;;  %3979 = vst [vmem:[#allocation9_spill] sm:$0xff] %v3235_v2 }
 0x2ba   : > { %719 = vadd.xlane.f32.xlu0 %v718_v36 }
 0x2be   : > { %722 = vadd.xlane.f32.xlu0 %v721_v40 }
 0x2c2   : > { %728 = vadd.xlane.f32.xlu0 %v727_v44 }
 0x2c6   : > { %734 = vadd.xlane.f32.xlu0 %v733_v48 }
 0x2ca   : > { %740 = vadd.xlane.f32.xlu0 %v739_v51 }
 0x2ce   : > { %746 = vadd.xlane.f32.xlu0 %v745_v53 }
 0x2d2   : > { %752 = vadd.xlane.f32.xlu0 %v751_v62 }
 0x2d6   : > { %758 = vadd.xlane.f32.xlu0 %v757_v6 }
 0x2da   : > { %764 = vadd.xlane.f32.xlu0 %v763_v12 }
 0x30d   : > { %v403_v54 = vpop.permute.xlu0 %402 }
 0x30e   : > { %405 = vst.msk [vmem:[%s3938_s15] sm:$0xff] %vm59_vm1, %v403_v54  ;;  %2399 = vmatmul.mubr.msk.f32.vlgmr.msra.gmra.mxu1 %vm59_vm1, %v403_v54 }
 0x3ce   : > { %v490_v19 = vpop.f32.mrf.mxu1 }
 0x3cf   : > { %v3106_v20 = vadd.f32 %v2346_v16, %v490_v19 }
 0x3d0   : > { %v2400_v22 = vpop.f32.mrf.mxu1 }
 0x3d1   : > { %v527_v24 = vadd.f32 1e-16, %v3106_v20  ;;  %vm494_vm7 = vcmp.gt.f32.partialorder %v3106_v20, 20.0 }
 0x3d3   : > { %v3112_v27 = vmul.f32 %v527_v24, %v527_v24  ;;  %v552_v28 = vrot.slane %v527_v24, %v3110_v25  ;;  %v545_v29 = vcombine.high %v527_v24, %v527_v24 }
 0x3d5   : > { %v699_v30 = vsel %vm56_vm0, %v3112_v27, 0.0  ;;  %v568_v32 = vrot.slane %v552_v28, %v3110_v25  ;;  %v560_v35 = vcombine.high %v552_v28, %v552_v28  ;;  %v559_v36 = vrot.slane %v545_v29, %v3110_v25 }
 0x3d6   : > { %700 = vadd.xlane.f32.xlu1 %v699_v30 }
 0x3d7   : > { %v3123_v37 = vrot.slane %v568_v32, %v3119_v33  ;;  %v582_v39 = vrot.slane %v560_v35, %v3110_v25  ;;  %v590_v40 = vcombine.high %v568_v32, %v568_v32  ;;  %v575_v47 = vrot.slane %v559_v36, %v3110_v25 }
 0x3d8   : > { %v561_v55 = vcombine.high %v559_v36, %v559_v36 }
 0x3d9   : > { %v635_v41 = vmul.f32 %v3123_v37, %v3025_v34  ;;  %v634_v43 = vmul.f32 %v3123_v37, %v3018_v31  ;;  %v3131_v44 = vrot.slane %v582_v39, %v3119_v33  ;;  %v3134_v45 = vrot.slane %v590_v40, %v3119_v33 }
 0x3da   : > { %v3144_v53 = vrot.slane %v575_v47, %v3119_v33  ;;  %v592_v54 = vcombine.high %v582_v39, %v582_v39  ;;  %v589_v1 = vrot.slane %v561_v55, %v3110_v25  ;;  %v591_v13 = vcombine.high %v575_v47, %v575_v47  ;;  %v726_v55 = vpop.xlane.xlu1 %725 }
 0x3db   : > { %v653_v48 = vsel %vm56_vm0, %v635_v41, 0.0  ;;  %v650_v49 = vsel %vm56_vm0, %v634_v43, 0.0  ;;  %v637_v51 = vmul.f32 %v3131_v44, %v3033_v38  ;;  %v636_v52 = vmul.f32 %v3131_v44, %v2969_v3 }
 0x3dc   : > { %654 = vadd.xlane.f32.xlu0 %v653_v48  ;;  %651 = vadd.xlane.f32.xlu1 %v650_v49  ;;  %v639_v61 = vmul.f32 %v3134_v45, %v3041_v42  ;;  %v638_v62 = vmul.f32 %v3134_v45, %v2979_v7  ;;  %v643_v63 = vmul.f32 %v3144_v53, %v3057_v50 }
 0x3dd   : > { %v659_v57 = vsel %vm56_vm0, %v637_v51, 0.0  ;;  %v656_v58 = vsel %vm56_vm0, %v636_v52, 0.0  ;;  %v642_v6 = vmul.f32 %v3144_v53, %v2992_v15  ;;  %v3160_v11 = vrot.slane %v592_v54, %v3119_v33 }
 0x3de   : > { %v665_v4 = vsel %vm56_vm0, %v639_v61, 0.0  ;;  %v662_v5 = vsel %vm56_vm0, %v638_v62, 0.0  ;;  %v3163_v12 = vrot.slane %v589_v1, %v3119_v33  ;;  %v677_v14 = vsel %vm56_vm0, %v643_v63, 0.0 }
 0x3df   : > { %v674_v16 = vsel %vm56_vm0, %v642_v6, 0.0  ;;  %v641_v17 = vmul.f32 %v3160_v11, %v3049_v46  ;;  %v640_v19 = vmul.f32 %v3160_v11, %v2981_v8  ;;  %v3174_v24 = vrot.slane %v591_v13, %v3119_v33 }
 0x3e0   : > { %660 = vadd.xlane.f32.xlu0 %v659_v57  ;;  %657 = vadd.xlane.f32.xlu1 %v656_v58  ;;  %v645_v22 = vmul.f32 %v3163_v12, %v3071_v56  ;;  %v644_v30 = vmul.f32 %v3163_v12, %v3000_v21  ;;  %v593_v32 = vcombine.high %v589_v1, %v589_v1  ;;  %v3943_v51 = vmov 0   ;;  %v720_v57 = vpop.xlane.xlu0 %719  ;;  %v732_v58 = vpop.xlane.xlu1 %731 }
 0x3e1   : > { %v671_v28 = vsel %vm56_vm0, %v641_v17, 0.0  ;;  %v668_v29 = vsel %vm56_vm0, %v640_v19, 0.0  ;;  %v647_v35 = vmul.f32 %v3174_v24, %v3086_v0  ;;  %v646_v40 = vmul.f32 %v3174_v24, %v3009_v26  ;;  %2447 = vset.pattern.permute.xlu0 %v3943_v51  ;;  %2446 = vset.pattern.permute.xlu1 %v3943_v51 }
 0x3e2   : > { %v683_v36 = vsel %vm56_vm0, %v645_v22, 0.0  ;;  %v680_v39 = vsel %vm56_vm0, %v644_v30, 0.0  ;;  %v3187_v41 = vrot.slane %v593_v32, %v3119_v33  ;;  %v495_v17 = vmin.f32 %v3106_v20, 20.0 }
 0x3e3   : > { %v689_v43 = vsel %vm56_vm0, %v647_v35, 0.0  ;;  %v686_v47 = vsel %vm56_vm0, %v646_v40, 0.0  ;;  %v825_v30 = vmax.f32 %v720_v57, 1e-16 }
 0x3e4   : > { %666 = vadd.xlane.f32.xlu0 %v665_v4  ;;  %663 = vadd.xlane.f32.xlu1 %v662_v5  ;;  %v649_v48 = vmul.f32 %v3187_v41, %v3095_v10  ;;  %v648_v49 = vmul.f32 %v3187_v41, %v3078_v60  ;;  %v723_v61 = vpop.xlane.xlu0 %722  ;;  %v3199_v62 = vpop.xlane.xlu1 %737  ;;  %v496_v22 = vmul.f32 1.442695, %v495_v17 }
 0x3e5   : > { %v826_v35 = vmax.f32 %v723_v61, 1e-16 }
 0x3e6   : > { %v695_v52 = vsel %vm56_vm0, %v649_v48, 0.0  ;;  %v692_v54 = vsel %vm56_vm0, %v648_v49, 0.0  ;;  %2471 = vpow2.f32 %v496_v22  ;;  %v3215_v49 = vsub.s32 1, %v3104_v18 }
 0x3e8   : > { %678 = vadd.xlane.f32.xlu0 %v677_v14  ;;  %675 = vadd.xlane.f32.xlu1 %v674_v16  ;;  %v729_v63 = vpop.xlane.xlu0 %728  ;;  %v3201_v1 = vpop.xlane.xlu1 %743 }
 0x3ec   : > { %672 = vadd.xlane.f32.xlu0 %v671_v28  ;;  %669 = vadd.xlane.f32.xlu1 %v668_v29  ;;  %v735_v4 = vpop.xlane.xlu0 %734  ;;  %v750_v5 = vpop.xlane.xlu1 %749 }
 0x3ed   : > { %v835_v48 = vmax.f32 %v750_v5, 1e-16 }
 0x3f0   : > { %684 = vadd.xlane.f32.xlu0 %v683_v36  ;;  %681 = vadd.xlane.f32.xlu1 %v680_v39  ;;  %v3203_v6 = vpop.xlane.xlu0 %740  ;;  %v756_v13 = vpop.xlane.xlu1 %755  ;;  %v827_v39 = vmax.f32 %v726_v55, 1e-16  ;;  %v830_v55 = vmax.f32 %v735_v4, 1e-16 }
 0x3f1   : > { %v837_v61 = vmax.f32 %v756_v13, 1e-16 }
 0x3f3   : > { %v2472_v17 = vpop.eup %2471 }
 0x3f4   : > { %690 = vadd.xlane.f32.xlu0 %v689_v43  ;;  %687 = vadd.xlane.f32.xlu1 %v686_v47  ;;  %v3205_v14 = vpop.xlane.xlu0 %746  ;;  %v762_v16 = vpop.xlane.xlu1 %761  ;;  %v828_v43 = vmax.f32 %v729_v63, 1e-16 }
 0x3f5   : > { %v839_v5 = vmax.f32 %v762_v16, 1e-16 }
 0x3f8   : > { %696 = vadd.xlane.f32.xlu0 %v695_v52  ;;  %693 = vadd.xlane.f32.xlu1 %v692_v54  ;;  %v3208_v19 = vpop.xlane.xlu0 %752  ;;  %v829_v52 = vmax.f32 %v732_v58, 1e-16 }
 0x3fc   : > { %v3210_v32 = vpop.xlane.xlu0 %758 }
 0x400   : > { %v3212_v40 = vpop.xlane.xlu0 %764 }
 0x45f   : > { %v701_v28 = vpop.xlane.xlu1 %700 }
 0x460   : > { %v766_v29 = vmax.f32 %v701_v28, 1e-16 }
 0x462   : > { %2473 = vrsqrt.f32 %v766_v29 }
 0x463   : > { %2475 = vrsqrt.f32 %v825_v30 }
 0x464   : > { %2477 = vrsqrt.f32 %v826_v35 }
 0x465   : > { %v652_v36 = vpop.xlane.xlu1 %651  ;;  %2479 = vrsqrt.f32 %v827_v39  ;;  %v655_v54 = vpop.xlane.xlu0 %654  ;;  %v498_v39 = vadd.f32 1.0, %v2472_v17  ;;  %v3241_v17 = vsub.s32 6, %v3104_v18 }
 0x466   : > { %2481 = vrsqrt.f32 %v828_v43  ;;  %v3230_v43 = vsub.s32 2, %v3104_v18 }
 0x467   : > { %2483 = vrsqrt.f32 %v835_v48  ;;  %3980 = vst [vmem:[#allocation10_spill] sm:$0xff] %v3241_v17 }
 0x468   : > { %2485 = vrsqrt.f32 %v829_v52 }
 0x469   : > { %v658_v47 = vpop.xlane.xlu1 %657  ;;  %2487 = vrsqrt.f32 %v837_v61  ;;  %v661_v4 = vpop.xlane.xlu0 %660 }
 0x46a   : > { %2489 = vrsqrt.f32 %v830_v55 }
 0x46b   : > { %2491 = vrsqrt.f32 %v839_v5 }
 0x46c   : > { %2493 = vlog2.f32 %v498_v39  ;;  %v832_v39 = vmax.f32 %v3203_v6, 1e-16  ;;  %v833_v6 = vmax.f32 %v3201_v1, 1e-16 }
 0x46d   : > { %v664_v57 = vpop.xlane.xlu1 %663 }
 0x46f   : > { %v3217_v22 = vpop.eup %2473 }
 0x470   : > { %v772_v28 = vrot.slane %v3217_v22, %v3119_v33  ;;  %v776_v63 = vrot.slane %v3217_v22, %v3215_v49  ;;  %v3225_v58 = vpop.eup %2475  ;;  %v3248_v5 = vrot.slane %v3217_v22, %v3235_v2  ;;  %v3263_v23 = vrot.slane %v3217_v22, %v3241_v17 }
 0x471   : > { %v3223_v29 = vpop.xlane.xlu1 %675  ;;  %v3227_v13 = vpop.eup %2477 }
 0x472   : > { %v810_v30 = vmul.f32 %v772_v28, %v655_v54  ;;  %v809_v35 = vmul.f32 %v772_v28, %v652_v36  ;;  %v811_v16 = vmul.f32 %v776_v63, %v658_v47  ;;  %v831_v36 = vmax.f32 %v3199_v62, 1e-16  ;;  %v3238_v54 = vpop.eup %2479 }
 0x473   : > { %v812_v55 = vmul.f32 %v776_v63, %v661_v4  ;;  %v780_v47 = vrot.slane %v3217_v22, %v3230_v43  ;;  %v3257_v4 = vsub.s32 7, %v3104_v18 }
 0x474   : > { %v858_v48 = vmul.f32 %v3227_v13, %v810_v30  ;;  %v857_v52 = vmul.f32 %v3225_v58, %v809_v35  ;;  %v859_v28 = vmul.f32 %v3238_v54, %v811_v16  ;;  %v667_v30 = vpop.xlane.xlu0 %666  ;;  %v3250_v35 = vpop.eup %2481  ;;  %2495 = vrsqrt.f32 %v831_v36 }
 0x475   : > { %v670_v61 = vpop.xlane.xlu1 %669  ;;  %3981 = vst [vmem:[#allocation11_spill] sm:$0xff] %v3250_v35  ;;  %v3254_v63 = vpop.eup %2483  ;;  %3983 = vst [vmem:[#allocation13_spill] sm:$0xff] %v3257_v4  ;;  %v813_v16 = vmul.f32 %v780_v47, %v664_v57  ;;  %2497 = vrsqrt.f32 %v832_v39  ;;  %v800_v39 = vrot.slane %v3217_v22, %v3257_v4  ;;  %v836_v4 = vmax.f32 %v3208_v19, 1e-16 }
 0x476   : > { %898 = vperm.xlu0 %2447, %v858_v48   ;;  %895 = vperm.xlu1 %2446, %v857_v52   ;;  %3982 = vst [vmem:[#allocation12_spill] sm:$0xff] %v3254_v63  ;;  %v860_v52 = vmul.f32 %v3250_v35, %v812_v55  ;;  %v3265_v25 = vpop.eup %2485  ;;  %v834_v55 = vmax.f32 %v3205_v14, 1e-16  ;;  %2499 = vrsqrt.f32 %v833_v6 }
 0x477   : > { %v3272_v57 = vpop.eup %2487  ;;  %v861_v17 = vmul.f32 %v3265_v25, %v813_v16 }
 0x478   : > { %3984 = vst [vmem:[#allocation14_spill] sm:$0xff] %v3272_v57  ;;  %v3275_v59 = vpop.eup %2489  ;;  %2501 = vrsqrt.f32 %v834_v55  ;;  %v2599_v55 = vmov 8  }
 0x479   : > { %v682_v62 = vpop.xlane.xlu1 %681  ;;  %v3281_v35 = vpop.eup %2491  ;;  %2503 = vrsqrt.f32 %v836_v4  ;;  %v840_v4 = vmax.f32 %v3212_v40, 1e-16 }
 0x47a   : > { %v819_v48 = vmul.f32 %v3248_v5, %v682_v62  ;;  %901 = vperm.xlu1 %2446, %v859_v28   ;;  %v3269_v28 = vsub.s32 3, %v3104_v18  ;;  %3985 = vst [vmem:[#allocation15_spill] sm:$0xff] %v3281_v35  ;;  %v2494_v14 = vpop.eup %2493 }
 0x47b   : > { %v500_v6 = vmul.f32 0.6931472, %v2494_v14 }
 0x47c   : > { %v867_v51 = vmul.f32 %v3254_v63, %v819_v48  ;;  %v679_v48 = vpop.xlane.xlu0 %678  ;;  %v814_v63 = vmul.f32 %v780_v47, %v667_v30  ;;  %v3287_v30 = vsub.s32 4, %v3104_v18 }
 0x47d   : > { %v688_v36 = vpop.xlane.xlu1 %687  ;;  %v3299_v19 = vsel %vm494_vm7, %v3106_v20, %v500_v6  ;;  %vm1073_vm7 = vcmask 121856  }
 0x47e   : > { %v821_v62 = vmul.f32 %v3263_v23, %v688_v36  ;;  %925 = vperm.xlu0 %2447, %v867_v51   ;;  %904 = vperm.xlu1 %2446, %v860_v52   ;;  %v784_v51 = vrot.slane %v3217_v22, %v3269_v28  ;;  %v862_v47 = vmul.f32 %v3275_v59, %v814_v63 }
 0x480   : > { %v869_v1 = vmul.f32 %v3272_v57, %v821_v62  ;;  %v815_v16 = vmul.f32 %v784_v51, %v670_v61  ;;  %v673_v62 = vpop.xlane.xlu0 %672  ;;  %v838_v61 = vmax.f32 %v3210_v32, 1e-16 }
 0x481   : > { %v694_v2 = vpop.xlane.xlu1 %693  ;;  %v3291_v57 = vpop.eup %2495 }
 0x482   : > { %v823_v52 = vmul.f32 %v800_v39, %v694_v2  ;;  %931 = vperm.xlu0 %2447, %v869_v1   ;;  %907 = vperm.xlu1 %2446, %v861_v17   ;;  %v788_v2 = vrot.slane %v3217_v22, %v3287_v30  ;;  %v816_v17 = vmul.f32 %v784_v51, %v673_v62  ;;  %v3301_v1 = vpop.eup %2497  ;;  %2505 = vrsqrt.f32 %v838_v61 }
 0x483   : > { %v863_v63 = vmul.f32 %v3291_v57, %v815_v16  ;;  %v3307_v32 = vpop.eup %2499  ;;  %2507 = vrsqrt.f32 %v840_v4 }
 0x484   : > { %v871_v36 = vmul.f32 %v3281_v35, %v823_v52  ;;  %v817_v22 = vmul.f32 %v788_v2, %v3223_v29  ;;  %v864_v51 = vmul.f32 %v3301_v1, %v816_v17  ;;  %v685_v52 = vpop.xlane.xlu0 %684 }
 0x485   : > { %v3311_v14 = vpop.eup %2501 }
 0x486   : > { %910 = vperm.xlu1 %2446, %v862_v47   ;;  %937 = vperm.xlu0 %2447, %v871_v36   ;;  %v818_v47 = vmul.f32 %v788_v2, %v679_v48  ;;  %v865_v16 = vmul.f32 %v3307_v32, %v817_v22  ;;  %v820_v36 = vmul.f32 %v3248_v5, %v685_v52  ;;  %v3318_v62 = vpop.eup %2503 }
 0x488   : > { %v691_v29 = vpop.xlane.xlu0 %690  ;;  %v866_v40 = vmul.f32 %v3311_v14, %v818_v47 }
 0x489   : > { %v822_v48 = vmul.f32 %v3263_v23, %v691_v29 }
 0x48a   : > { %913 = vperm.xlu1 %2446, %v863_v63   ;;  %2448 = vset.pattern.permute.xlu0 %v2599_v55 }
 0x48b   : > { %875 = vperm.xlu0 %2448, %v3299_v19  }
 0x48c   : > { %v697_v6 = vpop.xlane.xlu0 %696 }
 0x48d   : > { %v824_v17 = vmul.f32 %v800_v39, %v697_v6  ;;  %v946_v39 = vadd.s32 4294967288, %v3973_v9 }
 0x48e   : > { %916 = vperm.xlu1 %2446, %v864_v51  }
 0x48f   : > { %1394 = vrot.lane.b32.xlu0 %v3112_v27, %s2600_s21  ;;  %v868_v27 = vmul.f32 %v3318_v62, %v820_v36  ;;  %v3324_v2 = vpop.eup %2505  ;;  %v3333_v36 = vsub.s32 %v946_v39, %v3104_v18 }
 0x490   : > { %3986 = vst [vmem:[#allocation16_spill] sm:$0xff] %v3324_v2  ;;  %v3327_v63 = vpop.eup %2507 }
 0x491   : > { %3987 = vst [vmem:[#allocation17_spill] sm:$0xff] %v3327_v63  ;;  %v872_v5 = vmul.f32 %v3327_v63, %v824_v17 }
 0x492   : > { %919 = vperm.xlu1 %2446, %v865_v16  }
 0x493   : > { %1307 = vrot.lane.b32.xlu0 %v3131_v44, %s2600_s21  ;;  %v870_v44 = vmul.f32 %v3324_v2, %v822_v48 }
 0x496   : > { %922 = vperm.xlu1 %2446, %v866_v40  }
 0x497   : > { %1313 = vrot.lane.b32.xlu0 %v3144_v53, %s2600_s21  ;;  %v509_v53 = vsel %vm508_vm8, %v3106_v20, -inf  ;;  %vm1287_vm8 = vcmask 367952  }
 0x49a   : > { %928 = vperm.xlu1 %2446, %v868_v27   ;;  %v3337_v27 = vsub.s32 %v3973_v9, %v3104_v18 }
 0x49e   : > { %934 = vperm.xlu1 %2446, %v870_v44  }
 0x4a2   : > { %940 = vperm.xlu1 %2446, %v872_v5  }
 0x4c6   : > { %510 = vmax.xlane.f32.xlu1 %v509_v53 }
 0x4f1   : > { %v896_v61 = vpop.permute.xlu1 %895  ;;  %v899_v47 = vpop.permute.xlu0 %898 }
 0x4f2   : > { %v950_v5 = vrot.slane %v899_v47, %v3333_v36  ;;  %v945_v53 = vrot.slane %v896_v61, %v3337_v27 }
 0x4f5   : > { %v902_v55 = vpop.permute.xlu1 %901 }
 0x4f6   : > { %v956_v63 = vrot.slane %v902_v55, %v3337_v27 }
 0x4f9   : > { %v905_v23 = vpop.permute.xlu1 %904  ;;  %v926_v29 = vpop.permute.xlu0 %925 }
 0x4fa   : > { %v960_v48 = vrot.slane %v905_v23, %v3333_v36 }
 0x4fc   : > { %v961_v23 = vsel %vm951_vm9, %v960_v48, %v956_v63 }
 0x4fd   : > { %v908_v22 = vpop.permute.xlu1 %907  ;;  %v932_v6 = vpop.permute.xlu0 %931 }
 0x4fe   : > { %v965_v39 = vrot.slane %v908_v22, %v3337_v27  ;;  %v992_v22 = vrot.slane %v926_v29, %v3337_v27 }
 0x501   : > { %v911_v51 = vpop.permute.xlu1 %910  ;;  %v938_v48 = vpop.permute.xlu0 %937 }
 0x502   : > { %v969_v44 = vrot.slane %v911_v51, %v3333_v36 }
 0x504   : > { %v970_v47 = vsel %vm951_vm9, %v969_v44, %v965_v39 }
 0x505   : > { %v914_v52 = vpop.permute.xlu1 %913 }
 0x506   : > { %v974_v9 = vrot.slane %v914_v52, %v3337_v27  ;;  %v1001_v52 = vrot.slane %v932_v6, %v3337_v27 }
 0x509   : > { %v917_v4 = vpop.permute.xlu1 %916 }
 0x50a   : > { %v978_v35 = vrot.slane %v917_v4, %v3333_v36  ;;  %v952_v4 = vsel %vm951_vm9, %v950_v5, %v945_v53 }
 0x50b   : > { %v1017_v63 = vsel %vm1016_vm10, %v961_v23, %v952_v4 }
 0x50d   : > { %v920_v16 = vpop.permute.xlu1 %919 }
 0x50e   : > { %v983_v61 = vrot.slane %v920_v16, %v3337_v27 }
 0x511   : > { %v923_v40 = vpop.permute.xlu1 %922 }
 0x512   : > { %v987_v18 = vrot.slane %v923_v40, %v3333_v36  ;;  %v979_v40 = vsel %vm951_vm9, %v978_v35, %v974_v9  ;;  %v1010_v35 = vrot.slane %v938_v48, %v3337_v27 }
 0x514   : > { %v988_v44 = vsel %vm951_vm9, %v987_v18, %v983_v61 }
 0x515   : > { %v929_v17 = vpop.permute.xlu1 %928 }
 0x516   : > { %v996_v51 = vrot.slane %v929_v17, %v3333_v36  ;;  %v1019_v17 = vsel %vm1018_vm11, %v970_v47, %v1017_v63 }
 0x517   : > { %v1021_v5 = vsel %vm1020_vm12, %v979_v40, %v1019_v17  ;;  %v2601_v40 = vmov 9  }
 0x518   : > { %v997_v16 = vsel %vm951_vm9, %v996_v51, %v992_v22  ;;  %v1023_v53 = vsel %vm1022_vm13, %v988_v44, %v1021_v5  ;;  %v876_v51 = vpop.permute.xlu0 %875  ;;  %2449 = vset.pattern.permute.xlu0 %v2601_v40  ;;  %2450 = vset.pattern.permute.xlu1 %v2601_v40  ;;  %v2348_v5 = vmul.f32 -1.442695, %v3106_v20 }
 0x519   : > { %v935_v55 = vpop.permute.xlu1 %934  ;;  %v1025_v39 = vsel %vm1024_vm14, %v997_v16, %v1023_v53 }
 0x51a   : > { %v1005_v2 = vrot.slane %v935_v55, %v3333_v36 }
 0x51c   : > { %v1006_v29 = vsel %vm951_vm9, %v1005_v2, %v1001_v52 }
 0x51d   : > { %v941_v9 = vpop.permute.xlu1 %940  ;;  %v1027_v23 = vsel %vm1026_vm15, %v1006_v29, %v1025_v39  ;;  %v2603_v39 = vmov 10  }
 0x51e   : > { %v1014_v6 = vrot.slane %v941_v9, %v3333_v36 }
 0x520   : > { %v1015_v18 = vsel %vm951_vm9, %v1014_v6, %v1010_v35 }
 0x521   : > { %v1029_v47 = vsel %vm1028_vm3, %v1015_v18, %v1027_v23 }
 0x522   : > { %v1031_v61 = vmul.f32 %v1029_v47, %v876_v51 }
 0x524   : > { %v1033_v2 = vsel %vm65_vm2, %v1031_v61, -inf }
 0x525   : > { %1034 = vmax.xlane.f32.xlu0 %v1033_v2 }
 0x53b   : > { %1317 = vrot.lane.b32.xlu0 %v3174_v24, %s2600_s21  ;;  %v1395_v24 = vpop.permute.xlu0 %1394 }
 0x53f   : > { %v1308_v52 = vpop.permute.xlu0 %1307 }
 0x540   : > { %v1332_v2 = vmul.f32 %v1308_v52, %v3033_v38 }
 0x543   : > { %v3385_v48 = vpop.permute.xlu0 %1313 }
 0x54f   : > { %v511_v55 = vpop.xlane.xlu1 %510 }
 0x550   : > { %v512_v4 = vsub.f32 %v3106_v20, %v511_v55  ;;  %v1354_v55 = vsel %vm56_vm0, %v1332_v2, 0.0 }
 0x552   : > { %v513_v22 = vmul.f32 1.442695, %v512_v4 }
 0x554   : > { %2509 = vpow2.f32 %v513_v22 }
 0x561   : > { %v3374_v63 = vpop.eup %2509 }
 0x562   : > { %516 = vrot.lane.b32.xlu1 %v3374_v63, %s2602_s2 }
 0x566   : > { %1305 = vrot.lane.b32.xlu1 %v3123_v37, %s2600_s21 }
 0x56a   : > { %1309 = vrot.lane.b32.xlu1 %v3134_v45, %s2600_s21 }
 0x56e   : > { %1311 = vrot.lane.b32.xlu1 %v3160_v11, %s2600_s21 }
 0x572   : > { %1315 = vrot.lane.b32.xlu1 %v3163_v12, %s2600_s21 }
 0x5ae   : > { %v1035_v44 = vpop.xlane.xlu0 %1034 }
 0x5af   : > { %v1036_v17 = vsub.f32 %v1031_v61, %v1035_v44  ;;  %v2604_v61 = vmov 11   ;;  %v1338_v44 = vmul.f32 %v3385_v48, %v3057_v50 }
 0x5b1   : > { %v1037_v16 = vmul.f32 1.442695, %v1036_v17  ;;  %v1372_v38 = vsel %vm56_vm0, %v1338_v44, 0.0 }
 0x5b3   : > { %2511 = vpow2.f32 %v1037_v16 }
 0x5b4   : > { %2513 = vpow2.f32 %v2348_v5  ;;  %v1318_v5 = vpop.permute.xlu0 %1317 }
 0x5c0   : > { %v3388_v37 = vpop.eup %2511 }
 0x5c1   : > { %v1039_v45 = vsel %vm65_vm2, %v3388_v37, 0.0  ;;  %v2514_v11 = vpop.eup %2513 }
 0x5c2   : > { %1040 = vadd.xlane.f32.xlu0 %v1039_v45  ;;  %v505_v29 = vadd.f32 1.0, %v2514_v11  ;;  %v1342_v11 = vmul.f32 %v1318_v5, %v3086_v0 }
 0x5c4   : > { %2515 = vrcp.f32 %v505_v29  ;;  %v1384_v29 = vsel %vm56_vm0, %v1342_v11, 0.0 }
 0x5d1   : > { %v3393_v35 = vpop.eup %2515 }
 0x5d2   : > { %v1050_v53 = vsub.f32 1.0, %v3393_v35 }
 0x5d4   : > { %v517_v12 = vpop.permute.xlu1 %516 }
 0x5d5   : > { %v520_v9 = vsel %vm519_vm4, %v517_v12, 0.0 }
 0x5d6   : > { %521 = vadd.xlane.f32.xlu1 %v520_v9 }
 0x5d8   : > { %1046 = vperm.xlu0 %2449, %v3393_v35   ;;  %v1306_v6 = vpop.permute.xlu1 %1305 }
 0x5d9   : > { %v1329_v18 = vmul.f32 %v1306_v6, %v3018_v31  ;;  %v1330_v51 = vmul.f32 %v1306_v6, %v3025_v34  ;;  %v1341_v6 = vmul.f32 %v1318_v5, %v3009_v26 }
 0x5db   : > { %v1345_v23 = vsel %vm56_vm0, %v1329_v18, 0.0 }
 0x5dc   : > { %v1310_v47 = vpop.permute.xlu1 %1309  ;;  %2452 = vset.pattern.permute.xlu0 %v2604_v61 }
 0x5dd   : > { %v1334_v4 = vmul.f32 %v1310_v47, %v3041_v42  ;;  %v1397_v42 = vsel %vm56_vm0, %v1395_v24, 0.0  ;;  %v1333_v12 = vmul.f32 %v1310_v47, %v2979_v7 }
 0x5df   : > { %v1360_v31 = vsel %vm56_vm0, %v1334_v4, 0.0  ;;  %v2605_v4 = vmov 12  }
 0x5e0   : > { %v1312_v22 = vpop.permute.xlu1 %1311 }
 0x5e1   : > { %v1336_v40 = vmul.f32 %v1312_v22, %v3049_v46  ;;  %v1331_v46 = vmul.f32 %v1308_v52, %v2969_v3  ;;  %v1335_v24 = vmul.f32 %v1312_v22, %v2981_v8  ;;  %v1337_v3 = vmul.f32 %v3385_v48, %v2992_v15 }
 0x5e3   : > { %v1366_v34 = vsel %vm56_vm0, %v1336_v40, 0.0  ;;  %v1351_v50 = vsel %vm56_vm0, %v1331_v46, 0.0  ;;  %v1363_v9 = vsel %vm56_vm0, %v1335_v24, 0.0  ;;  %v1369_v0 = vsel %vm56_vm0, %v1337_v3, 0.0 }
 0x5e4   : > { %v1316_v17 = vpop.permute.xlu1 %1315  ;;  %v2607_v40 = vmov 13  }
 0x5e5   : > { %v1340_v16 = vmul.f32 %v1316_v17, %v3071_v56  ;;  %v1357_v56 = vsel %vm56_vm0, %v1333_v12, 0.0  ;;  %v1339_v52 = vmul.f32 %v1316_v17, %v3000_v21 }
 0x5e7   : > { %1319 = vrot.lane.b32.xlu1 %v3187_v41, %s2600_s21  ;;  %v1348_v41 = vsel %vm56_vm0, %v1330_v51, 0.0  ;;  %v1378_v45 = vsel %vm56_vm0, %v1340_v16, 0.0  ;;  %v1375_v7 = vsel %vm56_vm0, %v1339_v52, 0.0  ;;  %s2621_s21 = smov 80  }
 0x5eb   : > { %1053 = vperm.xlu1 %2450, %v1050_v53  }
 0x5ef   : > { %2451 = vset.pattern.permute.xlu1 %v2603_v39  ;;  %v1381_v39 = vsel %vm56_vm0, %v1341_v6, 0.0 }
 0x5f7   : > { %1346 = vadd.xlane.f32.xlu0 %v1345_v23 }
 0x5fb   : > { %1349 = vadd.xlane.f32.xlu0 %v1348_v41  ;;  %v526_v41 = vld [vmem:[%s3940_s17] sm:$0xff] }
 0x5ff   : > { %1355 = vadd.xlane.f32.xlu0 %v1354_v55 }
 0x603   : > { %1361 = vadd.xlane.f32.xlu0 %v1360_v31 }
 0x607   : > { %1367 = vadd.xlane.f32.xlu0 %v1366_v34 }
 0x60b   : > { %1373 = vadd.xlane.f32.xlu0 %v1372_v38 }
 0x60f   : > { %1398 = vadd.xlane.f32.xlu1 %v1397_v42  ;;  %1379 = vadd.xlane.f32.xlu0 %v1378_v45 }
 0x613   : > { %1352 = vadd.xlane.f32.xlu1 %v1351_v50  ;;  %1385 = vadd.xlane.f32.xlu0 %v1384_v29 }
 0x617   : > { %1358 = vadd.xlane.f32.xlu1 %v1357_v56 }
 0x61b   : > { %1364 = vadd.xlane.f32.xlu1 %v1363_v9 }
 0x61f   : > { %1370 = vadd.xlane.f32.xlu1 %v1369_v0 }
 0x623   : > { %1376 = vadd.xlane.f32.xlu1 %v1375_v7 }
 0x627   : > { %1382 = vadd.xlane.f32.xlu1 %v1381_v39 }
 0x64b   : > { %v1041_v48 = vpop.xlane.xlu0 %1040 }
 0x653   : > { %v1047_v55 = vpop.permute.xlu0 %1046 }
 0x65f   : > { %v522_v8 = vpop.xlane.xlu1 %521 }
 0x660   : > { %2517 = vrcp.f32 %v522_v8 }
 0x661   : > { %2519 = vrcp.f32 %v1041_v48 }
 0x663   : > { %v1320_v18 = vpop.permute.xlu1 %1319 }
 0x664   : > { %v1344_v23 = vmul.f32 %v1320_v18, %v3095_v10  ;;  %v1343_v15 = vmul.f32 %v1320_v18, %v3078_v60 }
 0x666   : > { %v1390_v51 = vsel %vm56_vm0, %v1344_v23, 0.0  ;;  %v1387_v21 = vsel %vm56_vm0, %v1343_v15, 0.0 }
 0x667   : > { %1391 = vadd.xlane.f32.xlu0 %v1390_v51  ;;  %1388 = vadd.xlane.f32.xlu1 %v1387_v21  ;;  %v1054_v10 = vpop.permute.xlu1 %1053 }
 0x668   : > { %v1056_v2 = vmul.f32 %v1054_v10, %v526_v41 }
 0x66d   : > { %v2518_v26 = vpop.eup %2517 }
 0x66e   : > { %v2520_v47 = vpop.eup %2519  ;;  %v524_v61 = vmul.f32 %v2518_v26, %v3374_v63  ;;  %v3988_v63 = vmov 0  }
 0x66f   : > { %v1043_v60 = vmul.f32 %v2520_v47, %v3388_v37  ;;  %v3453_v37 = vadd.f32 1.0, %v3299_v19 }
 0x671   : > { %v1049_v22 = vmul.f32 %v1047_v55, %v1043_v60 }
 0x673   : > { %v3441_v31 = vadd.f32 %v1056_v2, %v1049_v22 }
 0x678   : > { %1077 = vperm.xlu1 %2451, %v524_v61  }
 0x67c   : > { %2453 = vset.pattern.permute.xlu1 %v2605_v4  ;;  %v3991_v4 = vld [vmem:[#allocation10_spill] sm:$0xff] }
 0x67d   : > { %1082 = vperm.xlu0 %2452, %v524_v61   ;;  %1088 = vperm.xlu1 %2453, %v524_v61   ;;  %v3990_v61 = vld [vmem:[#allocation9_spill] sm:$0xff] }
 0x680   : > { %v1347_v17 = vpop.xlane.xlu0 %1346 }
 0x681   : > { %1059 = vrot.lane.b32.xlu1 %v3441_v31, %s2606_s25  ;;  %2456 = vset.pattern.permute.xlu0 %v3988_v63 }
 0x682   : > { %2454 = vset.pattern.permute.xlu1 %v2607_v40 }
 0x684   : > { %v1350_v16 = vpop.xlane.xlu0 %1349 }
 0x685   : > { %1062 = vrot.lane.b32.xlu1 %v3441_v31, %s2608_s26 }
 0x688   : > { %v1356_v45 = vpop.xlane.xlu0 %1355 }
 0x689   : > { %1067 = vrot.lane.b32.xlu1 %v3441_v31, %s2609_s27 }
 0x68c   : > { %v1362_v24 = vpop.xlane.xlu0 %1361 }
 0x68d   : > { %1070 = vrot.lane.b32.xlu1 %v3441_v31, %s2610_s28 }
 0x690   : > { %v1368_v48 = vpop.xlane.xlu0 %1367 }
 0x691   : > { %1098 = vperm.xlu1 %2454, %v3453_v37  }
 0x694   : > { %v1374_v10 = vpop.xlane.xlu0 %1373 }
 0x695   : > { %2455 = vset.pattern.permute.xlu1 %v3988_v63  ;;  %v3992_v63 = vld [vmem:[#allocation12_spill] sm:$0xff] }
 0x698   : > { %v1399_v34 = vpop.xlane.xlu1 %1398 }
 0x699   : > { %v1400_v44 = vmax.f32 %v1399_v34, 1e-16 }
 0x69b   : > { %2521 = vrsqrt.f32 %v1400_v44 }
 0x69c   : > { %v1353_v38 = vpop.xlane.xlu1 %1352 }
 0x6a0   : > { %v1359_v5 = vpop.xlane.xlu1 %1358 }
 0x6a4   : > { %v1365_v11 = vpop.xlane.xlu1 %1364 }
 0x6a8   : > { %v2522_v42 = vpop.eup %2521  ;;  %v1371_v6 = vpop.xlane.xlu1 %1370 }
 0x6a9   : > { %v1406_v46 = vrot.slane %v2522_v42, %v3119_v33  ;;  %v1410_v50 = vrot.slane %v2522_v42, %v3215_v49  ;;  %v1414_v29 = vrot.slane %v2522_v42, %v3230_v43  ;;  %v1418_v9 = vrot.slane %v2522_v42, %v3269_v28 }
 0x6aa   : > { %v1422_v39 = vrot.slane %v2522_v42, %v3287_v30  ;;  %v1426_v41 = vrot.slane %v2522_v42, %v3990_v61  ;;  %v1430_v22 = vrot.slane %v2522_v42, %v3991_v4 }
 0x6ab   : > { %v1444_v12 = vmul.f32 %v1406_v46, %v1350_v16  ;;  %v1443_v56 = vmul.f32 %v1406_v46, %v1347_v17  ;;  %v1445_v3 = vmul.f32 %v1410_v50, %v1353_v38  ;;  %v1447_v0 = vmul.f32 %v1414_v29, %v1359_v5  ;;  %v1380_v17 = vpop.xlane.xlu0 %1379  ;;  %v3993_v16 = vld [vmem:[#allocation14_spill] sm:$0xff] }
 0x6ac   : > { %v1446_v8 = vmul.f32 %v1410_v50, %v1356_v45  ;;  %v1449_v15 = vmul.f32 %v1418_v9, %v1365_v11  ;;  %v1377_v51 = vpop.xlane.xlu1 %1376  ;;  %v1448_v21 = vmul.f32 %v1414_v29, %v1362_v24  ;;  %v1451_v26 = vmul.f32 %v1422_v39, %v1371_v6  ;;  %v3994_v11 = vld [vmem:[#allocation16_spill] sm:$0xff]  ;;  %v3995_v29 = vld [vmem:[#allocation13_spill] sm:$0xff] }
 0x6ad   : > { %v1460_v52 = vmul.f32 %v3227_v13, %v1444_v12  ;;  %v1459_v7 = vmul.f32 %v3225_v58, %v1443_v56  ;;  %v1461_v18 = vmul.f32 %v3238_v54, %v1445_v3  ;;  %v1463_v23 = vmul.f32 %v3265_v25, %v1447_v0  ;;  %v3989_v58 = vld [vmem:[#allocation11_spill] sm:$0xff] }
 0x6ae   : > { %v1465_v13 = vmul.f32 %v3291_v57, %v1449_v15  ;;  %v1462_v47 = vmul.f32 %v3989_v58, %v1446_v8  ;;  %v1450_v60 = vmul.f32 %v1418_v9, %v1368_v48  ;;  %v1467_v54 = vmul.f32 %v3307_v32, %v1451_v26  ;;  %v3996_v3 = vld [vmem:[#allocation15_spill] sm:$0xff] }
 0x6af   : > { %1499 = vperm.xlu0 %2456, %v1460_v52   ;;  %1496 = vperm.xlu1 %2455, %v1459_v7   ;;  %v1453_v25 = vmul.f32 %v1426_v41, %v1377_v51  ;;  %v1464_v2 = vmul.f32 %v3275_v59, %v1448_v21  ;;  %v1452_v57 = vmul.f32 %v1422_v39, %v1374_v10  ;;  %v1386_v59 = vpop.xlane.xlu0 %1385  ;;  %v3997_v52 = vld [vmem:[#allocation17_spill] sm:$0xff] }
 0x6b0   : > { %v1383_v55 = vpop.xlane.xlu1 %1382  ;;  %v1466_v44 = vmul.f32 %v3301_v1, %v1450_v60  ;;  %v1454_v38 = vmul.f32 %v1426_v41, %v1380_v17  ;;  %v1456_v46 = vmul.f32 %v1430_v22, %v1386_v59  ;;  %v1434_v1 = vrot.slane %v2522_v42, %v3995_v29 }
 0x6b1   : > { %v1469_v40 = vmul.f32 %v3992_v63, %v1453_v25  ;;  %v1455_v34 = vmul.f32 %v1430_v22, %v1383_v55  ;;  %v1468_v5 = vmul.f32 %v3311_v14, %v1452_v57 }
 0x6b2   : > { %v1470_v45 = vmul.f32 %v3318_v62, %v1454_v38  ;;  %v1472_v50 = vmul.f32 %v3994_v11, %v1456_v46  ;;  %v2611_v62 = vmov 40  }
 0x6b3   : > { %1508 = vperm.xlu0 %2456, %v1463_v23   ;;  %1502 = vperm.xlu1 %2455, %v1461_v18   ;;  %v1471_v32 = vmul.f32 %v3993_v16, %v1455_v34 }
 0x6b7   : > { %1514 = vperm.xlu0 %2456, %v1465_v13   ;;  %1505 = vperm.xlu1 %2455, %v1462_v47  }
 0x6bb   : > { %1520 = vperm.xlu0 %2456, %v1467_v54   ;;  %1511 = vperm.xlu1 %2455, %v1464_v2  }
 0x6bf   : > { %1526 = vperm.xlu0 %2456, %v1469_v40   ;;  %1517 = vperm.xlu1 %2455, %v1466_v44  }
 0x6c3   : > { %1532 = vperm.xlu0 %2456, %v1471_v32   ;;  %1523 = vperm.xlu1 %2455, %v1468_v5  }
 0x6c7   : > { %1529 = vperm.xlu1 %2455, %v1470_v45  }
 0x6cb   : > { %1535 = vperm.xlu1 %2455, %v1472_v50  }
 0x6f0   : > { %v1389_v12 = vpop.xlane.xlu1 %1388  ;;  %v1392_v56 = vpop.xlane.xlu0 %1391 }
 0x6f1   : > { %v1457_v24 = vmul.f32 %v1434_v1, %v1389_v12  ;;  %v1458_v9 = vmul.f32 %v1434_v1, %v1392_v56 }
 0x6f3   : > { %v1473_v0 = vmul.f32 %v3996_v3, %v1457_v24  ;;  %v1474_v14 = vmul.f32 %v3997_v52, %v1458_v9 }
 0x6f4   : > { %v1078_v7 = vpop.permute.xlu1 %1077 }
 0x6f5   : > { %1538 = vperm.xlu0 %2456, %v1473_v0   ;;  %1541 = vperm.xlu1 %2455, %v1474_v14  }
 0x6f8   : > { %v1089_v6 = vpop.permute.xlu1 %1088  ;;  %v1083_v23 = vpop.permute.xlu0 %1082 }
 0x6f9   : > { %2457 = vset.pattern.permute.xlu0 %v2611_v62  ;;  %v1085_v48 = vmul.f32 %v1083_v23, %v3441_v31 }
 0x6fa   : > { %1476 = vperm.xlu0 %2457, %v3299_v19   ;;  %v1288_v19 = vsel %vm1287_vm8, %v3106_v20, -inf }
 0x6fc   : > { %v1060_v39 = vpop.permute.xlu1 %1059 }
 0x700   : > { %v1063_v8 = vpop.permute.xlu1 %1062 }
 0x701   : > { %v1066_v42 = vsel %vm1065_vm6, %v1060_v39, %v1063_v8 }
 0x702   : > { %v1080_v15 = vmul.f32 %v1078_v7, %v1066_v42 }
 0x704   : > { %v1068_v18 = vpop.permute.xlu1 %1067  ;;  %v1086_v13 = vadd.f32 %v1085_v48, %v1080_v15 }
 0x708   : > { %v1071_v51 = vpop.permute.xlu1 %1070 }
 0x709   : > { %v1074_v21 = vsel %vm1073_vm7, %v1068_v18, %v1071_v51 }
 0x70a   : > { %v1091_v26 = vmul.f32 %v1089_v6, %v1074_v21 }
 0x70c   : > { %v1092_v58 = vadd.f32 %v1091_v26, %v1086_v13  ;;  %v1099_v10 = vpop.permute.xlu1 %1098 }
 0x70e   : > { %2523 = vlog2.f32 %v1092_v58 }
 0x719   : > { %1289 = vmax.xlane.f32.xlu1 %v1288_v19 }
 0x71b   : > { %v2524_v47 = vpop.eup %2523 }
 0x71c   : > { %v1095_v41 = vmul.f32 0.6931472, %v2524_v47 }
 0x71e   : > { %v1101_v60 = vmul.f32 %v1099_v10, %v1095_v41 }
 0x720   : > { %v1102_v54 = vmul.f32 1.442695, %v1101_v60 }
 0x722   : > { %2525 = vpow2.f32 %v1102_v54 }
 0x72a   : > { %v1497_v2 = vpop.permute.xlu1 %1496  ;;  %v1500_v57 = vpop.permute.xlu0 %1499 }
 0x72b   : > { %v1550_v45 = vrot.slane %v1500_v57, %v3333_v36  ;;  %v1546_v46 = vrot.slane %v1497_v2, %v3337_v27 }
 0x72d   : > { %v1551_v6 = vsel %vm951_vm9, %v1550_v45, %v1546_v46  ;;  %v2204_v46 = vld [vmem:[%s3935_s12] sm:$0xff] }
 0x72e   : > { %v1503_v55 = vpop.permute.xlu1 %1502  ;;  %v1509_v40 = vpop.permute.xlu0 %1508  ;;  %2402 = vmatpush3.msra.mxu0 %v2204_v46  ;;  %v3615_v46 = vld [vmem:[%s3941_s18 + $0x48] sm:$0xff] }
 0x72f   : > { %v3486_v25 = vpop.eup %2525  ;;  %v1555_v11 = vrot.slane %v1503_v55, %v3337_v27  ;;  %v1564_v12 = vrot.slane %v1509_v40, %v3337_v27  ;;  %v2612_v55 = vmov 41  }
 0x730   : > { %v1104_v31 = vsel %vm65_vm2, %v3486_v25, 0.0  ;;  %2459 = vset.pattern.permute.xlu1 %v2612_v55  ;;  %2458 = vset.pattern.permute.xlu0 %v2612_v55 }
 0x731   : > { %1105 = vadd.xlane.f32.xlu0 %v1104_v31 }
 0x732   : > { %v1506_v22 = vpop.permute.xlu1 %1505  ;;  %v1515_v44 = vpop.permute.xlu0 %1514 }
 0x733   : > { %v1559_v5 = vrot.slane %v1506_v22, %v3333_v36  ;;  %v1573_v24 = vrot.slane %v1515_v44, %v3337_v27 }
 0x735   : > { %v1560_v9 = vsel %vm951_vm9, %v1559_v5, %v1555_v11 }
 0x736   : > { %v1512_v63 = vpop.permute.xlu1 %1511  ;;  %v1521_v38 = vpop.permute.xlu0 %1520  ;;  %v1615_v8 = vsel %vm1016_vm10, %v1560_v9, %v1551_v6 }
 0x737   : > { %v1568_v59 = vrot.slane %v1512_v63, %v3333_v36  ;;  %v1582_v52 = vrot.slane %v1521_v38, %v3337_v27 }
 0x739   : > { %v1569_v14 = vsel %vm951_vm9, %v1568_v59, %v1564_v12 }
 0x73a   : > { %v1518_v34 = vpop.permute.xlu1 %1517  ;;  %v1527_v32 = vpop.permute.xlu0 %1526  ;;  %v1616_v23 = vsel %vm1018_vm11, %v1569_v14, %v1615_v8  ;;  %v3559_v8 = vld [vmem:[%s3941_s18 + $0x10] sm:$0xff] }
 0x73b   : > { %v1577_v50 = vrot.slane %v1518_v34, %v3333_v36  ;;  %v1591_v62 = vrot.slane %v1527_v32, %v3337_v27 }
 0x73d   : > { %v1578_v39 = vsel %vm951_vm9, %v1577_v50, %v1573_v24 }
 0x73e   : > { %v1524_v17 = vpop.permute.xlu1 %1523  ;;  %v1533_v3 = vpop.permute.xlu0 %1532  ;;  %v1617_v48 = vsel %vm1020_vm12, %v1578_v39, %v1616_v23  ;;  %v3553_v39 = vld [vmem:[%s3941_s18 + $0x18] sm:$0xff] }
 0x73f   : > { %v1586_v56 = vrot.slane %v1524_v17, %v3333_v36  ;;  %v1600_v42 = vrot.slane %v1533_v3, %v3337_v27  ;;  %v2614_v3 = vmov 42  }
 0x741   : > { %v1587_v18 = vsel %vm951_vm9, %v1586_v56, %v1582_v52 }
 0x742   : > { %v1530_v16 = vpop.permute.xlu1 %1529  ;;  %v1618_v19 = vsel %vm1022_vm13, %v1587_v18, %v1617_v48  ;;  %v3565_v18 = vld [vmem:[%s3941_s18 + $0x8] sm:$0xff] }
 0x743   : > { %v1595_v0 = vrot.slane %v1530_v16, %v3333_v36 }
 0x745   : > { %v1596_v15 = vsel %vm951_vm9, %v1595_v0, %v1591_v62 }
 0x746   : > { %v1536_v1 = vpop.permute.xlu1 %1535  ;;  %v1619_v47 = vsel %vm1024_vm14, %v1596_v15, %v1618_v19  ;;  %v3571_v15 = vld [vmem:[%s3941_s18 + $0x20] sm:$0xff]  ;;  %v3584_v19 = vld [vmem:[%s3941_s18 + $0x28] sm:$0xff] }
 0x747   : > { %v1604_v7 = vrot.slane %v1536_v1, %v3333_v36 }
 0x749   : > { %v1605_v13 = vsel %vm951_vm9, %v1604_v7, %v1600_v42 }
 0x74a   : > { %v1620_v10 = vsel %vm1026_vm15, %v1605_v13, %v1619_v47  ;;  %v3577_v13 = vld [vmem:[%s3941_s18] sm:$0xff] }
 0x770   : > { %v1539_v51 = vpop.permute.xlu0 %1538  ;;  %v1542_v21 = vpop.permute.xlu1 %1541 }
 0x771   : > { %v1609_v26 = vrot.slane %v1539_v51, %v3337_v27  ;;  %v1613_v58 = vrot.slane %v1542_v21, %v3333_v36 }
 0x773   : > { %v1614_v41 = vsel %vm951_vm9, %v1613_v58, %v1609_v26 }
 0x774   : > { %v1621_v60 = vsel %vm1028_vm3, %v1614_v41, %v1620_v10 }
 0x775   : > { %v1477_v54 = vpop.permute.xlu0 %1476 }
 0x776   : > { %v1623_v31 = vmul.f32 %v1621_v60, %v1477_v54  ;;  %v3592_v60 = vld [vmem:[%s3941_s18 + $0x30] sm:$0xff] }
 0x778   : > { %v1624_v2 = vsel %vm65_vm2, %v1623_v31, -inf }
 0x779   : > { %1625 = vmax.xlane.f32.xlu1 %v1624_v2 }
 0x7a2   : > { %v1290_v27 = vpop.xlane.xlu1 %1289 }
 0x7a3   : > { %v1291_v36 = vsub.f32 %v3106_v20, %v1290_v27 }
 0x7a5   : > { %v1292_v22 = vmul.f32 1.442695, %v1291_v36 }
 0x7a7   : > { %2527 = vpow2.f32 %v1292_v22 }
 0x7b4   : > { %v3523_v57 = vpop.eup %2527 }
 0x7b5   : > { %1295 = vrot.lane.b32.xlu0 %v3523_v57, %s2613_s29  ;;  %s2563_s29 = scalar_lea.vmem (%p107_p0), %s2300_s24, 1024 }
 0x7b6   :  { %p2564_p1 = scmp.ne.s32.totalorder (%p107_p0), %s2300_s24, %s2563_s29  ;;  %p2569_p3 = scmp.lt.s32.totalorder (%p107_p0), %s2563_s29, %s2563_s29 }
 0x7b8   :  { %p2570_p4 = por (%p107_p0), %p2569_p3, %p2568_p2 }
 0x7ba   : > { %v1106_v63 = vpop.xlane.xlu0 %1105  ;;  %p2571_p5 = pnand (%p107_p0), %p2570_p4, %p2564_p1 }
 0x7bb   : > { %v1107_v40 = vadd.f32 1e-16, %v1106_v63 }
 0x7bd   : > { %2529 = vrcp.f32 %v1107_v40  ;;  %v3601_v40 = vld [vmem:[%s3941_s18 + $0x38] sm:$0xff] }
 0x7ca   : > { %v2530_v34 = vpop.eup %2529 }
 0x7cb   : > { %v1109_v44 = vmul.f32 %v2530_v34, %v3486_v25 }
 0x7cd   : > { %1110 = vst.msk [vmem:[%s3940_s17] sm:$0xff] %vm65_vm2, %v1109_v44  ;;  %v1114_v17 = vrot.slane %v1109_v44, %v3119_v33  ;;  %v1125_v38 = vrot.slane %v1109_v44, %v3215_v49  ;;  %v1136_v16 = vrot.slane %v1109_v44, %v3230_v43  ;;  %v1147_v32 = vrot.slane %v1109_v44, %v3269_v28 }
 0x7ce   : > { %v1158_v25 = vrot.slane %v1109_v44, %v3287_v30  ;;  %v1169_v5 = vrot.slane %v1109_v44, %v3990_v61  ;;  %v1180_v59 = vrot.slane %v1109_v44, %v3991_v4  ;;  %v1191_v45 = vrot.slane %v1109_v44, %v3995_v29 }
 0x7cf   : > { %1116 = vbcast.lane.b32.xlu1 %v1114_v17, 256  ;;  %1127 = vbcast.lane.b32.xlu0 %v1125_v38, 256 }
 0x7d3   : > { %1120 = vbcast.lane.b32.xlu1 %v1114_v17, 264  ;;  %1138 = vbcast.lane.b32.xlu0 %v1136_v16, 256 }
 0x7d7   : > { %1131 = vbcast.lane.b32.xlu1 %v1125_v38, 264  ;;  %1149 = vbcast.lane.b32.xlu0 %v1147_v32, 256  ;;  %v3608_v38 = vld [vmem:[%s3941_s18 + $0x40] sm:$0xff] }
 0x7db   : > { %1142 = vbcast.lane.b32.xlu1 %v1136_v16, 264  ;;  %1160 = vbcast.lane.b32.xlu0 %v1158_v25, 256 }
 0x7df   : > { %1153 = vbcast.lane.b32.xlu1 %v1147_v32, 264  ;;  %1171 = vbcast.lane.b32.xlu0 %v1169_v5, 256 }
 0x7e3   : > { %1164 = vbcast.lane.b32.xlu1 %v1158_v25, 264  ;;  %1182 = vbcast.lane.b32.xlu0 %v1180_v59, 256 }
 0x7e7   : > { %1175 = vbcast.lane.b32.xlu1 %v1169_v5, 264  ;;  %1193 = vbcast.lane.b32.xlu0 %v1191_v45, 256 }
 0x7eb   : > { %1186 = vbcast.lane.b32.xlu1 %v1180_v59, 264 }
 0x7ef   : > { %1197 = vbcast.lane.b32.xlu1 %v1191_v45, 264 }
 0x802   : > { %v1626_v11 = vpop.xlane.xlu1 %1625 }
 0x803   : > { %v1627_v50 = vsub.f32 %v1623_v31, %v1626_v11 }
 0x805   : > { %v1628_v1 = vmul.f32 1.442695, %v1627_v50 }
 0x807   : > { %2531 = vpow2.f32 %v1628_v1 }
 0x814   : > { %v3542_v12 = vpop.eup %2531 }
 0x815   : > { %v1630_v56 = vsel %vm65_vm2, %v3542_v12, 0.0 }
 0x816   : > { %1631 = vadd.xlane.f32.xlu1 %v1630_v56 }
 0x827   : > { %v1296_v24 = vpop.permute.xlu0 %1295  ;;  %1641 = vperm.xlu1 %2459, %v1050_v53  }
 0x828   : > { %v1298_v9 = vsel %vm519_vm4, %v1296_v24, 0.0 }
 0x829   : > { %1299 = vadd.xlane.f32.xlu0 %v1298_v9  ;;  %v3622_v9 = vld [vmem:[%s3941_s18 + $0x50] sm:$0xff] }
 0x82b   : > { %2460 = vset.pattern.permute.xlu1 %v2614_v3 }
 0x83f   : > { %1636 = vperm.xlu0 %2458, %v3393_v35  }
 0x841   : > { %v1128_v0 = vpop.permute.xlu0 %1127  ;;  %v1117_v52 = vpop.permute.xlu1 %1116 }
 0x842   : > { %v1201_v42 = vmul.f32 %v3559_v8, %v1128_v0  ;;  %v1199_v26 = vmul.f32 %v3577_v13, %v1117_v52 }
 0x844   : > { %v1224_v41 = vsel %vm56_vm0, %v1201_v42, 0.0  ;;  %v1215_v22 = vsel %vm56_vm0, %v1199_v26, 0.0  ;;  %v3637_v26 = vld [vmem:[%s3941_s18 + $0x60] sm:$0xff] }
 0x845   : > { %v1139_v14 = vpop.permute.xlu0 %1138  ;;  %v1121_v7 = vpop.permute.xlu1 %1120 }
 0x846   : > { %v1200_v23 = vmul.f32 %v3565_v18, %v1121_v7  ;;  %v1203_v48 = vmul.f32 %v3571_v15, %v1139_v14 }
 0x848   : > { %v1216_v10 = vsel %vm56_vm0, %v1200_v23, 0.0  ;;  %v1233_v2 = vsel %vm56_vm0, %v1203_v48, 0.0 }
 0x849   : > { %v1150_v6 = vpop.permute.xlu0 %1149  ;;  %v1132_v62 = vpop.permute.xlu1 %1131  ;;  %v1217_v44 = vadd.f32 %v1216_v10, %v1215_v22 }
 0x84a   : > { %v1202_v53 = vmul.f32 %v3553_v39, %v1132_v62  ;;  %v1205_v54 = vmul.f32 %v3592_v60, %v1150_v6  ;;  %v3629_v62 = vld [vmem:[%s3941_s18 + $0x58] sm:$0xff] }
 0x84b   : > { %v1218_v50 = vrot.slane %v1217_v44, 4 }
 0x84c   : > { %v1225_v58 = vsel %vm56_vm0, %v1202_v53, 0.0  ;;  %v1242_v17 = vsel %vm56_vm0, %v1205_v54, 0.0 }
 0x84d   : > { %v1161_v51 = vpop.permute.xlu0 %1160  ;;  %v1143_v21 = vpop.permute.xlu1 %1142  ;;  %v1226_v55 = vadd.f32 %v1225_v58, %v1224_v41  ;;  %v1219_v42 = vadd.f32 %v1218_v50, %v1217_v44 }
 0x84e   : > { %v1204_v47 = vmul.f32 %v3584_v19, %v1143_v21  ;;  %v1207_v16 = vmul.f32 %v3608_v38, %v1161_v51  ;;  %v2615_v51 = vmov 45  }
 0x84f   : > { %v1227_v25 = vrot.slane %v1226_v55, 4  ;;  %2464 = vset.pattern.permute.xlu0 %v2615_v51  ;;  %v1220_v22 = vrot.slane %v1219_v42, 2 }
 0x850   : > { %v1234_v31 = vsel %vm56_vm0, %v1204_v47, 0.0  ;;  %v1251_v24 = vsel %vm56_vm0, %v1207_v16, 0.0  ;;  %v3651_v16 = vld [vmem:[%s3941_s18 + $0x70] sm:$0xff] }
 0x851   : > { %v1172_v27 = vpop.permute.xlu0 %1171  ;;  %v1154_v36 = vpop.permute.xlu1 %1153  ;;  %v1235_v63 = vadd.f32 %v1234_v31, %v1233_v2  ;;  %v1228_v52 = vadd.f32 %v1227_v25, %v1226_v55 }
 0x852   : > { %v1206_v34 = vmul.f32 %v3601_v40, %v1154_v36  ;;  %v1209_v3 = vmul.f32 %v3622_v9, %v1172_v27  ;;  %v3644_v27 = vld [vmem:[%s3941_s18 + $0x68] sm:$0xff] }
 0x853   : > { %v1236_v45 = vrot.slane %v1235_v63, 4  ;;  %v1229_v41 = vrot.slane %v1228_v52, 2 }
 0x854   : > { %v1243_v32 = vsel %vm56_vm0, %v1206_v34, 0.0  ;;  %v1260_v21 = vsel %vm56_vm0, %v1209_v3, 0.0 }
 0x855   : > { %v1244_v5 = vadd.f32 %v1243_v32, %v1242_v17  ;;  %v1165_v59 = vpop.permute.xlu1 %1164  ;;  %v1183_v56 = vpop.permute.xlu0 %1182  ;;  %v1237_v6 = vadd.f32 %v1236_v45, %v1235_v63 }
 0x856   : > { %v1208_v11 = vmul.f32 %v3615_v46, %v1165_v59  ;;  %v1211_v58 = vmul.f32 %v3637_v26, %v1183_v56 }
 0x857   : > { %v1245_v1 = vrot.slane %v1244_v5, 4  ;;  %v1238_v55 = vrot.slane %v1237_v6, 2 }
 0x858   : > { %v1252_v0 = vsel %vm56_vm0, %v1208_v11, 0.0  ;;  %v1269_v44 = vsel %vm56_vm0, %v1211_v58, 0.0 }
 0x859   : > { %v1253_v14 = vadd.f32 %v1252_v0, %v1251_v24  ;;  %v1176_v7 = vpop.permute.xlu1 %1175  ;;  %v1246_v23 = vadd.f32 %v1245_v1, %v1244_v5  ;;  %v1194_v54 = vpop.permute.xlu0 %1193  ;;  %v1230_v5 = vadd.f32 %v1229_v41, %v1228_v52  ;;  %v1239_v50 = vadd.f32 %v1238_v55, %v1237_v6  ;;  %v3658_v1 = vld [vmem:[%s3941_s18 + $0x78] sm:$0xff] }
 0x85a   : > { %v1210_v53 = vmul.f32 %v3629_v62, %v1176_v7  ;;  %v1213_v32 = vmul.f32 %v3651_v16, %v1194_v54  ;;  %v1221_v24 = vadd.f32 %v1220_v22, %v1219_v42 }
 0x85b   : > { %v1254_v48 = vrot.slane %v1253_v14, 4  ;;  %v1247_v63 = vrot.slane %v1246_v23, 2 }
 0x85c   : > { %v1261_v47 = vsel %vm56_vm0, %v1210_v53, 0.0  ;;  %v1278_v53 = vsel %vm56_vm0, %v1213_v32, 0.0  ;;  %v1222_v41 = vrot.slane %v1221_v24, 1 }
 0x85d   : > { %v1255_v10 = vadd.f32 %v1254_v48, %v1253_v14  ;;  %v1262_v31 = vadd.f32 %v1261_v47, %v1260_v21  ;;  %v1187_v2 = vpop.permute.xlu1 %1186  ;;  %v1248_v3 = vadd.f32 %v1247_v63, %v1246_v23  ;;  %v1231_v48 = vrot.slane %v1230_v5, 1 }
 0x85e   : > { %v1212_v36 = vmul.f32 %v3644_v27, %v1187_v2  ;;  %v1240_v47 = vrot.slane %v1239_v50, 1 }
 0x85f   : > { %v1263_v34 = vrot.slane %v1262_v31, 4  ;;  %v1256_v17 = vrot.slane %v1255_v10, 2  ;;  %v1249_v54 = vrot.slane %v1248_v3, 1 }
 0x860   : > { %v1270_v25 = vsel %vm56_vm0, %v1212_v36, 0.0  ;;  %v1232_v36 = vadd.f32 %v1231_v48, %v1230_v5  ;;  %v1241_v63 = vadd.f32 %v1240_v47, %v1239_v50 }
 0x861   : > { %v1264_v59 = vadd.f32 %v1263_v34, %v1262_v31  ;;  %v1271_v45 = vadd.f32 %v1270_v25, %v1269_v44  ;;  %v1198_v11 = vpop.permute.xlu1 %1197  ;;  %v1257_v7 = vadd.f32 %v1256_v17, %v1255_v10  ;;  %v1223_v10 = vadd.f32 %v1222_v41, %v1221_v24 }
 0x862   : > { %v1214_v56 = vmul.f32 %v3658_v1, %v1198_v11  ;;  %v1250_v34 = vadd.f32 %v1249_v54, %v1248_v3 }
 0x863   : > { %v1265_v0 = vrot.slane %v1264_v59, 2  ;;  %v1272_v14 = vrot.slane %v1271_v45, 4  ;;  %v1258_v55 = vrot.slane %v1257_v7, 1  ;;  %v2195_v25 = vsel %vm1016_vm10, %v1232_v36, %v1223_v10 }
 0x864   : > { %v1279_v52 = vsel %vm56_vm0, %v1214_v56, 0.0  ;;  %v2196_v11 = vsel %vm1018_vm11, %v1241_v63, %v2195_v25  ;;  %v2616_v36 = vmov 43  }
 0x865   : > { %v1266_v21 = vadd.f32 %v1265_v0, %v1264_v59  ;;  %v1273_v58 = vadd.f32 %v1272_v14, %v1271_v45  ;;  %v1280_v6 = vadd.f32 %v1279_v52, %v1278_v53  ;;  %v1259_v32 = vadd.f32 %v1258_v55, %v1257_v7 }
 0x866   : > { %v2197_v14 = vsel %vm1020_vm12, %v1250_v34, %v2196_v11 }
 0x867   : > { %v1274_v31 = vrot.slane %v1273_v58, 2  ;;  %v1281_v2 = vrot.slane %v1280_v6, 4  ;;  %v1267_v42 = vrot.slane %v1266_v21, 1  ;;  %v2198_v5 = vsel %vm1022_vm13, %v1259_v32, %v2197_v14 }
 0x869   : > { %v1275_v23 = vadd.f32 %v1274_v31, %v1273_v58  ;;  %v1282_v22 = vadd.f32 %v1281_v2, %v1280_v6  ;;  %v1268_v59 = vadd.f32 %v1267_v42, %v1266_v21  ;;  %v2349_v21 = vld [vmem:[%s3940_s17 + $0x8] sm:$0xff]  ;;  %v2617_v42 = vmov 44  }
 0x86b   : > { %v1276_v44 = vrot.slane %v1275_v23, 1  ;;  %v1283_v17 = vrot.slane %v1282_v22, 2  ;;  %v2199_v50 = vsel %vm1024_vm14, %v1268_v59, %v2198_v5 }
 0x86d   : > { %v1284_v45 = vadd.f32 %v1283_v17, %v1282_v22  ;;  %v1277_v56 = vadd.f32 %v1276_v44, %v1275_v23 }
 0x86f   : > { %v1285_v0 = vrot.slane %v1284_v45, 1  ;;  %v2200_v24 = vsel %vm1026_vm15, %v1277_v56, %v2199_v50 }
 0x871   : > { %v1286_v53 = vadd.f32 %v1285_v0, %v1284_v45 }
 0x873   : > { %v2201_v3 = vsel %vm1028_vm3, %v1286_v53, %v2200_v24 }
 0x874   : > { %2203 = vst.msk [vmem:[%s3937_s14] sm:$0xff] %vm56_vm0, %v2201_v3  ;;  %2404 = vmatmul.mubr.msk.f32.vlgmr.msra.gmra.mxu0 %vm56_vm0, %v2201_v3 }
 0x89f   : > { %v1632_v7 = vpop.xlane.xlu1 %1631 }
 0x8a0   : > { %2533 = vrcp.f32 %v1632_v7 }
 0x8a3   : > { %v1642_v58 = vpop.permute.xlu1 %1641 }
 0x8a4   : > { %v1644_v41 = vmul.f32 %v2349_v21, %v1642_v58 }
 0x8ad   : > { %v2534_v48 = vpop.eup %2533 }
 0x8ae   : > { %v1634_v6 = vmul.f32 %v2534_v48, %v3542_v12 }
 0x8b2   : > { %v1300_v52 = vpop.xlane.xlu0 %1299 }
 0x8b3   : > { %2535 = vrcp.f32 %v1300_v52 }
 0x8ba   : > { %v1637_v47 = vpop.permute.xlu0 %1636 }
 0x8bb   : > { %v1639_v54 = vmul.f32 %v1637_v47, %v1634_v6 }
 0x8bd   : > { %v1645_v31 = vadd.f32 %v1644_v41, %v1639_v54 }
 0x8bf   : > { %1657 = vrot.lane.b32.xlu0 %v1645_v31, %s2610_s28  ;;  %s2618_s28 = smov 96  }
 0x8c0   : > { %v2536_v2 = vpop.eup %2535 }
 0x8c1   : > { %v1302_v55 = vmul.f32 %v2536_v2, %v3523_v57  ;;  %v3998_v57 = vld [vmem:[#allocation7_spill] sm:$0xff] }
 0x8c3   : > { %1663 = vperm.xlu1 %2460, %v1302_v55  }
 0x8c7   : > { %2461 = vset.pattern.permute.xlu1 %v2616_v36 }
 0x8c8   : > { %1668 = vperm.xlu1 %2461, %v1302_v55  }
 0x8cc   : > { %2462 = vset.pattern.permute.xlu1 %v2617_v42 }
 0x8cd   : > { %1674 = vperm.xlu1 %2462, %v1302_v55  }
 0x8d1   : > { %1647 = vrot.lane.b32.xlu1 %v1645_v31, %s2606_s25 }
 0x8d2   : > { %2463 = vset.pattern.permute.xlu1 %v2615_v51 }
 0x8d5   : > { %1650 = vrot.lane.b32.xlu1 %v1645_v31, %s2608_s26 }
 0x8d9   : > { %1654 = vrot.lane.b32.xlu1 %v1645_v31, %s2609_s27 }
 0x8dd   : > { %1683 = vperm.xlu1 %2463, %v3453_v37  }
 0x8e1   : > { %407 = vrot.lane.b32.xlu1 %v3998_v57, %s2618_s28 }
 0x931   : > { %v1658_v32 = vpop.permute.xlu0 %1657 }
 0x934   : > { %v2273_v12 = vpop.f32.mrf.mxu0 }
 0x936   : > { %v2405_v23 = vpop.f32.mrf.mxu0 }
 0x93e   : > { %v1664_v22 = vpop.permute.xlu1 %1663 }
 0x943   : > { %v1669_v63 = vpop.permute.xlu1 %1668 }
 0x944   : > { %v1671_v25 = vmul.f32 %v1669_v63, %v1645_v31 }
 0x948   : > { %v1675_v10 = vpop.permute.xlu1 %1674 }
 0x94c   : > { %v1648_v34 = vpop.permute.xlu1 %1647 }
 0x950   : > { %v1651_v44 = vpop.permute.xlu1 %1650 }
 0x951   : > { %v1653_v17 = vsel %vm1065_vm6, %v1648_v34, %v1651_v44 }
 0x952   : > { %v1666_v51 = vmul.f32 %v1664_v22, %v1653_v17 }
 0x954   : > { %v1655_v59 = vpop.permute.xlu1 %1654  ;;  %v1672_v37 = vadd.f32 %v1671_v25, %v1666_v51  ;;  %v1784_v25 = vcombine.high %v3393_v35, %v3393_v35 }
 0x955   : > { %v1660_v45 = vsel %vm1073_vm7, %v1655_v59, %v1658_v32 }
 0x956   : > { %v1677_v11 = vmul.f32 %v1675_v10, %v1660_v45 }
 0x958   : > { %v1678_v56 = vadd.f32 %v1677_v11, %v1672_v37  ;;  %v1684_v0 = vpop.permute.xlu1 %1683 }
 0x95a   : > { %2537 = vlog2.f32 %v1678_v56 }
 0x95c   : > { %v408_v14 = vpop.permute.xlu1 %407 }
 0x95d   : > { %410 = vst.msk [vmem:[%s3939_s16] sm:$0xff] %vm59_vm1, %v408_v14 }
 0x967   : > { %v2538_v5 = vpop.eup %2537 }
 0x968   : > { %v1681_v53 = vmul.f32 0.6931472, %v2538_v5 }
 0x96a   : > { %v1686_v50 = vmul.f32 %v1684_v0, %v1681_v53 }
 0x96c   : > { %v1687_v24 = vmul.f32 1.442695, %v1686_v50 }
 0x96e   : > { %2539 = vpow2.f32 %v1687_v24 }
 0x97b   : > { %v2540_v3 = vpop.eup %2539 }
 0x97c   : > { %v1689_v7 = vsel %vm65_vm2, %v2540_v3, 0.0 }
 0x97d   : > { %1690 = vadd.xlane.f32.xlu0 %v1689_v7 }
 0xa06   : > { %v1691_v52 = vpop.xlane.xlu0 %1690 }
 0xa07   : > { %v1692_v48 = vadd.f32 1e-16, %v1691_v52 }
 0xa09   : > { %2541 = vrcp.f32 %v1692_v48 }
 0xa16   : > { %v2542_v21 = vpop.eup %2541 }
 0xa17   : > { %v1694_v58 = vmul.f32 %v2542_v21, %v2540_v3 }
 0xa19   : > { %2350 = vst.msk [vmem:[%s3940_s17 + $0x8] sm:$0xff] %vm65_vm2, %v1694_v58  ;;  %v1732_v6 = vrot.slane %v1694_v58, %v3269_v28  ;;  %v1699_v47 = vrot.slane %v1694_v58, %v3119_v33  ;;  %v1765_v41 = vrot.slane %v1694_v58, %v3991_v4  ;;  %v1776_v54 = vrot.slane %v1694_v58, %v3995_v29 }
 0xa1a   : > { %v1710_v31 = vrot.slane %v1694_v58, %v3215_v49  ;;  %v1721_v2 = vrot.slane %v1694_v58, %v3230_v43  ;;  %v1743_v28 = vrot.slane %v1694_v58, %v3287_v30  ;;  %v1754_v4 = vrot.slane %v1694_v58, %v3990_v61  ;;  %v3999_v49 = vld [vmem:[#allocation8_spill] sm:$0xff] }
 0xa1b   : > { %1738 = vbcast.lane.b32.xlu0 %v1732_v6, 264  ;;  %1701 = vbcast.lane.b32.xlu1 %v1699_v47, 256  ;;  %v1791_v29 = vrot.slane %v3393_v35, %v3999_v49  ;;  %v1798_v0 = vrot.slane %v1784_v25, %v3999_v49 }
 0xa1d   : > { %v1807_v43 = vrot.slane %v1791_v29, %v3999_v49  ;;  %v1799_v55 = vcombine.high %v1791_v29, %v1791_v29  ;;  %v1814_v3 = vrot.slane %v1798_v0, %v3999_v49  ;;  %v1800_v58 = vcombine.high %v1798_v0, %v1798_v0 }
 0xa1f   : > { %1771 = vbcast.lane.b32.xlu0 %v1765_v41, 264  ;;  %1705 = vbcast.lane.b32.xlu1 %v1699_v47, 264  ;;  %v1836_v36 = vrot.slane %v1807_v43, %v3119_v33  ;;  %v1821_v61 = vrot.slane %v1799_v55, %v3999_v49  ;;  %v1829_v17 = vcombine.high %v1807_v43, %v1807_v43 }
 0xa20   : > { %v1852_v47 = vrot.slane %v1814_v3, %v3119_v33 }
 0xa21   : > { %v1840_v63 = vrot.slane %v1821_v61, %v3119_v33  ;;  %v1844_v45 = vrot.slane %v1829_v17, %v3119_v33  ;;  %v1831_v11 = vcombine.high %v1821_v61, %v1821_v61 }
 0xa23   : > { %1778 = vbcast.lane.b32.xlu0 %v1776_v54, 256  ;;  %1712 = vbcast.lane.b32.xlu1 %v1710_v31, 256  ;;  %v1848_v50 = vrot.slane %v1831_v11, %v3119_v33 }
 0xa27   : > { %1716 = vbcast.lane.b32.xlu1 %v1710_v31, 264  ;;  %v1828_v31 = vrot.slane %v1800_v58, %v3999_v49 }
 0xa29   : > { %v1856_v43 = vrot.slane %v1828_v31, %v3119_v33 }
 0xa2b   : > { %1723 = vbcast.lane.b32.xlu1 %v1721_v2, 256 }
 0xa2f   : > { %1727 = vbcast.lane.b32.xlu1 %v1721_v2, 264 }
 0xa33   : > { %1734 = vbcast.lane.b32.xlu1 %v1732_v6, 256 }
 0xa37   : > { %1745 = vbcast.lane.b32.xlu1 %v1743_v28, 256 }
 0xa3b   : > { %1749 = vbcast.lane.b32.xlu1 %v1743_v28, 264 }
 0xa3f   : > { %1756 = vbcast.lane.b32.xlu1 %v1754_v4, 256 }
 0xa43   : > { %1760 = vbcast.lane.b32.xlu1 %v1754_v4, 264 }
 0xa47   : > { %1767 = vbcast.lane.b32.xlu1 %v1765_v41, 256 }
 0xa4b   : > { %2278 = vrot.lane.b32.xlu1 %v2273_v12, %s2619_s1 }
 0xa4f   : > { %1782 = vbcast.lane.b32.xlu1 %v1776_v54, 264 }
 0xa8d   : > { %v3711_v42 = vpop.permute.xlu1 %1701  ;;  %v3736_v5 = vpop.permute.xlu0 %1738 }
 0xa8e   : > { %v1873_v30 = vmul.f32 %v1836_v36, %v3711_v42  ;;  %v1880_v24 = vmul.f32 %v1848_v50, %v3736_v5 }
 0xa90   : > { %v1995_v57 = vsub.f32 1.0, %v1873_v30  ;;  %v2002_v21 = vsub.f32 1.0, %v1880_v24 }
 0xa91   : > { %v3715_v23 = vpop.permute.xlu1 %1705  ;;  %v3765_v61 = vpop.permute.xlu0 %1771 }
 0xa92   : > { %v1874_v12 = vmul.f32 %v1836_v36, %v3715_v23  ;;  %2027 = vrot.lane.b32.xlu0 %v1995_v57, %s2620_s20  ;;  %v1830_v36 = vcombine.high %v1814_v3, %v1814_v3 }
 0xa94   : > { %v1996_v22 = vsub.f32 1.0, %v1874_v12 }
 0xa95   : > { %v3720_v10 = vpop.permute.xlu1 %1712 }
 0xa96   : > { %v1875_v34 = vmul.f32 %v1840_v63, %v3720_v10  ;;  %2029 = vrot.lane.b32.xlu1 %v1996_v22, %s2620_s20  ;;  %v1860_v22 = vrot.slane %v1830_v36, %v3119_v33 }
 0xa98   : > { %v1997_v44 = vsub.f32 1.0, %v1875_v34 }
 0xa99   : > { %v3724_v51 = vpop.permute.xlu1 %1716 }
 0xa9a   : > { %v1876_v32 = vmul.f32 %v1840_v63, %v3724_v51  ;;  %2031 = vrot.lane.b32.xlu0 %v1997_v44, %s2620_s20  ;;  %v1832_v63 = vcombine.high %v1828_v31, %v1828_v31  ;;  %v1886_v44 = vmul.f32 %v1860_v22, %v3765_v61 }
 0xa9c   : > { %v1998_v59 = vsub.f32 1.0, %v1876_v32  ;;  %v3773_v32 = vpop.permute.xlu0 %1778 }
 0xa9d   : > { %v3731_v37 = vpop.permute.xlu1 %1723 }
 0xa9e   : > { %v1877_v56 = vmul.f32 %v1844_v45, %v3731_v37  ;;  %2033 = vrot.lane.b32.xlu1 %v1998_v59, %s2620_s20  ;;  %v1897_v59 = vrot.slane %v3106_v20, %v3999_v49 }
 0xaa0   : > { %v1999_v14 = vsub.f32 1.0, %v1877_v56  ;;  %v2008_v56 = vsub.f32 1.0, %v1886_v44  ;;  %v1913_v24 = vrot.slane %v1897_v59, %v3999_v49 }
 0xaa1   : > { %v3738_v53 = vpop.permute.xlu1 %1727 }
 0xaa2   : > { %v1878_v35 = vmul.f32 %v1844_v45, %v3738_v53  ;;  %2035 = vrot.lane.b32.xlu0 %v1999_v14, %s2620_s20  ;;  %v1864_v45 = vrot.slane %v1832_v63, %v3119_v33 }
 0xaa4   : > { %v2000_v7 = vsub.f32 1.0, %v1878_v35  ;;  %v1887_v0 = vmul.f32 %v1864_v45, %v3773_v32  ;;  %v1905_v35 = vcombine.high %v1897_v59, %v1897_v59 }
 0xaa5   : > { %v3745_v52 = vpop.permute.xlu1 %1734 }
 0xaa6   : > { %v1879_v48 = vmul.f32 %v1848_v50, %v3745_v52  ;;  %2037 = vrot.lane.b32.xlu1 %v2000_v7, %s2620_s20  ;;  %v2009_v7 = vsub.f32 1.0, %v1887_v0  ;;  %v1927_v58 = vrot.slane %v1905_v35, %v3999_v49 }
 0xaa8   : > { %v2001_v6 = vsub.f32 1.0, %v1879_v48 }
 0xaa9   : > { %v3750_v41 = vpop.permute.xlu1 %1745 }
 0xaaa   : > { %v1881_v54 = vmul.f32 %v1852_v47, %v3750_v41  ;;  %2041 = vrot.lane.b32.xlu1 %v2002_v21, %s2620_s20  ;;  %2039 = vrot.lane.b32.xlu0 %v2001_v6, %s2620_s20  ;;  %v1942_v6 = vrot.slane %v1913_v24, %v3119_v33 }
 0xaac   : > { %v2003_v2 = vsub.f32 1.0, %v1881_v54  ;;  %v1979_v54 = vmul.f32 %v1942_v6, %v3711_v42 }
 0xaad   : > { %v3756_v28 = vpop.permute.xlu1 %1749 }
 0xaae   : > { %v1882_v4 = vmul.f32 %v1852_v47, %v3756_v28  ;;  %2043 = vrot.lane.b32.xlu0 %v2003_v2, %s2620_s20  ;;  %v1890_v2 = vcombine.high %v3106_v20, %v3106_v20 }
 0xab0   : > { %v2004_v29 = vsub.f32 1.0, %v1882_v4  ;;  %v1946_v4 = vrot.slane %v1927_v58, %v3119_v33 }
 0xab1   : > { %v3761_v55 = vpop.permute.xlu1 %1756 }
 0xab2   : > { %v1883_v30 = vmul.f32 %v1856_v43, %v3761_v55  ;;  %2045 = vrot.lane.b32.xlu1 %v2004_v29, %s2620_s20  ;;  %v1935_v29 = vcombine.high %v1913_v24, %v1913_v24  ;;  %v1981_v36 = vmul.f32 %v1946_v4, %v3720_v10 }
 0xab4   : > { %v2005_v57 = vsub.f32 1.0, %v1883_v30  ;;  %v1937_v30 = vcombine.high %v1927_v58, %v1927_v58  ;;  %v1950_v42 = vrot.slane %v1935_v29, %v3119_v33 }
 0xab5   : > { %v3767_v12 = vpop.permute.xlu1 %1760 }
 0xab6   : > { %v1884_v34 = vmul.f32 %v1856_v43, %v3767_v12  ;;  %2047 = vrot.lane.b32.xlu0 %v2005_v57, %s2620_s20  ;;  %v1980_v43 = vmul.f32 %v1942_v6, %v3715_v23  ;;  %v1904_v57 = vrot.slane %v1890_v2, %v3999_v49  ;;  %v1954_v63 = vrot.slane %v1937_v30, %v3119_v33 }
 0xab7   : > { %v1984_v10 = vmul.f32 %v1950_v42, %v3738_v53 }
 0xab8   : > { %v2006_v17 = vsub.f32 1.0, %v1884_v34  ;;  %v1920_v34 = vrot.slane %v1904_v57, %v3999_v49  ;;  %v1906_v23 = vcombine.high %v1904_v57, %v1904_v57  ;;  %v1985_v44 = vmul.f32 %v1954_v63, %v3745_v52 }
 0xab9   : > { %v3775_v25 = vpop.permute.xlu1 %1767 }
 0xaba   : > { %v1885_v11 = vmul.f32 %v1860_v22, %v3775_v25  ;;  %2049 = vrot.lane.b32.xlu1 %v2006_v17, %s2620_s20  ;;  %v1983_v22 = vmul.f32 %v1950_v42, %v3731_v37  ;;  %v1934_v59 = vrot.slane %v1906_v23, %v3999_v49  ;;  %v1986_v37 = vmul.f32 %v1954_v63, %v3736_v5 }
 0xabc   : > { %v2007_v14 = vsub.f32 1.0, %v1885_v11  ;;  %v1962_v0 = vrot.slane %v1934_v59, %v3119_v33 }
 0xabd   : > { %v2279_v50 = vpop.permute.xlu1 %2278 }
 0xabe   : > { %v2281_v3 = vadd.f32 %v2279_v50, %v3106_v20  ;;  %2053 = vrot.lane.b32.xlu1 %v2008_v56, %s2620_s20  ;;  %2051 = vrot.lane.b32.xlu0 %v2007_v14, %s2620_s20  ;;  %v1982_v20 = vmul.f32 %v1946_v4, %v3724_v51  ;;  %v1958_v51 = vrot.slane %v1920_v34, %v3119_v33 }
 0xabf   : > { %v1936_v56 = vcombine.high %v1920_v34, %v1920_v34  ;;  %v1989_v53 = vmul.f32 %v1962_v0, %v3761_v55  ;;  %v1938_v14 = vcombine.high %v1934_v59, %v1934_v59  ;;  %v1990_v5 = vmul.f32 %v1962_v0, %v3767_v12 }
 0xac0   : > { %v2352_v48 = vmul.f32 -1.442695, %v2281_v3  ;;  %v1988_v49 = vmul.f32 %v1958_v51, %v3756_v28 }
 0xac1   : > { %v1783_v21 = vpop.permute.xlu1 %1782  ;;  %v1966_v52 = vrot.slane %v1936_v56, %v3119_v33  ;;  %v1970_v50 = vrot.slane %v1938_v14, %v3119_v33 }
 0xac2   : > { %v1888_v47 = vmul.f32 %v1864_v45, %v1783_v21  ;;  %2055 = vrot.lane.b32.xlu0 %v2009_v7, %s2620_s20  ;;  %2543 = vpow2.f32 %v2352_v48  ;;  %v1987_v45 = vmul.f32 %v1958_v51, %v3750_v41 }
 0xac3   : > { %v1991_v41 = vmul.f32 %v1966_v52, %v3775_v25  ;;  %v1992_v28 = vmul.f32 %v1966_v52, %v3765_v61  ;;  %v1993_v55 = vmul.f32 %v1970_v50, %v3773_v32  ;;  %v1994_v35 = vmul.f32 %v1970_v50, %v1783_v21 }
 0xac4   : > { %v2010_v31 = vsub.f32 1.0, %v1888_v47 }
 0xac6   : > { %2107 = vrot.lane.b32.xlu0 %v1979_v54, %s2618_s28  ;;  %2057 = vrot.lane.b32.xlu1 %v2010_v31, %s2620_s20  ;;  %s2292_s20 = scalar_lea.vmem [#allocation2], %s2339_s22 }
 0xaca   : > { %2111 = vrot.lane.b32.xlu0 %v1981_v36, %s2618_s28  ;;  %2109 = vrot.lane.b32.xlu1 %v1980_v43, %s2618_s28 }
 0xace   : > { %2115 = vrot.lane.b32.xlu0 %v1983_v22, %s2618_s28  ;;  %2113 = vrot.lane.b32.xlu1 %v1982_v20, %s2618_s28 }
 0xacf   : > { %v2544_v17 = vpop.eup %2543 }
 0xad0   : > { %v2285_v11 = vadd.f32 1.0, %v2544_v17 }
 0xad2   : > { %2119 = vrot.lane.b32.xlu0 %v1985_v44, %s2618_s28  ;;  %2117 = vrot.lane.b32.xlu1 %v1984_v10, %s2618_s28  ;;  %2545 = vrcp.f32 %v2285_v11 }
 0xad6   : > { %2123 = vrot.lane.b32.xlu0 %v1987_v45, %s2618_s28  ;;  %2121 = vrot.lane.b32.xlu1 %v1986_v37, %s2618_s28 }
 0xada   : > { %2127 = vrot.lane.b32.xlu0 %v1989_v53, %s2618_s28  ;;  %2125 = vrot.lane.b32.xlu1 %v1988_v49, %s2618_s28 }
 0xade   : > { %2131 = vrot.lane.b32.xlu0 %v1991_v41, %s2618_s28  ;;  %2129 = vrot.lane.b32.xlu1 %v1990_v5, %s2618_s28 }
 0xadf   : > { %v2546_v24 = vpop.eup %2545 }
 0xae2   : > { %2135 = vrot.lane.b32.xlu0 %v1993_v55, %s2618_s28  ;;  %2133 = vrot.lane.b32.xlu1 %v1992_v28, %s2618_s28 }
 0xae6   : > { %2289 = vrot.lane.b32.xlu0 %v2546_v24, %s2621_s21  ;;  %2137 = vrot.lane.b32.xlu1 %v1994_v35, %s2618_s28 }
 0xb04   : > { %v2028_v12 = vpop.permute.xlu0 %2027 }
 0xb05   : > { %v2075_v4 = vmul.f32 %v3577_v13, %v2028_v12 }
 0xb08   : > { %v2030_v33 = vpop.permute.xlu1 %2029 }
 0xb09   : > { %v2076_v30 = vmul.f32 %v3565_v18, %v2030_v33 }
 0xb0c   : > { %v2032_v25 = vpop.permute.xlu0 %2031 }
 0xb0d   : > { %v2077_v57 = vmul.f32 %v3559_v8, %v2032_v25 }
 0xb10   : > { %v2034_v3 = vpop.permute.xlu1 %2033 }
 0xb11   : > { %v2078_v34 = vmul.f32 %v3553_v39, %v2034_v3 }
 0xb14   : > { %v2036_v7 = vpop.permute.xlu0 %2035 }
 0xb15   : > { %v2079_v13 = vmul.f32 %v3571_v15, %v2036_v7 }
 0xb18   : > { %v2038_v48 = vpop.permute.xlu1 %2037 }
 0xb19   : > { %v2080_v44 = vmul.f32 %v3584_v19, %v2038_v48 }
 0xb1c   : > { %v2040_v58 = vpop.permute.xlu0 %2039  ;;  %v2042_v61 = vpop.permute.xlu1 %2041 }
 0xb1d   : > { %v2081_v39 = vmul.f32 %v3592_v60, %v2040_v58  ;;  %v2082_v37 = vmul.f32 %v3601_v40, %v2042_v61 }
 0xb20   : > { %v2044_v6 = vpop.permute.xlu0 %2043 }
 0xb21   : > { %v2083_v19 = vmul.f32 %v3608_v38, %v2044_v6 }
 0xb24   : > { %v2046_v32 = vpop.permute.xlu1 %2045 }
 0xb25   : > { %v2084_v0 = vmul.f32 %v3615_v46, %v2046_v32 }
 0xb28   : > { %v2048_v47 = vpop.permute.xlu0 %2047 }
 0xb29   : > { %v2085_v40 = vmul.f32 %v3622_v9, %v2048_v47 }
 0xb2c   : > { %v2050_v54 = vpop.permute.xlu1 %2049 }
 0xb2d   : > { %v2086_v14 = vmul.f32 %v3629_v62, %v2050_v54 }
 0xb30   : > { %v2052_v31 = vpop.permute.xlu0 %2051  ;;  %v2054_v2 = vpop.permute.xlu1 %2053 }
 0xb31   : > { %v2087_v46 = vmul.f32 %v3637_v26, %v2052_v31  ;;  %v2088_v28 = vmul.f32 %v3644_v27, %v2054_v2 }
 0xb34   : > { %v2056_v21 = vpop.permute.xlu0 %2055 }
 0xb35   : > { %v2089_v62 = vmul.f32 %v3651_v16, %v2056_v21 }
 0xb38   : > { %v2108_v29 = vpop.permute.xlu0 %2107  ;;  %v2058_v43 = vpop.permute.xlu1 %2057 }
 0xb39   : > { %v2155_v36 = vadd.f32 %v2108_v29, %v2075_v4  ;;  %v2090_v12 = vmul.f32 %v3658_v1, %v2058_v43 }
 0xb3b   : > { %2171 = vst.msk [vmem:[%s3941_s18] sm:$0xff] %vm56_vm0, %v2155_v36 }
 0xb3c   : > { %v2112_v42 = vpop.permute.xlu0 %2111  ;;  %v2110_v20 = vpop.permute.xlu1 %2109 }
 0xb3d   : > { %v2157_v22 = vadd.f32 %v2112_v42, %v2077_v57  ;;  %v2156_v63 = vadd.f32 %v2110_v20, %v2076_v30 }
 0xb3f   : > { %2173 = vst.msk [vmem:[%s3941_s18 + $0x10] sm:$0xff] %vm56_vm0, %v2157_v22  ;;  %2172 = vst.msk [vmem:[%s3941_s18 + $0x8] sm:$0xff] %vm56_vm0, %v2156_v63 }
 0xb40   : > { %v2116_v8 = vpop.permute.xlu0 %2115  ;;  %v2114_v18 = vpop.permute.xlu1 %2113 }
 0xb41   : > { %v2159_v23 = vadd.f32 %v2116_v8, %v2079_v13  ;;  %v2158_v10 = vadd.f32 %v2114_v18, %v2078_v34 }
 0xb43   : > { %2175 = vst.msk [vmem:[%s3941_s18 + $0x20] sm:$0xff] %vm56_vm0, %v2159_v23  ;;  %2174 = vst.msk [vmem:[%s3941_s18 + $0x18] sm:$0xff] %vm56_vm0, %v2158_v10 }
 0xb44   : > { %v2120_v15 = vpop.permute.xlu0 %2119  ;;  %v2118_v17 = vpop.permute.xlu1 %2117 }
 0xb45   : > { %v2161_v59 = vadd.f32 %v2120_v15, %v2081_v39  ;;  %v2160_v51 = vadd.f32 %v2118_v17, %v2080_v44 }
 0xb47   : > { %2177 = vst.msk [vmem:[%s3941_s18 + $0x30] sm:$0xff] %vm56_vm0, %v2161_v59  ;;  %2176 = vst.msk [vmem:[%s3941_s18 + $0x28] sm:$0xff] %vm56_vm0, %v2160_v51 }
 0xb48   : > { %v2124_v60 = vpop.permute.xlu0 %2123  ;;  %v2122_v45 = vpop.permute.xlu1 %2121 }
 0xb49   : > { %v2163_v11 = vadd.f32 %v2124_v60, %v2083_v19  ;;  %v2162_v56 = vadd.f32 %v2122_v45, %v2082_v37 }
 0xb4b   : > { %2179 = vst.msk [vmem:[%s3941_s18 + $0x40] sm:$0xff] %vm56_vm0, %v2163_v11  ;;  %2178 = vst.msk [vmem:[%s3941_s18 + $0x38] sm:$0xff] %vm56_vm0, %v2162_v56 }
 0xb4c   : > { %v2128_v38 = vpop.permute.xlu0 %2127  ;;  %v2126_v49 = vpop.permute.xlu1 %2125 }
 0xb4d   : > { %v2165_v53 = vadd.f32 %v2128_v38, %v2085_v40  ;;  %v2164_v52 = vadd.f32 %v2126_v49, %v2084_v0 }
 0xb4f   : > { %2181 = vst.msk [vmem:[%s3941_s18 + $0x50] sm:$0xff] %vm56_vm0, %v2165_v53  ;;  %2180 = vst.msk [vmem:[%s3941_s18 + $0x48] sm:$0xff] %vm56_vm0, %v2164_v52 }
 0xb50   : > { %v2132_v9 = vpop.permute.xlu0 %2131  ;;  %v2130_v5 = vpop.permute.xlu1 %2129 }
 0xb51   : > { %v2167_v41 = vadd.f32 %v2132_v9, %v2087_v46  ;;  %v2166_v50 = vadd.f32 %v2130_v5, %v2086_v14 }
 0xb53   : > { %2183 = vst.msk [vmem:[%s3941_s18 + $0x60] sm:$0xff] %vm56_vm0, %v2167_v41  ;;  %2182 = vst.msk [vmem:[%s3941_s18 + $0x58] sm:$0xff] %vm56_vm0, %v2166_v50 }
 0xb54   : > { %v2136_v26 = vpop.permute.xlu0 %2135  ;;  %v2134_v55 = vpop.permute.xlu1 %2133 }
 0xb55   : > { %v2169_v35 = vadd.f32 %v2136_v26, %v2089_v62  ;;  %v2168_v24 = vadd.f32 %v2134_v55, %v2088_v28 }
 0xb57   : > { %2185 = vst.msk [vmem:[%s3941_s18 + $0x70] sm:$0xff] %vm56_vm0, %v2169_v35  ;;  %2184 = vst.msk [vmem:[%s3941_s18 + $0x68] sm:$0xff] %vm56_vm0, %v2168_v24  ;;  %109 = sbr.rel (!%p107_p0) target bundleno = 53 (0x35), region = 126 }
 0xb58   : > { %v2290_v27 = vpop.permute.xlu0 %2289  ;;  %v2138_v16 = vpop.permute.xlu1 %2137 }
 0xb59   : > { %2293 = vst.msk [vmem:[%s2292_s20] sm:$0xff] %vm56_vm0, %v2290_v27  ;;  %v2170_v33 = vadd.f32 %v2138_v16, %v2090_v12 }
 0xb5b   : > { %2186 = vst.msk [vmem:[%s3941_s18 + $0x78] sm:$0xff] %vm56_vm0, %v2170_v33 }
 0xb5c   :  { %2574 = shalt.err (!%p2571_p5)
}
 0xb5d   :  { %s2623_s22 = smov 128   ;;  %s2624_s23 = smov 8  }
 0xb5e   :  { %2305 = dma.vmem_to_hbm [thread:$0]  %s2300_s24, 1024, %s3936_s13, [#allocation3], %s2623_s22, %s2623_s22, %s2624_s23  }
 0xb5f   :  { %2587 = dma.done.wait [#allocation3], 1024  }
 0xb60   :  { %2588 = vsyncadd [#allocation3], 4294966272 }
 0xb61   :  { %2329 = vsyncpa [#allocation3], 1 }

</bundles_post_ra>
